<compile_context>
chip_gen: v7x
topology: tpu7x:2x2x1
jax: 0.10.0
libtpu: 0.0.40
codegen_flags: <defaults>
</compile_context>

<pallas_src>
import functools
import math

import jax
import jax.numpy as jnp
from jax.experimental import pallas as pl
from jax.experimental.pallas import tpu as pltpu


# ----------------------------------------------------------------------------
# Fused decoder kernel
# ----------------------------------------------------------------------------
def _layernorm(y, g, b, eps):
    mean = jnp.mean(y, axis=-1, keepdims=True)
    c = y - mean
    var = jnp.mean(c * c, axis=-1, keepdims=True)
    return c * jax.lax.rsqrt(var + eps) * g + b


def _decoder_kernel(x_ref, mem_ref,
                    sa_in_w, sa_in_b, sa_out_w, sa_out_b,
                    ca_q_w, ca_q_b, ca_kv_w, ca_kv_b, ca_out_w, ca_out_b,
                    w1, b1, w2, b2,
                    ln1_g, ln1_b, ln2_g, ln2_b, ln3_g, ln3_b,
                    head_w, head_b,
                    o_ref, x_scr,
                    *, num_heads, eps):
    """One grid step == one decoder layer; x carried in VMEM scratch."""
    l = pl.program_id(0)

    @pl.when(l == 0)
    def _():
        x_scr[...] = x_ref[...]          # load residual stream once

    B, S, D = x_scr.shape
    Sm = mem_ref.shape[1]
    H = num_heads
    hd = D // H
    M = B * S
    scale = 1.0 / math.sqrt(hd)
    bf16 = jnp.bfloat16

    # causal mask generated in-kernel (no HBM input / per-step DMA)
    rows = jax.lax.broadcasted_iota(jnp.int32, (S, S), 0)
    cols = jax.lax.broadcasted_iota(jnp.int32, (S, S), 1)
    causal = jnp.where(cols > rows, jnp.float32(-1e30), jnp.float32(0.0))

    def mha(q, k, v, out_w_bf, out_b, mask):
        # q: (B, Sq, D) f32 (scale already folded in); k, v: (B, Sk, D) f32
        Sq = q.shape[1]
        q_bf = q.astype(bf16)
        k_bf = k.astype(bf16)
        v_bf = v.astype(bf16)
        acc = jnp.zeros((B * Sq, D), jnp.float32)
        # NOTE: hd=8 lane slices per head are sub-vreg extractions; fine at
        # D=32 — regroup weight columns / use ref slices if d_model scales.
        for h in range(H):
            lo, hi = h * hd, (h + 1) * hd
            s = jnp.einsum('bqd,bkd->bqk', q_bf[:, :, lo:hi], k_bf[:, :, lo:hi],
                           preferred_element_type=jnp.float32)
            if mask is not None:
                s = s + mask
            s = s - jnp.max(s, axis=-1, keepdims=True)
            p = jnp.exp(s)
            p = p * pl.reciprocal(jnp.sum(p, axis=-1, keepdims=True),
                                  approx=True)
            oh = jnp.einsum('bqk,bkd->bqd', p.astype(bf16), v_bf[:, :, lo:hi],
                            preferred_element_type=jnp.float32)
            # accumulate the output projection per head (no head concat)
            acc = acc + jnp.dot(oh.reshape(B * Sq, hd).astype(bf16),
                                out_w_bf[lo:hi, :],
                                preferred_element_type=jnp.float32)
        return acc.reshape(B, Sq, D) + out_b

    x = x_scr[...]                                           # (B, S, D) f32
    mem_bf = mem_ref[...].reshape(B * Sm, D).astype(bf16)

    # ---- self-attention block: fused (M,D)@(D,3D) QKV, residual + LN ----
    x2_bf = x.reshape(M, D).astype(bf16)
    qkv = jnp.dot(x2_bf, sa_in_w[0],
                  preferred_element_type=jnp.float32) + sa_in_b[0]
    q = (qkv[:, :D] * scale).reshape(B, S, D)
    k = qkv[:, D:2 * D].reshape(B, S, D)
    v = qkv[:, 2 * D:].reshape(B, S, D)
    x = _layernorm(x + mha(q, k, v, sa_out_w[0], sa_out_b[0], causal),
                   ln1_g[0], ln1_b[0], eps)

    # ---- cross-attention block: pre-split q / kv weights, no mask ----
    x2_bf = x.reshape(M, D).astype(bf16)
    q = (jnp.dot(x2_bf, ca_q_w[0],
                 preferred_element_type=jnp.float32) + ca_q_b[0]) * scale
    q = q.reshape(B, S, D)
    kv = jnp.dot(mem_bf, ca_kv_w[0],
                 preferred_element_type=jnp.float32) + ca_kv_b[0]
    k = kv[:, :D].reshape(B, Sm, D)
    v = kv[:, D:].reshape(B, Sm, D)
    x = _layernorm(x + mha(q, k, v, ca_out_w[0], ca_out_b[0], None),
                   ln2_g[0], ln2_b[0], eps)

    # ---- feed-forward block: exact erf-GELU, intermediate stays on-chip ----
    x2_bf = x.reshape(M, D).astype(bf16)
    h = jnp.dot(x2_bf, w1[0], preferred_element_type=jnp.float32) + b1[0]
    h = 0.5 * h * (1.0 + jax.lax.erf(h * (1.0 / math.sqrt(2.0))))
    y = jnp.dot(h.astype(bf16), w2[0],
                preferred_element_type=jnp.float32) + b2[0]
    x = _layernorm(x + y.reshape(B, S, D), ln3_g[0], ln3_b[0], eps)

    x_scr[...] = x                       # carry residual stream to next layer

    # ---- head projection folded into the last layer step (lane-dense 128) ----
    @pl.when(l == pl.num_programs(0) - 1)
    def _():
        logits = (jnp.dot(x.reshape(M, D).astype(bf16), head_w[...],
                          preferred_element_type=jnp.float32) + head_b[...])
        o_ref[...] = logits.reshape(B, S, head_w.shape[1])


# ----------------------------------------------------------------------------
# Wrapper: stack weights, build specs, single pallas_call
# ----------------------------------------------------------------------------
def pallas_forward(tgt_tokens, memory, params, num_heads):
    B, S = tgt_tokens.shape
    emb = params["embedding"]
    D = emb.shape[1]
    Sm = memory.shape[1]
    layers = params["layers"]
    L = len(layers)
    F = layers[0]["ffn_w1"].shape[1]
    N = params["head_w"].shape[1]
    Npad = ((N + 127) // 128) * 128
    bf16 = jnp.bfloat16
    assert D % num_heads == 0

    # Embedding lookup * sqrt(d_model) + sinusoidal PE (plain-JAX glue;
    # dropout is the identity in eval mode).
    x = jnp.take(emb, tgt_tokens, axis=0) * math.sqrt(D)
    x = x + params["pe"][:S][None, :, :]

    def stack(name):
        return jnp.stack([p[name] for p in layers])

    # Per-layer weights stacked on a leading layer axis; matmul weights bf16.
    sa_in_w = stack("sa_in_w").astype(bf16)                    # (L, D, 3D)
    sa_in_b = stack("sa_in_b").reshape(L, 1, 3 * D)
    sa_out_w = stack("sa_out_w").astype(bf16)                  # (L, D, D)
    sa_out_b = stack("sa_out_b").reshape(L, 1, D)
    ca_in_w = stack("ca_in_w")
    ca_q_w = ca_in_w[:, :, :D].astype(bf16)                    # (L, D, D)
    ca_kv_w = ca_in_w[:, :, D:].astype(bf16)                   # (L, D, 2D)
    ca_in_b = stack("ca_in_b")
    ca_q_b = ca_in_b[:, :D].reshape(L, 1, D)
    ca_kv_b = ca_in_b[:, D:].reshape(L, 1, 2 * D)
    ca_out_w = stack("ca_out_w").astype(bf16)
    ca_out_b = stack("ca_out_b").reshape(L, 1, D)
    w1 = stack("ffn_w1").astype(bf16)                          # (L, D, F)
    b1 = stack("ffn_b1").reshape(L, 1, F)
    w2 = stack("ffn_w2").astype(bf16)                          # (L, F, D)
    b2 = stack("ffn_b2").reshape(L, 1, D)
    ln1_g = stack("ln1_g").reshape(L, 1, D)
    ln1_b = stack("ln1_b").reshape(L, 1, D)
    ln2_g = stack("ln2_g").reshape(L, 1, D)
    ln2_b = stack("ln2_b").reshape(L, 1, D)
    ln3_g = stack("ln3_g").reshape(L, 1, D)
    ln3_b = stack("ln3_b").reshape(L, 1, D)

    # lane-dense head: pad N up to a multiple of 128, slice valid cols after
    head_w = jnp.pad(params["head_w"], ((0, 0), (0, Npad - N))).astype(bf16)
    head_b = jnp.pad(params["head_b"], (0, Npad - N)).reshape(1, Npad)

    operands = (x, memory, sa_in_w, sa_in_b, sa_out_w, sa_out_b,
                ca_q_w, ca_q_b, ca_kv_w, ca_kv_b, ca_out_w, ca_out_b,
                w1, b1, w2, b2,
                ln1_g, ln1_b, ln2_g, ln2_b, ln3_g, ln3_b,
                head_w, head_b)

    def layer_spec(*shape):
        return pl.BlockSpec((1,) + shape, lambda l: (l,) + (0,) * len(shape))

    def const_spec(*shape):
        return pl.BlockSpec(shape, lambda l: (0,) * len(shape))

    in_specs = [
        const_spec(B, S, D),            # x (residual stream, loaded at l==0)
        const_spec(B, Sm, D),           # encoder memory
        layer_spec(D, 3 * D), layer_spec(1, 3 * D),       # sa in proj
        layer_spec(D, D), layer_spec(1, D),               # sa out proj
        layer_spec(D, D), layer_spec(1, D),               # ca q proj
        layer_spec(D, 2 * D), layer_spec(1, 2 * D),       # ca kv proj
        layer_spec(D, D), layer_spec(1, D),               # ca out proj
        layer_spec(D, F), layer_spec(1, F),               # ffn w1
        layer_spec(F, D), layer_spec(1, D),               # ffn w2
        layer_spec(1, D), layer_spec(1, D),               # ln1
        layer_spec(1, D), layer_spec(1, D),               # ln2
        layer_spec(1, D), layer_spec(1, D),               # ln3
        const_spec(D, Npad), const_spec(1, Npad),         # head
    ]

    # advisory cost estimate: lets XLA overlap the gather / PE add with the call
    M = B * S
    hd = D // num_heads
    flops_layer = (2 * M * D * 3 * D + 2 * M * D * D
                   + 4 * B * num_heads * S * S * hd
                   + 2 * M * D * D + 4 * B * Sm * D * D + 2 * M * D * D
                   + 4 * B * num_heads * S * Sm * hd
                   + 4 * M * D * F)
    flops = L * flops_layer + 2 * M * D * Npad
    transcendentals = L * (B * num_heads * (S * S + S * Sm) + M * F)
    bytes_accessed = (sum(int(a.size) * a.dtype.itemsize for a in operands)
                      + B * S * Npad * 4)

    kernel = functools.partial(_decoder_kernel, num_heads=num_heads, eps=1e-5)

    out = pl.pallas_call(
        kernel,
        out_shape=jax.ShapeDtypeStruct((B, S, Npad), jnp.float32),
        grid=(L,),                       # sequential over layers (x is carried)
        in_specs=in_specs,
        out_specs=const_spec(B, S, Npad),
        scratch_shapes=[pltpu.VMEM((B, S, D), jnp.float32)],
        compiler_params=pltpu.CompilerParams(
            dimension_semantics=("arbitrary",)),
        cost_estimate=pl.CostEstimate(flops=flops,
                                      transcendentals=transcendentals,
                                      bytes_accessed=bytes_accessed),
    )(*operands)
    return out[:, :, :N]


# ----------------------------------------------------------------------------
# Pure-jnp f32 reference (for numerical check)
# ----------------------------------------------------------------------------
def ref_forward(tgt_tokens, memory, params, num_heads):
    B, S = tgt_tokens.shape
    D = params["embedding"].shape[1]
    H = num_heads
    hd = D // H
    Sm = memory.shape[1]

    x = jnp.take(params["embedding"], tgt_tokens, axis=0) * math.sqrt(D)
    x = x + params["pe"][:S][None, :, :]
    causal = jnp.where(jnp.arange(S)[None, :] > jnp.arange(S)[:, None],
                       jnp.float32(-1e30), jnp.float32(0.0))

    def ln(y, g, b, eps=1e-5):
        m = jnp.mean(y, -1, keepdims=True)
        v = jnp.mean((y - m) ** 2, -1, keepdims=True)
        return (y - m) * jax.lax.rsqrt(v + eps) * g + b

    def mha(xq, xkv, in_w, in_b, out_w, out_b, mask):
        q = xq @ in_w[:, :D] + in_b[:D]
        k = xkv @ in_w[:, D:2 * D] + in_b[D:2 * D]
        v = xkv @ in_w[:, 2 * D:] + in_b[2 * D:]

        def split(t):
            Bq, Sx, _ = t.shape
            return t.reshape(Bq, Sx, H, hd).transpose(0, 2, 1, 3)

        qh, kh, vh = split(q), split(k), split(v)
        s = jnp.einsum("bhqd,bhkd->bhqk", qh, kh) / math.sqrt(hd)
        s = s + mask[None, None]
        p = jax.nn.softmax(s, axis=-1)
        o = jnp.einsum("bhqk,bhkd->bhqd", p, vh)
        o = o.transpose(0, 2, 1, 3).reshape(xq.shape[0], -1, D)
        return o @ out_w + out_b

    for p in params["layers"]:
        x = ln(x + mha(x, x, p["sa_in_w"], p["sa_in_b"],
                       p["sa_out_w"], p["sa_out_b"], causal),
               p["ln1_g"], p["ln1_b"])
        x = ln(x + mha(x, memory, p["ca_in_w"], p["ca_in_b"],
                       p["ca_out_w"], p["ca_out_b"],
                       jnp.zeros((S, Sm), jnp.float32)),
               p["ln2_g"], p["ln2_b"])
        h = x @ p["ffn_w1"] + p["ffn_b1"]
        h = 0.5 * h * (1.0 + jax.lax.erf(h / math.sqrt(2.0)))
        x = ln(x + h @ p["ffn_w2"] + p["ffn_b2"], p["ln3_g"], p["ln3_b"])

    return x @ params["head_w"] + params["head_b"]


# ----------------------------------------------------------------------------
# Deterministic parameter initialization (shapes from __init__)
# ----------------------------------------------------------------------------
def init_params(key, d_model, num_layers, num_heads, num_classes, dim_ff,
                max_len=64):
    def nrm(k, shape, scale=0.02):
        return scale * jax.random.normal(k, shape, jnp.float32)

    keys = jax.random.split(key, num_layers * 12 + 3)
    ki = iter(keys)

    layers = []
    for _ in range(num_layers):
        layers.append(dict(
            sa_in_w=nrm(next(ki), (d_model, 3 * d_model)),
            sa_in_b=nrm(next(ki), (3 * d_model,)),
            sa_out_w=nrm(next(ki), (d_model, d_model)),
            sa_out_b=nrm(next(ki), (d_model,)),
            ca_in_w=nrm(next(ki), (d_model, 3 * d_model)),
            ca_in_b=nrm(next(ki), (3 * d_model,)),
            ca_out_w=nrm(next(ki), (d_model, d_model)),
            ca_out_b=nrm(next(ki), (d_model,)),
            ln1_g=jnp.ones((d_model,), jnp.float32),
            ln1_b=jnp.zeros((d_model,), jnp.float32),
            ln2_g=jnp.ones((d_model,), jnp.float32),
            ln2_b=jnp.zeros((d_model,), jnp.float32),
            ln3_g=jnp.ones((d_model,), jnp.float32),
            ln3_b=jnp.zeros((d_model,), jnp.float32),
            ffn_w1=nrm(next(ki), (d_model, dim_ff)),
            ffn_b1=nrm(next(ki), (dim_ff,)),
            ffn_w2=nrm(next(ki), (dim_ff, d_model)),
            ffn_b2=nrm(next(ki), (d_model,)),
        ))

    embedding = nrm(next(ki), (num_classes, d_model), scale=1.0)
    head_w = nrm(next(ki), (d_model, num_classes))
    head_b = nrm(next(ki), (num_classes,))

    # sinusoidal positional encoding
    pos = jnp.arange(max_len, dtype=jnp.float32)[:, None]
    div = jnp.exp(jnp.arange(0, d_model, 2, dtype=jnp.float32)
                  * (-math.log(10000.0) / d_model))
    pe = jnp.zeros((max_len, d_model), jnp.float32)
    pe = pe.at[:, 0::2].set(jnp.sin(pos * div))
    pe = pe.at[:, 1::2].set(jnp.cos(pos * div))

    return {"embedding": embedding, "pe": pe, "layers": layers,
            "head_w": head_w, "head_b": head_b}


# ----------------------------------------------------------------------------
if __name__ == "__main__":
    d_model, num_layers, num_heads, num_classes = 32, 2, 4, 10
    dim_ff = 2048  # nn.TransformerDecoderLayer default dim_feedforward
    B, S, Sm = 2, 8, 8

    root = jax.random.PRNGKey(0)
    kp, kt, km = jax.random.split(root, 3)
    params = init_params(kp, d_model, num_layers, num_heads, num_classes,
                         dim_ff)
    tgt = jax.random.randint(kt, (B, S), 0, num_classes, dtype=jnp.int32)
    encoder_outputs = jax.random.normal(km, (B, Sm, d_model), jnp.float32)

    fwd = jax.jit(lambda t, m, p: pallas_forward(t, m, p, num_heads))
    ref = jax.jit(lambda t, m, p: ref_forward(t, m, p, num_heads))

    out = jax.block_until_ready(fwd(tgt, encoder_outputs, params))
    expected = jax.block_until_ready(ref(tgt, encoder_outputs, params))

    assert out.shape == (B, S, num_classes), out.shape
    assert bool(jnp.all(jnp.isfinite(out)))
    # bf16 matmul operands + approx softmax reciprocal vs exact-f32 reference.
    assert bool(jnp.allclose(out, expected, atol=2e-2, rtol=2e-2)), (
        float(jnp.max(jnp.abs(out - expected))))

    # TODO(synk): dropout (p=0.3 / p=0.1) is identity here (eval-mode semantics).
    print("KERNEL_OK")
</pallas_src>

<mosaic_0001>
module attributes {stable_mosaic.version = 11 : i64} {
  func.func @_decoder_kernel(%arg0: i32, %arg1: memref<2x8x32xf32, #tpu.memory_space<vmem>>, %arg2: memref<2x8x32xf32, #tpu.memory_space<vmem>>, %arg3: memref<1x32x96xbf16, #tpu.memory_space<vmem>>, %arg4: memref<1x1x96xf32, #tpu.memory_space<vmem>>, %arg5: memref<1x32x32xbf16, #tpu.memory_space<vmem>>, %arg6: memref<1x1x32xf32, #tpu.memory_space<vmem>>, %arg7: memref<1x32x32xbf16, #tpu.memory_space<vmem>>, %arg8: memref<1x1x32xf32, #tpu.memory_space<vmem>>, %arg9: memref<1x32x64xbf16, #tpu.memory_space<vmem>>, %arg10: memref<1x1x64xf32, #tpu.memory_space<vmem>>, %arg11: memref<1x32x32xbf16, #tpu.memory_space<vmem>>, %arg12: memref<1x1x32xf32, #tpu.memory_space<vmem>>, %arg13: memref<1x32x2048xbf16, #tpu.memory_space<vmem>>, %arg14: memref<1x1x2048xf32, #tpu.memory_space<vmem>>, %arg15: memref<1x2048x32xbf16, #tpu.memory_space<vmem>>, %arg16: memref<1x1x32xf32, #tpu.memory_space<vmem>>, %arg17: memref<1x1x32xf32, #tpu.memory_space<vmem>>, %arg18: memref<1x1x32xf32, #tpu.memory_space<vmem>>, %arg19: memref<1x1x32xf32, #tpu.memory_space<vmem>>, %arg20: memref<1x1x32xf32, #tpu.memory_space<vmem>>, %arg21: memref<1x1x32xf32, #tpu.memory_space<vmem>>, %arg22: memref<1x1x32xf32, #tpu.memory_space<vmem>>, %arg23: memref<32x128xbf16, #tpu.memory_space<vmem>>, %arg24: memref<1x128xf32, #tpu.memory_space<vmem>>, %arg25: memref<2x8x128xf32, #tpu.memory_space<vmem>>, %arg26: memref<2x8x32xf32, #tpu.memory_space<vmem>>) attributes {dimension_semantics = [#tpu.dimension_semantics<arbitrary>], iteration_bounds = array<i64: 2>, scalar_prefetch = 0 : i64, scratch_operands = 1 : i64, tpu.core_type = #tpu.core_type<tc>, window_params = [{pipeline_mode = #tpu.pipeline_mode<synchronous>, transform_indices = @transform_0, window_bounds = array<i64: 2, 8, 32>}, {pipeline_mode = #tpu.pipeline_mode<synchronous>, transform_indices = @transform_1, window_bounds = array<i64: 2, 8, 32>}, {transform_indices = @transform_2, window_bounds = array<i64: 1, 32, 96>}, {transform_indices = @transform_3, window_bounds = array<i64: 1, 1, 96>}, {transform_indices = @transform_4, window_bounds = array<i64: 1, 32, 32>}, {transform_indices = @transform_5, window_bounds = array<i64: 1, 1, 32>}, {transform_indices = @transform_6, window_bounds = array<i64: 1, 32, 32>}, {transform_indices = @transform_7, window_bounds = array<i64: 1, 1, 32>}, {transform_indices = @transform_8, window_bounds = array<i64: 1, 32, 64>}, {transform_indices = @transform_9, window_bounds = array<i64: 1, 1, 64>}, {transform_indices = @transform_10, window_bounds = array<i64: 1, 32, 32>}, {transform_indices = @transform_11, window_bounds = array<i64: 1, 1, 32>}, {transform_indices = @transform_12, window_bounds = array<i64: 1, 32, 2048>}, {transform_indices = @transform_13, window_bounds = array<i64: 1, 1, 2048>}, {transform_indices = @transform_14, window_bounds = array<i64: 1, 2048, 32>}, {transform_indices = @transform_15, window_bounds = array<i64: 1, 1, 32>}, {transform_indices = @transform_16, window_bounds = array<i64: 1, 1, 32>}, {transform_indices = @transform_17, window_bounds = array<i64: 1, 1, 32>}, {transform_indices = @transform_18, window_bounds = array<i64: 1, 1, 32>}, {transform_indices = @transform_19, window_bounds = array<i64: 1, 1, 32>}, {transform_indices = @transform_20, window_bounds = array<i64: 1, 1, 32>}, {transform_indices = @transform_21, window_bounds = array<i64: 1, 1, 32>}, {pipeline_mode = #tpu.pipeline_mode<synchronous>, transform_indices = @transform_22, window_bounds = array<i64: 32, 128>}, {pipeline_mode = #tpu.pipeline_mode<synchronous>, transform_indices = @transform_23, window_bounds = array<i64: 1, 128>}, {pipeline_mode = #tpu.pipeline_mode<synchronous>, transform_indices = @transform_24, window_bounds = array<i64: 2, 8, 128>}]} {
    %c0_i32 = arith.constant 0 : i32
    %0 = arith.cmpi eq, %arg0, %c0_i32 : i32
    %1 = arith.extui %0 : i1 to i32
    %c0_i32_0 = arith.constant 0 : i32
    %2 = arith.cmpi ne, %1, %c0_i32_0 : i32
    scf.if %2 {
      %c0_138 = arith.constant 0 : index
      %c0_139 = arith.constant 0 : index
      %c0_140 = arith.constant 0 : index
      %368 = vector.load %arg1[%c0_138, %c0_139, %c0_140] : memref<2x8x32xf32, #tpu.memory_space<vmem>>, vector<2x8x32xf32>
      %c0_141 = arith.constant 0 : index
      %c0_142 = arith.constant 0 : index
      %c0_143 = arith.constant 0 : index
      %369 = vector.load %arg26[%c0_141, %c0_142, %c0_143] : memref<2x8x32xf32, #tpu.memory_space<vmem>>, vector<2x8x32xf32>
      tpu.vector_store %arg26[%c0_141, %c0_142, %c0_143], %368 {strides = array<i32>} : memref<2x8x32xf32, #tpu.memory_space<vmem>>, vector<2x8x32xf32>,
    } else {
    }
    %3 = tpu.iota {dimensions = array<i32: 0>} : vector<8x8xi32>
    %4 = tpu.iota {dimensions = array<i32: 1>} : vector<8x8xi32>
    %5 = arith.cmpi sgt, %4, %3 : vector<8x8xi32>
    %cst = arith.constant -1.000000e+30 : f32
    %cst_1 = arith.constant 0.000000e+00 : f32
    %6 = vector.broadcast %cst : f32 to vector<8x8xf32>
    %7 = vector.broadcast %cst_1 : f32 to vector<8x8xf32>
    %8 = arith.select %5, %6, %7 : vector<8x8xi1>, vector<8x8xf32>
    %c0 = arith.constant 0 : index
    %c0_2 = arith.constant 0 : index
    %c0_3 = arith.constant 0 : index
    %9 = vector.load %arg26[%c0, %c0_2, %c0_3] : memref<2x8x32xf32, #tpu.memory_space<vmem>>, vector<2x8x32xf32>
    %c0_4 = arith.constant 0 : index
    %c0_5 = arith.constant 0 : index
    %c0_6 = arith.constant 0 : index
    %10 = vector.load %arg2[%c0_4, %c0_5, %c0_6] : memref<2x8x32xf32, #tpu.memory_space<vmem>>, vector<2x8x32xf32>
    %11 = vector.shape_cast %10 : vector<2x8x32xf32> to vector<16x32xf32>
    %12 = arith.truncf %11 : vector<16x32xf32> to vector<16x32xbf16>
    %13 = vector.shape_cast %9 : vector<2x8x32xf32> to vector<16x32xf32>
    %14 = arith.truncf %13 : vector<16x32xf32> to vector<16x32xbf16>
    %c0_7 = arith.constant 0 : index
    %c0_8 = arith.constant 0 : index
    %c0_9 = arith.constant 0 : index
    %15 = vector.load %arg3[%c0_7, %c0_8, %c0_9] : memref<1x32x96xbf16, #tpu.memory_space<vmem>>, vector<1x32x96xbf16>
    %16 = vector.shape_cast %15 : vector<1x32x96xbf16> to vector<32x96xbf16>
    %cst_10 = arith.constant dense<0.000000e+00> : vector<16x96xf32>
    %17 = tpu.matmul %14, %16, %cst_10 {dimension_numbers = #tpu.dot_dimension_numbers<[1], [0], [0], [1], [0, 0, 1, 1], [], []>} : vector<16x32xbf16>, vector<32x96xbf16>, vector<16x96xf32> -> vector<16x96xf32>
    %c0_11 = arith.constant 0 : index
    %c0_12 = arith.constant 0 : index
    %c0_13 = arith.constant 0 : index
    %18 = vector.load %arg4[%c0_11, %c0_12, %c0_13] : memref<1x1x96xf32, #tpu.memory_space<vmem>>, vector<1x1x96xf32>
    %19 = vector.shape_cast %18 : vector<1x1x96xf32> to vector<1x96xf32>
    %20 = vector.broadcast %19 : vector<1x96xf32> to vector<16x96xf32>
    %21 = arith.addf %17, %20 : vector<16x96xf32>
    %22 = vector.extract_strided_slice %21 {offsets = [0, 0], sizes = [16, 32], strides = [1, 1]} : vector<16x96xf32> to vector<16x32xf32>
    %cst_14 = arith.constant 0.353553385 : f32
    %23 = vector.broadcast %cst_14 : f32 to vector<16x32xf32>
    %24 = arith.mulf %22, %23 : vector<16x32xf32>
    %25 = vector.shape_cast %24 : vector<16x32xf32> to vector<2x8x32xf32>
    %26 = vector.extract_strided_slice %21 {offsets = [0, 32], sizes = [16, 32], strides = [1, 1]} : vector<16x96xf32> to vector<16x32xf32>
    %27 = vector.shape_cast %26 : vector<16x32xf32> to vector<2x8x32xf32>
    %28 = vector.extract_strided_slice %21 {offsets = [0, 64], sizes = [16, 32], strides = [1, 1]} : vector<16x96xf32> to vector<16x32xf32>
    %29 = vector.shape_cast %28 : vector<16x32xf32> to vector<2x8x32xf32>
    %c0_15 = arith.constant 0 : index
    %c0_16 = arith.constant 0 : index
    %c0_17 = arith.constant 0 : index
    %30 = vector.load %arg5[%c0_15, %c0_16, %c0_17] : memref<1x32x32xbf16, #tpu.memory_space<vmem>>, vector<1x32x32xbf16>
    %31 = vector.shape_cast %30 : vector<1x32x32xbf16> to vector<32x32xbf16>
    %c0_18 = arith.constant 0 : index
    %c0_19 = arith.constant 0 : index
    %c0_20 = arith.constant 0 : index
    %32 = vector.load %arg6[%c0_18, %c0_19, %c0_20] : memref<1x1x32xf32, #tpu.memory_space<vmem>>, vector<1x1x32xf32>
    %33 = vector.shape_cast %32 : vector<1x1x32xf32> to vector<1x32xf32>
    %34 = arith.truncf %25 : vector<2x8x32xf32> to vector<2x8x32xbf16>
    %35 = arith.truncf %27 : vector<2x8x32xf32> to vector<2x8x32xbf16>
    %36 = arith.truncf %29 : vector<2x8x32xf32> to vector<2x8x32xbf16>
    %cst_21 = arith.constant 0.000000e+00 : f32
    %37 = vector.broadcast %cst_21 : f32 to vector<16x32xf32>
    %38 = vector.extract_strided_slice %34 {offsets = [0, 0, 0], sizes = [2, 8, 8], strides = [1, 1, 1]} : vector<2x8x32xbf16> to vector<2x8x8xbf16>
    %39 = vector.extract_strided_slice %35 {offsets = [0, 0, 0], sizes = [2, 8, 8], strides = [1, 1, 1]} : vector<2x8x32xbf16> to vector<2x8x8xbf16>
    "tpu.trace_start"() <{level = 10 : i32, message = "bqd,bkd->bqk"}> : () -> ()
    %cst_22 = arith.constant dense<0.000000e+00> : vector<2x8x8xf32>
    %40 = tpu.matmul %38, %39, %cst_22 {dimension_numbers = #tpu.dot_dimension_numbers<[2], [2], [1], [1], [0, 0, 0, 1, 1, 1], [0], [0]>} : vector<2x8x8xbf16>, vector<2x8x8xbf16>, vector<2x8x8xf32> -> vector<2x8x8xf32>
    "tpu.trace_stop"() : () -> ()
    %41 = vector.shape_cast %8 : vector<8x8xf32> to vector<1x8x8xf32>
    %42 = vector.broadcast %41 : vector<1x8x8xf32> to vector<2x8x8xf32>
    %43 = arith.addf %40, %42 : vector<2x8x8xf32>
    %cst_23 = arith.constant dense<0xFF800000> : vector<2x8xf32>
    %44 = vector.multi_reduction <maximumf>, %43, %cst_23 [2] : vector<2x8x8xf32> to vector<2x8xf32>
    %45 = vector.shape_cast %44 : vector<2x8xf32> to vector<2x8x1xf32>
    %46 = vector.broadcast %45 : vector<2x8x1xf32> to vector<2x8x8xf32>
    %47 = arith.subf %43, %46 : vector<2x8x8xf32>
    %48 = math.exp %47 : vector<2x8x8xf32>
    %cst_24 = arith.constant dense<0.000000e+00> : vector<2x8xf32>
    %49 = vector.multi_reduction <add>, %48, %cst_24 [2] : vector<2x8x8xf32> to vector<2x8xf32>
    %50 = vector.shape_cast %49 : vector<2x8xf32> to vector<2x8x1xf32>
    %51 = tpu.reciprocal %50 {approx = true} : vector<2x8x1xf32> -> vector<2x8x1xf32>
    %52 = vector.broadcast %51 : vector<2x8x1xf32> to vector<2x8x8xf32>
    %53 = arith.mulf %48, %52 : vector<2x8x8xf32>
    %54 = arith.truncf %53 : vector<2x8x8xf32> to vector<2x8x8xbf16>
    %55 = vector.extract_strided_slice %36 {offsets = [0, 0, 0], sizes = [2, 8, 8], strides = [1, 1, 1]} : vector<2x8x32xbf16> to vector<2x8x8xbf16>
    "tpu.trace_start"() <{level = 10 : i32, message = "bqk,bkd->bqd"}> : () -> ()
    %cst_25 = arith.constant dense<0.000000e+00> : vector<2x8x8xf32>
    %56 = tpu.matmul %54, %55, %cst_25 {dimension_numbers = #tpu.dot_dimension_numbers<[2], [1], [1], [2], [0, 0, 0, 1, 1, 2], [0], [0]>} : vector<2x8x8xbf16>, vector<2x8x8xbf16>, vector<2x8x8xf32> -> vector<2x8x8xf32>
    "tpu.trace_stop"() : () -> ()
    %57 = vector.shape_cast %56 : vector<2x8x8xf32> to vector<16x8xf32>
    %58 = arith.truncf %57 : vector<16x8xf32> to vector<16x8xbf16>
    %59 = vector.extract_strided_slice %31 {offsets = [0, 0], sizes = [8, 32], strides = [1, 1]} : vector<32x32xbf16> to vector<8x32xbf16>
    %cst_26 = arith.constant dense<0.000000e+00> : vector<16x32xf32>
    %60 = tpu.matmul %58, %59, %cst_26 {dimension_numbers = #tpu.dot_dimension_numbers<[1], [0], [0], [1], [0, 0, 1, 1], [], []>} : vector<16x8xbf16>, vector<8x32xbf16>, vector<16x32xf32> -> vector<16x32xf32>
    %61 = arith.addf %37, %60 : vector<16x32xf32>
    %62 = vector.extract_strided_slice %34 {offsets = [0, 0, 8], sizes = [2, 8, 8], strides = [1, 1, 1]} : vector<2x8x32xbf16> to vector<2x8x8xbf16>
    %63 = vector.extract_strided_slice %35 {offsets = [0, 0, 8], sizes = [2, 8, 8], strides = [1, 1, 1]} : vector<2x8x32xbf16> to vector<2x8x8xbf16>
    "tpu.trace_start"() <{level = 10 : i32, message = "bqd,bkd->bqk"}> : () -> ()
    %cst_27 = arith.constant dense<0.000000e+00> : vector<2x8x8xf32>
    %64 = tpu.matmul %62, %63, %cst_27 {dimension_numbers = #tpu.dot_dimension_numbers<[2], [2], [1], [1], [0, 0, 0, 1, 1, 1], [0], [0]>} : vector<2x8x8xbf16>, vector<2x8x8xbf16>, vector<2x8x8xf32> -> vector<2x8x8xf32>
    "tpu.trace_stop"() : () -> ()
    %65 = vector.shape_cast %8 : vector<8x8xf32> to vector<1x8x8xf32>
    %66 = vector.broadcast %65 : vector<1x8x8xf32> to vector<2x8x8xf32>
    %67 = arith.addf %64, %66 : vector<2x8x8xf32>
    %cst_28 = arith.constant dense<0xFF800000> : vector<2x8xf32>
    %68 = vector.multi_reduction <maximumf>, %67, %cst_28 [2] : vector<2x8x8xf32> to vector<2x8xf32>
    %69 = vector.shape_cast %68 : vector<2x8xf32> to vector<2x8x1xf32>
    %70 = vector.broadcast %69 : vector<2x8x1xf32> to vector<2x8x8xf32>
    %71 = arith.subf %67, %70 : vector<2x8x8xf32>
    %72 = math.exp %71 : vector<2x8x8xf32>
    %cst_29 = arith.constant dense<0.000000e+00> : vector<2x8xf32>
    %73 = vector.multi_reduction <add>, %72, %cst_29 [2] : vector<2x8x8xf32> to vector<2x8xf32>
    %74 = vector.shape_cast %73 : vector<2x8xf32> to vector<2x8x1xf32>
    %75 = tpu.reciprocal %74 {approx = true} : vector<2x8x1xf32> -> vector<2x8x1xf32>
    %76 = vector.broadcast %75 : vector<2x8x1xf32> to vector<2x8x8xf32>
    %77 = arith.mulf %72, %76 : vector<2x8x8xf32>
    %78 = arith.truncf %77 : vector<2x8x8xf32> to vector<2x8x8xbf16>
    %79 = vector.extract_strided_slice %36 {offsets = [0, 0, 8], sizes = [2, 8, 8], strides = [1, 1, 1]} : vector<2x8x32xbf16> to vector<2x8x8xbf16>
    "tpu.trace_start"() <{level = 10 : i32, message = "bqk,bkd->bqd"}> : () -> ()
    %cst_30 = arith.constant dense<0.000000e+00> : vector<2x8x8xf32>
    %80 = tpu.matmul %78, %79, %cst_30 {dimension_numbers = #tpu.dot_dimension_numbers<[2], [1], [1], [2], [0, 0, 0, 1, 1, 2], [0], [0]>} : vector<2x8x8xbf16>, vector<2x8x8xbf16>, vector<2x8x8xf32> -> vector<2x8x8xf32>
    "tpu.trace_stop"() : () -> ()
    %81 = vector.shape_cast %80 : vector<2x8x8xf32> to vector<16x8xf32>
    %82 = arith.truncf %81 : vector<16x8xf32> to vector<16x8xbf16>
    %83 = vector.extract_strided_slice %31 {offsets = [8, 0], sizes = [8, 32], strides = [1, 1]} : vector<32x32xbf16> to vector<8x32xbf16>
    %cst_31 = arith.constant dense<0.000000e+00> : vector<16x32xf32>
    %84 = tpu.matmul %82, %83, %cst_31 {dimension_numbers = #tpu.dot_dimension_numbers<[1], [0], [0], [1], [0, 0, 1, 1], [], []>} : vector<16x8xbf16>, vector<8x32xbf16>, vector<16x32xf32> -> vector<16x32xf32>
    %85 = arith.addf %61, %84 : vector<16x32xf32>
    %86 = vector.extract_strided_slice %34 {offsets = [0, 0, 16], sizes = [2, 8, 8], strides = [1, 1, 1]} : vector<2x8x32xbf16> to vector<2x8x8xbf16>
    %87 = vector.extract_strided_slice %35 {offsets = [0, 0, 16], sizes = [2, 8, 8], strides = [1, 1, 1]} : vector<2x8x32xbf16> to vector<2x8x8xbf16>
    "tpu.trace_start"() <{level = 10 : i32, message = "bqd,bkd->bqk"}> : () -> ()
    %cst_32 = arith.constant dense<0.000000e+00> : vector<2x8x8xf32>
    %88 = tpu.matmul %86, %87, %cst_32 {dimension_numbers = #tpu.dot_dimension_numbers<[2], [2], [1], [1], [0, 0, 0, 1, 1, 1], [0], [0]>} : vector<2x8x8xbf16>, vector<2x8x8xbf16>, vector<2x8x8xf32> -> vector<2x8x8xf32>
    "tpu.trace_stop"() : () -> ()
    %89 = vector.shape_cast %8 : vector<8x8xf32> to vector<1x8x8xf32>
    %90 = vector.broadcast %89 : vector<1x8x8xf32> to vector<2x8x8xf32>
    %91 = arith.addf %88, %90 : vector<2x8x8xf32>
    %cst_33 = arith.constant dense<0xFF800000> : vector<2x8xf32>
    %92 = vector.multi_reduction <maximumf>, %91, %cst_33 [2] : vector<2x8x8xf32> to vector<2x8xf32>
    %93 = vector.shape_cast %92 : vector<2x8xf32> to vector<2x8x1xf32>
    %94 = vector.broadcast %93 : vector<2x8x1xf32> to vector<2x8x8xf32>
    %95 = arith.subf %91, %94 : vector<2x8x8xf32>
    %96 = math.exp %95 : vector<2x8x8xf32>
    %cst_34 = arith.constant dense<0.000000e+00> : vector<2x8xf32>
    %97 = vector.multi_reduction <add>, %96, %cst_34 [2] : vector<2x8x8xf32> to vector<2x8xf32>
    %98 = vector.shape_cast %97 : vector<2x8xf32> to vector<2x8x1xf32>
    %99 = tpu.reciprocal %98 {approx = true} : vector<2x8x1xf32> -> vector<2x8x1xf32>
    %100 = vector.broadcast %99 : vector<2x8x1xf32> to vector<2x8x8xf32>
    %101 = arith.mulf %96, %100 : vector<2x8x8xf32>
    %102 = arith.truncf %101 : vector<2x8x8xf32> to vector<2x8x8xbf16>
    %103 = vector.extract_strided_slice %36 {offsets = [0, 0, 16], sizes = [2, 8, 8], strides = [1, 1, 1]} : vector<2x8x32xbf16> to vector<2x8x8xbf16>
    "tpu.trace_start"() <{level = 10 : i32, message = "bqk,bkd->bqd"}> : () -> ()
    %cst_35 = arith.constant dense<0.000000e+00> : vector<2x8x8xf32>
    %104 = tpu.matmul %102, %103, %cst_35 {dimension_numbers = #tpu.dot_dimension_numbers<[2], [1], [1], [2], [0, 0, 0, 1, 1, 2], [0], [0]>} : vector<2x8x8xbf16>, vector<2x8x8xbf16>, vector<2x8x8xf32> -> vector<2x8x8xf32>
    "tpu.trace_stop"() : () -> ()
    %105 = vector.shape_cast %104 : vector<2x8x8xf32> to vector<16x8xf32>
    %106 = arith.truncf %105 : vector<16x8xf32> to vector<16x8xbf16>
    %107 = vector.extract_strided_slice %31 {offsets = [16, 0], sizes = [8, 32], strides = [1, 1]} : vector<32x32xbf16> to vector<8x32xbf16>
    %cst_36 = arith.constant dense<0.000000e+00> : vector<16x32xf32>
    %108 = tpu.matmul %106, %107, %cst_36 {dimension_numbers = #tpu.dot_dimension_numbers<[1], [0], [0], [1], [0, 0, 1, 1], [], []>} : vector<16x8xbf16>, vector<8x32xbf16>, vector<16x32xf32> -> vector<16x32xf32>
    %109 = arith.addf %85, %108 : vector<16x32xf32>
    %110 = vector.extract_strided_slice %34 {offsets = [0, 0, 24], sizes = [2, 8, 8], strides = [1, 1, 1]} : vector<2x8x32xbf16> to vector<2x8x8xbf16>
    %111 = vector.extract_strided_slice %35 {offsets = [0, 0, 24], sizes = [2, 8, 8], strides = [1, 1, 1]} : vector<2x8x32xbf16> to vector<2x8x8xbf16>
    "tpu.trace_start"() <{level = 10 : i32, message = "bqd,bkd->bqk"}> : () -> ()
    %cst_37 = arith.constant dense<0.000000e+00> : vector<2x8x8xf32>
    %112 = tpu.matmul %110, %111, %cst_37 {dimension_numbers = #tpu.dot_dimension_numbers<[2], [2], [1], [1], [0, 0, 0, 1, 1, 1], [0], [0]>} : vector<2x8x8xbf16>, vector<2x8x8xbf16>, vector<2x8x8xf32> -> vector<2x8x8xf32>
    "tpu.trace_stop"() : () -> ()
    %113 = vector.shape_cast %8 : vector<8x8xf32> to vector<1x8x8xf32>
    %114 = vector.broadcast %113 : vector<1x8x8xf32> to vector<2x8x8xf32>
    %115 = arith.addf %112, %114 : vector<2x8x8xf32>
    %cst_38 = arith.constant dense<0xFF800000> : vector<2x8xf32>
    %116 = vector.multi_reduction <maximumf>, %115, %cst_38 [2] : vector<2x8x8xf32> to vector<2x8xf32>
    %117 = vector.shape_cast %116 : vector<2x8xf32> to vector<2x8x1xf32>
    %118 = vector.broadcast %117 : vector<2x8x1xf32> to vector<2x8x8xf32>
    %119 = arith.subf %115, %118 : vector<2x8x8xf32>
    %120 = math.exp %119 : vector<2x8x8xf32>
    %cst_39 = arith.constant dense<0.000000e+00> : vector<2x8xf32>
    %121 = vector.multi_reduction <add>, %120, %cst_39 [2] : vector<2x8x8xf32> to vector<2x8xf32>
    %122 = vector.shape_cast %121 : vector<2x8xf32> to vector<2x8x1xf32>
    %123 = tpu.reciprocal %122 {approx = true} : vector<2x8x1xf32> -> vector<2x8x1xf32>
    %124 = vector.broadcast %123 : vector<2x8x1xf32> to vector<2x8x8xf32>
    %125 = arith.mulf %120, %124 : vector<2x8x8xf32>
    %126 = arith.truncf %125 : vector<2x8x8xf32> to vector<2x8x8xbf16>
    %127 = vector.extract_strided_slice %36 {offsets = [0, 0, 24], sizes = [2, 8, 8], strides = [1, 1, 1]} : vector<2x8x32xbf16> to vector<2x8x8xbf16>
    "tpu.trace_start"() <{level = 10 : i32, message = "bqk,bkd->bqd"}> : () -> ()
    %cst_40 = arith.constant dense<0.000000e+00> : vector<2x8x8xf32>
    %128 = tpu.matmul %126, %127, %cst_40 {dimension_numbers = #tpu.dot_dimension_numbers<[2], [1], [1], [2], [0, 0, 0, 1, 1, 2], [0], [0]>} : vector<2x8x8xbf16>, vector<2x8x8xbf16>, vector<2x8x8xf32> -> vector<2x8x8xf32>
    "tpu.trace_stop"() : () -> ()
    %129 = vector.shape_cast %128 : vector<2x8x8xf32> to vector<16x8xf32>
    %130 = arith.truncf %129 : vector<16x8xf32> to vector<16x8xbf16>
    %131 = vector.extract_strided_slice %31 {offsets = [24, 0], sizes = [8, 32], strides = [1, 1]} : vector<32x32xbf16> to vector<8x32xbf16>
    %cst_41 = arith.constant dense<0.000000e+00> : vector<16x32xf32>
    %132 = tpu.matmul %130, %131, %cst_41 {dimension_numbers = #tpu.dot_dimension_numbers<[1], [0], [0], [1], [0, 0, 1, 1], [], []>} : vector<16x8xbf16>, vector<8x32xbf16>, vector<16x32xf32> -> vector<16x32xf32>
    %133 = arith.addf %109, %132 : vector<16x32xf32>
    %134 = vector.shape_cast %133 : vector<16x32xf32> to vector<2x8x32xf32>
    %135 = vector.shape_cast %33 : vector<1x32xf32> to vector<1x1x32xf32>
    %136 = vector.broadcast %135 : vector<1x1x32xf32> to vector<2x8x32xf32>
    %137 = arith.addf %134, %136 : vector<2x8x32xf32>
    %138 = arith.addf %9, %137 : vector<2x8x32xf32>
    %c0_42 = arith.constant 0 : index
    %c0_43 = arith.constant 0 : index
    %c0_44 = arith.constant 0 : index
    %139 = vector.load %arg17[%c0_42, %c0_43, %c0_44] : memref<1x1x32xf32, #tpu.memory_space<vmem>>, vector<1x1x32xf32>
    %140 = vector.shape_cast %139 : vector<1x1x32xf32> to vector<1x32xf32>
    %c0_45 = arith.constant 0 : index
    %c0_46 = arith.constant 0 : index
    %c0_47 = arith.constant 0 : index
    %141 = vector.load %arg18[%c0_45, %c0_46, %c0_47] : memref<1x1x32xf32, #tpu.memory_space<vmem>>, vector<1x1x32xf32>
    %142 = vector.shape_cast %141 : vector<1x1x32xf32> to vector<1x32xf32>
    %cst_48 = arith.constant dense<0.000000e+00> : vector<2x8xf32>
    %143 = vector.multi_reduction <add>, %138, %cst_48 [2] : vector<2x8x32xf32> to vector<2x8xf32>
    %144 = vector.shape_cast %143 : vector<2x8xf32> to vector<2x8x1xf32>
    %cst_49 = arith.constant 3.200000e+01 : f32
    %145 = vector.broadcast %cst_49 : f32 to vector<2x8x1xf32>
    %146 = arith.divf %144, %145 : vector<2x8x1xf32>
    %147 = vector.broadcast %146 : vector<2x8x1xf32> to vector<2x8x32xf32>
    %148 = arith.subf %138, %147 : vector<2x8x32xf32>
    %149 = arith.mulf %148, %148 : vector<2x8x32xf32>
    %cst_50 = arith.constant dense<0.000000e+00> : vector<2x8xf32>
    %150 = vector.multi_reduction <add>, %149, %cst_50 [2] : vector<2x8x32xf32> to vector<2x8xf32>
    %151 = vector.shape_cast %150 : vector<2x8xf32> to vector<2x8x1xf32>
    %cst_51 = arith.constant 3.200000e+01 : f32
    %152 = vector.broadcast %cst_51 : f32 to vector<2x8x1xf32>
    %153 = arith.divf %151, %152 : vector<2x8x1xf32>
    %cst_52 = arith.constant 9.99999974E-6 : f32
    %154 = vector.broadcast %cst_52 : f32 to vector<2x8x1xf32>
    %155 = arith.addf %153, %154 : vector<2x8x1xf32>
    %156 = math.rsqrt %155 : vector<2x8x1xf32>
    %157 = vector.broadcast %156 : vector<2x8x1xf32> to vector<2x8x32xf32>
    %158 = arith.mulf %148, %157 : vector<2x8x32xf32>
    %159 = vector.shape_cast %140 : vector<1x32xf32> to vector<1x1x32xf32>
    %160 = vector.broadcast %159 : vector<1x1x32xf32> to vector<2x8x32xf32>
    %161 = arith.mulf %158, %160 : vector<2x8x32xf32>
    %162 = vector.shape_cast %142 : vector<1x32xf32> to vector<1x1x32xf32>
    %163 = vector.broadcast %162 : vector<1x1x32xf32> to vector<2x8x32xf32>
    %164 = arith.addf %161, %163 : vector<2x8x32xf32>
    %165 = vector.shape_cast %164 : vector<2x8x32xf32> to vector<16x32xf32>
    %166 = arith.truncf %165 : vector<16x32xf32> to vector<16x32xbf16>
    %c0_53 = arith.constant 0 : index
    %c0_54 = arith.constant 0 : index
    %c0_55 = arith.constant 0 : index
    %167 = vector.load %arg7[%c0_53, %c0_54, %c0_55] : memref<1x32x32xbf16, #tpu.memory_space<vmem>>, vector<1x32x32xbf16>
    %168 = vector.shape_cast %167 : vector<1x32x32xbf16> to vector<32x32xbf16>
    %cst_56 = arith.constant dense<0.000000e+00> : vector<16x32xf32>
    %169 = tpu.matmul %166, %168, %cst_56 {dimension_numbers = #tpu.dot_dimension_numbers<[1], [0], [0], [1], [0, 0, 1, 1], [], []>} : vector<16x32xbf16>, vector<32x32xbf16>, vector<16x32xf32> -> vector<16x32xf32>
    %c0_57 = arith.constant 0 : index
    %c0_58 = arith.constant 0 : index
    %c0_59 = arith.constant 0 : index
    %170 = vector.load %arg8[%c0_57, %c0_58, %c0_59] : memref<1x1x32xf32, #tpu.memory_space<vmem>>, vector<1x1x32xf32>
    %171 = vector.shape_cast %170 : vector<1x1x32xf32> to vector<1x32xf32>
    %172 = vector.broadcast %171 : vector<1x32xf32> to vector<16x32xf32>
    %173 = arith.addf %169, %172 : vector<16x32xf32>
    %cst_60 = arith.constant 0.353553385 : f32
    %174 = vector.broadcast %cst_60 : f32 to vector<16x32xf32>
    %175 = arith.mulf %173, %174 : vector<16x32xf32>
    %176 = vector.shape_cast %175 : vector<16x32xf32> to vector<2x8x32xf32>
    %c0_61 = arith.constant 0 : index
    %c0_62 = arith.constant 0 : index
    %c0_63 = arith.constant 0 : index
    %177 = vector.load %arg9[%c0_61, %c0_62, %c0_63] : memref<1x32x64xbf16, #tpu.memory_space<vmem>>, vector<1x32x64xbf16>
    %178 = vector.shape_cast %177 : vector<1x32x64xbf16> to vector<32x64xbf16>
    %cst_64 = arith.constant dense<0.000000e+00> : vector<16x64xf32>
    %179 = tpu.matmul %12, %178, %cst_64 {dimension_numbers = #tpu.dot_dimension_numbers<[1], [0], [0], [1], [0, 0, 1, 1], [], []>} : vector<16x32xbf16>, vector<32x64xbf16>, vector<16x64xf32> -> vector<16x64xf32>
    %c0_65 = arith.constant 0 : index
    %c0_66 = arith.constant 0 : index
    %c0_67 = arith.constant 0 : index
    %180 = vector.load %arg10[%c0_65, %c0_66, %c0_67] : memref<1x1x64xf32, #tpu.memory_space<vmem>>, vector<1x1x64xf32>
    %181 = vector.shape_cast %180 : vector<1x1x64xf32> to vector<1x64xf32>
    %182 = vector.broadcast %181 : vector<1x64xf32> to vector<16x64xf32>
    %183 = arith.addf %179, %182 : vector<16x64xf32>
    %184 = vector.extract_strided_slice %183 {offsets = [0, 0], sizes = [16, 32], strides = [1, 1]} : vector<16x64xf32> to vector<16x32xf32>
    %185 = vector.shape_cast %184 : vector<16x32xf32> to vector<2x8x32xf32>
    %186 = vector.extract_strided_slice %183 {offsets = [0, 32], sizes = [16, 32], strides = [1, 1]} : vector<16x64xf32> to vector<16x32xf32>
    %187 = vector.shape_cast %186 : vector<16x32xf32> to vector<2x8x32xf32>
    %c0_68 = arith.constant 0 : index
    %c0_69 = arith.constant 0 : index
    %c0_70 = arith.constant 0 : index
    %188 = vector.load %arg11[%c0_68, %c0_69, %c0_70] : memref<1x32x32xbf16, #tpu.memory_space<vmem>>, vector<1x32x32xbf16>
    %189 = vector.shape_cast %188 : vector<1x32x32xbf16> to vector<32x32xbf16>
    %c0_71 = arith.constant 0 : index
    %c0_72 = arith.constant 0 : index
    %c0_73 = arith.constant 0 : index
    %190 = vector.load %arg12[%c0_71, %c0_72, %c0_73] : memref<1x1x32xf32, #tpu.memory_space<vmem>>, vector<1x1x32xf32>
    %191 = vector.shape_cast %190 : vector<1x1x32xf32> to vector<1x32xf32>
    %192 = arith.truncf %176 : vector<2x8x32xf32> to vector<2x8x32xbf16>
    %193 = arith.truncf %185 : vector<2x8x32xf32> to vector<2x8x32xbf16>
    %194 = arith.truncf %187 : vector<2x8x32xf32> to vector<2x8x32xbf16>
    %cst_74 = arith.constant 0.000000e+00 : f32
    %195 = vector.broadcast %cst_74 : f32 to vector<16x32xf32>
    %196 = vector.extract_strided_slice %192 {offsets = [0, 0, 0], sizes = [2, 8, 8], strides = [1, 1, 1]} : vector<2x8x32xbf16> to vector<2x8x8xbf16>
    %197 = vector.extract_strided_slice %193 {offsets = [0, 0, 0], sizes = [2, 8, 8], strides = [1, 1, 1]} : vector<2x8x32xbf16> to vector<2x8x8xbf16>
    "tpu.trace_start"() <{level = 10 : i32, message = "bqd,bkd->bqk"}> : () -> ()
    %cst_75 = arith.constant dense<0.000000e+00> : vector<2x8x8xf32>
    %198 = tpu.matmul %196, %197, %cst_75 {dimension_numbers = #tpu.dot_dimension_numbers<[2], [2], [1], [1], [0, 0, 0, 1, 1, 1], [0], [0]>} : vector<2x8x8xbf16>, vector<2x8x8xbf16>, vector<2x8x8xf32> -> vector<2x8x8xf32>
    "tpu.trace_stop"() : () -> ()
    %cst_76 = arith.constant dense<0xFF800000> : vector<2x8xf32>
    %199 = vector.multi_reduction <maximumf>, %198, %cst_76 [2] : vector<2x8x8xf32> to vector<2x8xf32>
    %200 = vector.shape_cast %199 : vector<2x8xf32> to vector<2x8x1xf32>
    %201 = vector.broadcast %200 : vector<2x8x1xf32> to vector<2x8x8xf32>
    %202 = arith.subf %198, %201 : vector<2x8x8xf32>
    %203 = math.exp %202 : vector<2x8x8xf32>
    %cst_77 = arith.constant dense<0.000000e+00> : vector<2x8xf32>
    %204 = vector.multi_reduction <add>, %203, %cst_77 [2] : vector<2x8x8xf32> to vector<2x8xf32>
    %205 = vector.shape_cast %204 : vector<2x8xf32> to vector<2x8x1xf32>
    %206 = tpu.reciprocal %205 {approx = true} : vector<2x8x1xf32> -> vector<2x8x1xf32>
    %207 = vector.broadcast %206 : vector<2x8x1xf32> to vector<2x8x8xf32>
    %208 = arith.mulf %203, %207 : vector<2x8x8xf32>
    %209 = arith.truncf %208 : vector<2x8x8xf32> to vector<2x8x8xbf16>
    %210 = vector.extract_strided_slice %194 {offsets = [0, 0, 0], sizes = [2, 8, 8], strides = [1, 1, 1]} : vector<2x8x32xbf16> to vector<2x8x8xbf16>
    "tpu.trace_start"() <{level = 10 : i32, message = "bqk,bkd->bqd"}> : () -> ()
    %cst_78 = arith.constant dense<0.000000e+00> : vector<2x8x8xf32>
    %211 = tpu.matmul %209, %210, %cst_78 {dimension_numbers = #tpu.dot_dimension_numbers<[2], [1], [1], [2], [0, 0, 0, 1, 1, 2], [0], [0]>} : vector<2x8x8xbf16>, vector<2x8x8xbf16>, vector<2x8x8xf32> -> vector<2x8x8xf32>
    "tpu.trace_stop"() : () -> ()
    %212 = vector.shape_cast %211 : vector<2x8x8xf32> to vector<16x8xf32>
    %213 = arith.truncf %212 : vector<16x8xf32> to vector<16x8xbf16>
    %214 = vector.extract_strided_slice %189 {offsets = [0, 0], sizes = [8, 32], strides = [1, 1]} : vector<32x32xbf16> to vector<8x32xbf16>
    %cst_79 = arith.constant dense<0.000000e+00> : vector<16x32xf32>
    %215 = tpu.matmul %213, %214, %cst_79 {dimension_numbers = #tpu.dot_dimension_numbers<[1], [0], [0], [1], [0, 0, 1, 1], [], []>} : vector<16x8xbf16>, vector<8x32xbf16>, vector<16x32xf32> -> vector<16x32xf32>
    %216 = arith.addf %195, %215 : vector<16x32xf32>
    %217 = vector.extract_strided_slice %192 {offsets = [0, 0, 8], sizes = [2, 8, 8], strides = [1, 1, 1]} : vector<2x8x32xbf16> to vector<2x8x8xbf16>
    %218 = vector.extract_strided_slice %193 {offsets = [0, 0, 8], sizes = [2, 8, 8], strides = [1, 1, 1]} : vector<2x8x32xbf16> to vector<2x8x8xbf16>
    "tpu.trace_start"() <{level = 10 : i32, message = "bqd,bkd->bqk"}> : () -> ()
    %cst_80 = arith.constant dense<0.000000e+00> : vector<2x8x8xf32>
    %219 = tpu.matmul %217, %218, %cst_80 {dimension_numbers = #tpu.dot_dimension_numbers<[2], [2], [1], [1], [0, 0, 0, 1, 1, 1], [0], [0]>} : vector<2x8x8xbf16>, vector<2x8x8xbf16>, vector<2x8x8xf32> -> vector<2x8x8xf32>
    "tpu.trace_stop"() : () -> ()
    %cst_81 = arith.constant dense<0xFF800000> : vector<2x8xf32>
    %220 = vector.multi_reduction <maximumf>, %219, %cst_81 [2] : vector<2x8x8xf32> to vector<2x8xf32>
    %221 = vector.shape_cast %220 : vector<2x8xf32> to vector<2x8x1xf32>
    %222 = vector.broadcast %221 : vector<2x8x1xf32> to vector<2x8x8xf32>
    %223 = arith.subf %219, %222 : vector<2x8x8xf32>
    %224 = math.exp %223 : vector<2x8x8xf32>
    %cst_82 = arith.constant dense<0.000000e+00> : vector<2x8xf32>
    %225 = vector.multi_reduction <add>, %224, %cst_82 [2] : vector<2x8x8xf32> to vector<2x8xf32>
    %226 = vector.shape_cast %225 : vector<2x8xf32> to vector<2x8x1xf32>
    %227 = tpu.reciprocal %226 {approx = true} : vector<2x8x1xf32> -> vector<2x8x1xf32>
    %228 = vector.broadcast %227 : vector<2x8x1xf32> to vector<2x8x8xf32>
    %229 = arith.mulf %224, %228 : vector<2x8x8xf32>
    %230 = arith.truncf %229 : vector<2x8x8xf32> to vector<2x8x8xbf16>
    %231 = vector.extract_strided_slice %194 {offsets = [0, 0, 8], sizes = [2, 8, 8], strides = [1, 1, 1]} : vector<2x8x32xbf16> to vector<2x8x8xbf16>
    "tpu.trace_start"() <{level = 10 : i32, message = "bqk,bkd->bqd"}> : () -> ()
    %cst_83 = arith.constant dense<0.000000e+00> : vector<2x8x8xf32>
    %232 = tpu.matmul %230, %231, %cst_83 {dimension_numbers = #tpu.dot_dimension_numbers<[2], [1], [1], [2], [0, 0, 0, 1, 1, 2], [0], [0]>} : vector<2x8x8xbf16>, vector<2x8x8xbf16>, vector<2x8x8xf32> -> vector<2x8x8xf32>
    "tpu.trace_stop"() : () -> ()
    %233 = vector.shape_cast %232 : vector<2x8x8xf32> to vector<16x8xf32>
    %234 = arith.truncf %233 : vector<16x8xf32> to vector<16x8xbf16>
    %235 = vector.extract_strided_slice %189 {offsets = [8, 0], sizes = [8, 32], strides = [1, 1]} : vector<32x32xbf16> to vector<8x32xbf16>
    %cst_84 = arith.constant dense<0.000000e+00> : vector<16x32xf32>
    %236 = tpu.matmul %234, %235, %cst_84 {dimension_numbers = #tpu.dot_dimension_numbers<[1], [0], [0], [1], [0, 0, 1, 1], [], []>} : vector<16x8xbf16>, vector<8x32xbf16>, vector<16x32xf32> -> vector<16x32xf32>
    %237 = arith.addf %216, %236 : vector<16x32xf32>
    %238 = vector.extract_strided_slice %192 {offsets = [0, 0, 16], sizes = [2, 8, 8], strides = [1, 1, 1]} : vector<2x8x32xbf16> to vector<2x8x8xbf16>
    %239 = vector.extract_strided_slice %193 {offsets = [0, 0, 16], sizes = [2, 8, 8], strides = [1, 1, 1]} : vector<2x8x32xbf16> to vector<2x8x8xbf16>
    "tpu.trace_start"() <{level = 10 : i32, message = "bqd,bkd->bqk"}> : () -> ()
    %cst_85 = arith.constant dense<0.000000e+00> : vector<2x8x8xf32>
    %240 = tpu.matmul %238, %239, %cst_85 {dimension_numbers = #tpu.dot_dimension_numbers<[2], [2], [1], [1], [0, 0, 0, 1, 1, 1], [0], [0]>} : vector<2x8x8xbf16>, vector<2x8x8xbf16>, vector<2x8x8xf32> -> vector<2x8x8xf32>
    "tpu.trace_stop"() : () -> ()
    %cst_86 = arith.constant dense<0xFF800000> : vector<2x8xf32>
    %241 = vector.multi_reduction <maximumf>, %240, %cst_86 [2] : vector<2x8x8xf32> to vector<2x8xf32>
    %242 = vector.shape_cast %241 : vector<2x8xf32> to vector<2x8x1xf32>
    %243 = vector.broadcast %242 : vector<2x8x1xf32> to vector<2x8x8xf32>
    %244 = arith.subf %240, %243 : vector<2x8x8xf32>
    %245 = math.exp %244 : vector<2x8x8xf32>
    %cst_87 = arith.constant dense<0.000000e+00> : vector<2x8xf32>
    %246 = vector.multi_reduction <add>, %245, %cst_87 [2] : vector<2x8x8xf32> to vector<2x8xf32>
    %247 = vector.shape_cast %246 : vector<2x8xf32> to vector<2x8x1xf32>
    %248 = tpu.reciprocal %247 {approx = true} : vector<2x8x1xf32> -> vector<2x8x1xf32>
    %249 = vector.broadcast %248 : vector<2x8x1xf32> to vector<2x8x8xf32>
    %250 = arith.mulf %245, %249 : vector<2x8x8xf32>
    %251 = arith.truncf %250 : vector<2x8x8xf32> to vector<2x8x8xbf16>
    %252 = vector.extract_strided_slice %194 {offsets = [0, 0, 16], sizes = [2, 8, 8], strides = [1, 1, 1]} : vector<2x8x32xbf16> to vector<2x8x8xbf16>
    "tpu.trace_start"() <{level = 10 : i32, message = "bqk,bkd->bqd"}> : () -> ()
    %cst_88 = arith.constant dense<0.000000e+00> : vector<2x8x8xf32>
    %253 = tpu.matmul %251, %252, %cst_88 {dimension_numbers = #tpu.dot_dimension_numbers<[2], [1], [1], [2], [0, 0, 0, 1, 1, 2], [0], [0]>} : vector<2x8x8xbf16>, vector<2x8x8xbf16>, vector<2x8x8xf32> -> vector<2x8x8xf32>
    "tpu.trace_stop"() : () -> ()
    %254 = vector.shape_cast %253 : vector<2x8x8xf32> to vector<16x8xf32>
    %255 = arith.truncf %254 : vector<16x8xf32> to vector<16x8xbf16>
    %256 = vector.extract_strided_slice %189 {offsets = [16, 0], sizes = [8, 32], strides = [1, 1]} : vector<32x32xbf16> to vector<8x32xbf16>
    %cst_89 = arith.constant dense<0.000000e+00> : vector<16x32xf32>
    %257 = tpu.matmul %255, %256, %cst_89 {dimension_numbers = #tpu.dot_dimension_numbers<[1], [0], [0], [1], [0, 0, 1, 1], [], []>} : vector<16x8xbf16>, vector<8x32xbf16>, vector<16x32xf32> -> vector<16x32xf32>
    %258 = arith.addf %237, %257 : vector<16x32xf32>
    %259 = vector.extract_strided_slice %192 {offsets = [0, 0, 24], sizes = [2, 8, 8], strides = [1, 1, 1]} : vector<2x8x32xbf16> to vector<2x8x8xbf16>
    %260 = vector.extract_strided_slice %193 {offsets = [0, 0, 24], sizes = [2, 8, 8], strides = [1, 1, 1]} : vector<2x8x32xbf16> to vector<2x8x8xbf16>
    "tpu.trace_start"() <{level = 10 : i32, message = "bqd,bkd->bqk"}> : () -> ()
    %cst_90 = arith.constant dense<0.000000e+00> : vector<2x8x8xf32>
    %261 = tpu.matmul %259, %260, %cst_90 {dimension_numbers = #tpu.dot_dimension_numbers<[2], [2], [1], [1], [0, 0, 0, 1, 1, 1], [0], [0]>} : vector<2x8x8xbf16>, vector<2x8x8xbf16>, vector<2x8x8xf32> -> vector<2x8x8xf32>
    "tpu.trace_stop"() : () -> ()
    %cst_91 = arith.constant dense<0xFF800000> : vector<2x8xf32>
    %262 = vector.multi_reduction <maximumf>, %261, %cst_91 [2] : vector<2x8x8xf32> to vector<2x8xf32>
    %263 = vector.shape_cast %262 : vector<2x8xf32> to vector<2x8x1xf32>
    %264 = vector.broadcast %263 : vector<2x8x1xf32> to vector<2x8x8xf32>
    %265 = arith.subf %261, %264 : vector<2x8x8xf32>
    %266 = math.exp %265 : vector<2x8x8xf32>
    %cst_92 = arith.constant dense<0.000000e+00> : vector<2x8xf32>
    %267 = vector.multi_reduction <add>, %266, %cst_92 [2] : vector<2x8x8xf32> to vector<2x8xf32>
    %268 = vector.shape_cast %267 : vector<2x8xf32> to vector<2x8x1xf32>
    %269 = tpu.reciprocal %268 {approx = true} : vector<2x8x1xf32> -> vector<2x8x1xf32>
    %270 = vector.broadcast %269 : vector<2x8x1xf32> to vector<2x8x8xf32>
    %271 = arith.mulf %266, %270 : vector<2x8x8xf32>
    %272 = arith.truncf %271 : vector<2x8x8xf32> to vector<2x8x8xbf16>
    %273 = vector.extract_strided_slice %194 {offsets = [0, 0, 24], sizes = [2, 8, 8], strides = [1, 1, 1]} : vector<2x8x32xbf16> to vector<2x8x8xbf16>
    "tpu.trace_start"() <{level = 10 : i32, message = "bqk,bkd->bqd"}> : () -> ()
    %cst_93 = arith.constant dense<0.000000e+00> : vector<2x8x8xf32>
    %274 = tpu.matmul %272, %273, %cst_93 {dimension_numbers = #tpu.dot_dimension_numbers<[2], [1], [1], [2], [0, 0, 0, 1, 1, 2], [0], [0]>} : vector<2x8x8xbf16>, vector<2x8x8xbf16>, vector<2x8x8xf32> -> vector<2x8x8xf32>
    "tpu.trace_stop"() : () -> ()
    %275 = vector.shape_cast %274 : vector<2x8x8xf32> to vector<16x8xf32>
    %276 = arith.truncf %275 : vector<16x8xf32> to vector<16x8xbf16>
    %277 = vector.extract_strided_slice %189 {offsets = [24, 0], sizes = [8, 32], strides = [1, 1]} : vector<32x32xbf16> to vector<8x32xbf16>
    %cst_94 = arith.constant dense<0.000000e+00> : vector<16x32xf32>
    %278 = tpu.matmul %276, %277, %cst_94 {dimension_numbers = #tpu.dot_dimension_numbers<[1], [0], [0], [1], [0, 0, 1, 1], [], []>} : vector<16x8xbf16>, vector<8x32xbf16>, vector<16x32xf32> -> vector<16x32xf32>
    %279 = arith.addf %258, %278 : vector<16x32xf32>
    %280 = vector.shape_cast %279 : vector<16x32xf32> to vector<2x8x32xf32>
    %281 = vector.shape_cast %191 : vector<1x32xf32> to vector<1x1x32xf32>
    %282 = vector.broadcast %281 : vector<1x1x32xf32> to vector<2x8x32xf32>
    %283 = arith.addf %280, %282 : vector<2x8x32xf32>
    %284 = arith.addf %164, %283 : vector<2x8x32xf32>
    %c0_95 = arith.constant 0 : index
    %c0_96 = arith.constant 0 : index
    %c0_97 = arith.constant 0 : index
    %285 = vector.load %arg19[%c0_95, %c0_96, %c0_97] : memref<1x1x32xf32, #tpu.memory_space<vmem>>, vector<1x1x32xf32>
    %286 = vector.shape_cast %285 : vector<1x1x32xf32> to vector<1x32xf32>
    %c0_98 = arith.constant 0 : index
    %c0_99 = arith.constant 0 : index
    %c0_100 = arith.constant 0 : index
    %287 = vector.load %arg20[%c0_98, %c0_99, %c0_100] : memref<1x1x32xf32, #tpu.memory_space<vmem>>, vector<1x1x32xf32>
    %288 = vector.shape_cast %287 : vector<1x1x32xf32> to vector<1x32xf32>
    %cst_101 = arith.constant dense<0.000000e+00> : vector<2x8xf32>
    %289 = vector.multi_reduction <add>, %284, %cst_101 [2] : vector<2x8x32xf32> to vector<2x8xf32>
    %290 = vector.shape_cast %289 : vector<2x8xf32> to vector<2x8x1xf32>
    %cst_102 = arith.constant 3.200000e+01 : f32
    %291 = vector.broadcast %cst_102 : f32 to vector<2x8x1xf32>
    %292 = arith.divf %290, %291 : vector<2x8x1xf32>
    %293 = vector.broadcast %292 : vector<2x8x1xf32> to vector<2x8x32xf32>
    %294 = arith.subf %284, %293 : vector<2x8x32xf32>
    %295 = arith.mulf %294, %294 : vector<2x8x32xf32>
    %cst_103 = arith.constant dense<0.000000e+00> : vector<2x8xf32>
    %296 = vector.multi_reduction <add>, %295, %cst_103 [2] : vector<2x8x32xf32> to vector<2x8xf32>
    %297 = vector.shape_cast %296 : vector<2x8xf32> to vector<2x8x1xf32>
    %cst_104 = arith.constant 3.200000e+01 : f32
    %298 = vector.broadcast %cst_104 : f32 to vector<2x8x1xf32>
    %299 = arith.divf %297, %298 : vector<2x8x1xf32>
    %cst_105 = arith.constant 9.99999974E-6 : f32
    %300 = vector.broadcast %cst_105 : f32 to vector<2x8x1xf32>
    %301 = arith.addf %299, %300 : vector<2x8x1xf32>
    %302 = math.rsqrt %301 : vector<2x8x1xf32>
    %303 = vector.broadcast %302 : vector<2x8x1xf32> to vector<2x8x32xf32>
    %304 = arith.mulf %294, %303 : vector<2x8x32xf32>
    %305 = vector.shape_cast %286 : vector<1x32xf32> to vector<1x1x32xf32>
    %306 = vector.broadcast %305 : vector<1x1x32xf32> to vector<2x8x32xf32>
    %307 = arith.mulf %304, %306 : vector<2x8x32xf32>
    %308 = vector.shape_cast %288 : vector<1x32xf32> to vector<1x1x32xf32>
    %309 = vector.broadcast %308 : vector<1x1x32xf32> to vector<2x8x32xf32>
    %310 = arith.addf %307, %309 : vector<2x8x32xf32>
    %311 = vector.shape_cast %310 : vector<2x8x32xf32> to vector<16x32xf32>
    %312 = arith.truncf %311 : vector<16x32xf32> to vector<16x32xbf16>
    %c0_106 = arith.constant 0 : index
    %c0_107 = arith.constant 0 : index
    %c0_108 = arith.constant 0 : index
    %313 = vector.load %arg13[%c0_106, %c0_107, %c0_108] : memref<1x32x2048xbf16, #tpu.memory_space<vmem>>, vector<1x32x2048xbf16>
    %314 = vector.shape_cast %313 : vector<1x32x2048xbf16> to vector<32x2048xbf16>
    %cst_109 = arith.constant dense<0.000000e+00> : vector<16x2048xf32>
    %315 = tpu.matmul %312, %314, %cst_109 {dimension_numbers = #tpu.dot_dimension_numbers<[1], [0], [0], [1], [0, 0, 1, 1], [], []>} : vector<16x32xbf16>, vector<32x2048xbf16>, vector<16x2048xf32> -> vector<16x2048xf32>
    %c0_110 = arith.constant 0 : index
    %c0_111 = arith.constant 0 : index
    %c0_112 = arith.constant 0 : index
    %316 = vector.load %arg14[%c0_110, %c0_111, %c0_112] : memref<1x1x2048xf32, #tpu.memory_space<vmem>>, vector<1x1x2048xf32>
    %317 = vector.shape_cast %316 : vector<1x1x2048xf32> to vector<1x2048xf32>
    %318 = vector.broadcast %317 : vector<1x2048xf32> to vector<16x2048xf32>
    %319 = arith.addf %315, %318 : vector<16x2048xf32>
    %cst_113 = arith.constant 5.000000e-01 : f32
    %320 = vector.broadcast %cst_113 : f32 to vector<16x2048xf32>
    %321 = arith.mulf %320, %319 : vector<16x2048xf32>
    %cst_114 = arith.constant 0.707106769 : f32
    %322 = vector.broadcast %cst_114 : f32 to vector<16x2048xf32>
    %323 = arith.mulf %319, %322 : vector<16x2048xf32>
    %324 = math.erf %323 : vector<16x2048xf32>
    %cst_115 = arith.constant 1.000000e+00 : f32
    %325 = vector.broadcast %cst_115 : f32 to vector<16x2048xf32>
    %326 = arith.addf %325, %324 : vector<16x2048xf32>
    %327 = arith.mulf %321, %326 : vector<16x2048xf32>
    %328 = arith.truncf %327 : vector<16x2048xf32> to vector<16x2048xbf16>
    %c0_116 = arith.constant 0 : index
    %c0_117 = arith.constant 0 : index
    %c0_118 = arith.constant 0 : index
    %329 = vector.load %arg15[%c0_116, %c0_117, %c0_118] : memref<1x2048x32xbf16, #tpu.memory_space<vmem>>, vector<1x2048x32xbf16>
    %330 = vector.shape_cast %329 : vector<1x2048x32xbf16> to vector<2048x32xbf16>
    %cst_119 = arith.constant dense<0.000000e+00> : vector<16x32xf32>
    %331 = tpu.matmul %328, %330, %cst_119 {dimension_numbers = #tpu.dot_dimension_numbers<[1], [0], [0], [1], [0, 0, 1, 1], [], []>} : vector<16x2048xbf16>, vector<2048x32xbf16>, vector<16x32xf32> -> vector<16x32xf32>
    %c0_120 = arith.constant 0 : index
    %c0_121 = arith.constant 0 : index
    %c0_122 = arith.constant 0 : index
    %332 = vector.load %arg16[%c0_120, %c0_121, %c0_122] : memref<1x1x32xf32, #tpu.memory_space<vmem>>, vector<1x1x32xf32>
    %333 = vector.shape_cast %332 : vector<1x1x32xf32> to vector<1x32xf32>
    %334 = vector.broadcast %333 : vector<1x32xf32> to vector<16x32xf32>
    %335 = arith.addf %331, %334 : vector<16x32xf32>
    %336 = vector.shape_cast %335 : vector<16x32xf32> to vector<2x8x32xf32>
    %337 = arith.addf %310, %336 : vector<2x8x32xf32>
    %c0_123 = arith.constant 0 : index
    %c0_124 = arith.constant 0 : index
    %c0_125 = arith.constant 0 : index
    %338 = vector.load %arg21[%c0_123, %c0_124, %c0_125] : memref<1x1x32xf32, #tpu.memory_space<vmem>>, vector<1x1x32xf32>
    %339 = vector.shape_cast %338 : vector<1x1x32xf32> to vector<1x32xf32>
    %c0_126 = arith.constant 0 : index
    %c0_127 = arith.constant 0 : index
    %c0_128 = arith.constant 0 : index
    %340 = vector.load %arg22[%c0_126, %c0_127, %c0_128] : memref<1x1x32xf32, #tpu.memory_space<vmem>>, vector<1x1x32xf32>
    %341 = vector.shape_cast %340 : vector<1x1x32xf32> to vector<1x32xf32>
    %cst_129 = arith.constant dense<0.000000e+00> : vector<2x8xf32>
    %342 = vector.multi_reduction <add>, %337, %cst_129 [2] : vector<2x8x32xf32> to vector<2x8xf32>
    %343 = vector.shape_cast %342 : vector<2x8xf32> to vector<2x8x1xf32>
    %cst_130 = arith.constant 3.200000e+01 : f32
    %344 = vector.broadcast %cst_130 : f32 to vector<2x8x1xf32>
    %345 = arith.divf %343, %344 : vector<2x8x1xf32>
    %346 = vector.broadcast %345 : vector<2x8x1xf32> to vector<2x8x32xf32>
    %347 = arith.subf %337, %346 : vector<2x8x32xf32>
    %348 = arith.mulf %347, %347 : vector<2x8x32xf32>
    %cst_131 = arith.constant dense<0.000000e+00> : vector<2x8xf32>
    %349 = vector.multi_reduction <add>, %348, %cst_131 [2] : vector<2x8x32xf32> to vector<2x8xf32>
    %350 = vector.shape_cast %349 : vector<2x8xf32> to vector<2x8x1xf32>
    %cst_132 = arith.constant 3.200000e+01 : f32
    %351 = vector.broadcast %cst_132 : f32 to vector<2x8x1xf32>
    %352 = arith.divf %350, %351 : vector<2x8x1xf32>
    %cst_133 = arith.constant 9.99999974E-6 : f32
    %353 = vector.broadcast %cst_133 : f32 to vector<2x8x1xf32>
    %354 = arith.addf %352, %353 : vector<2x8x1xf32>
    %355 = math.rsqrt %354 : vector<2x8x1xf32>
    %356 = vector.broadcast %355 : vector<2x8x1xf32> to vector<2x8x32xf32>
    %357 = arith.mulf %347, %356 : vector<2x8x32xf32>
    %358 = vector.shape_cast %339 : vector<1x32xf32> to vector<1x1x32xf32>
    %359 = vector.broadcast %358 : vector<1x1x32xf32> to vector<2x8x32xf32>
    %360 = arith.mulf %357, %359 : vector<2x8x32xf32>
    %361 = vector.shape_cast %341 : vector<1x32xf32> to vector<1x1x32xf32>
    %362 = vector.broadcast %361 : vector<1x1x32xf32> to vector<2x8x32xf32>
    %363 = arith.addf %360, %362 : vector<2x8x32xf32>
    %c0_134 = arith.constant 0 : index
    %c0_135 = arith.constant 0 : index
    %c0_136 = arith.constant 0 : index
    %364 = vector.load %arg26[%c0_134, %c0_135, %c0_136] : memref<2x8x32xf32, #tpu.memory_space<vmem>>, vector<2x8x32xf32>
    tpu.vector_store %arg26[%c0_134, %c0_135, %c0_136], %363 {strides = array<i32>} : memref<2x8x32xf32, #tpu.memory_space<vmem>>, vector<2x8x32xf32>,
    %c1_i32 = arith.constant 1 : i32
    %365 = arith.cmpi eq, %arg0, %c1_i32 : i32
    %366 = arith.extui %365 : i1 to i32
    %c0_i32_137 = arith.constant 0 : i32
    %367 = arith.cmpi ne, %366, %c0_i32_137 : i32
    scf.if %367 {
      %368 = vector.shape_cast %363 : vector<2x8x32xf32> to vector<16x32xf32>
      %369 = arith.truncf %368 : vector<16x32xf32> to vector<16x32xbf16>
      %c0_138 = arith.constant 0 : index
      %c0_139 = arith.constant 0 : index
      %370 = vector.load %arg23[%c0_138, %c0_139] : memref<32x128xbf16, #tpu.memory_space<vmem>>, vector<32x128xbf16>
      %cst_140 = arith.constant dense<0.000000e+00> : vector<16x128xf32>
      %371 = tpu.matmul %369, %370, %cst_140 {dimension_numbers = #tpu.dot_dimension_numbers<[1], [0], [0], [1], [0, 0, 1, 1], [], []>} : vector<16x32xbf16>, vector<32x128xbf16>, vector<16x128xf32> -> vector<16x128xf32>
      %c0_141 = arith.constant 0 : index
      %c0_142 = arith.constant 0 : index
      %372 = vector.load %arg24[%c0_141, %c0_142] : memref<1x128xf32, #tpu.memory_space<vmem>>, vector<1x128xf32>
      %373 = vector.broadcast %372 : vector<1x128xf32> to vector<16x128xf32>
      %374 = arith.addf %371, %373 : vector<16x128xf32>
      %375 = vector.shape_cast %374 : vector<16x128xf32> to vector<2x8x128xf32>
      %c0_143 = arith.constant 0 : index
      %c0_144 = arith.constant 0 : index
      %c0_145 = arith.constant 0 : index
      %376 = vector.load %arg25[%c0_143, %c0_144, %c0_145] : memref<2x8x128xf32, #tpu.memory_space<vmem>>, vector<2x8x128xf32>
      tpu.vector_store %arg25[%c0_143, %c0_144, %c0_145], %375 {strides = array<i32>} : memref<2x8x128xf32, #tpu.memory_space<vmem>>, vector<2x8x128xf32>,
    } else {
    }
    return
  }
  func.func @transform_0(%arg0: i32) -> (i32, i32, i32) {
    %c0_i32 = arith.constant 0 : i32
    %c0_i32_0 = arith.constant 0 : i32
    %c0_i32_1 = arith.constant 0 : i32
    %c0_i32_2 = arith.constant 0 : i32
    return %c0_i32, %c0_i32_0, %c0_i32_1 : i32, i32, i32
  }
  func.func @transform_1(%arg0: i32) -> (i32, i32, i32) {
    %c0_i32 = arith.constant 0 : i32
    %c0_i32_0 = arith.constant 0 : i32
    %c0_i32_1 = arith.constant 0 : i32
    %c0_i32_2 = arith.constant 0 : i32
    return %c0_i32, %c0_i32_0, %c0_i32_1 : i32, i32, i32
  }
  func.func @transform_2(%arg0: i32) -> (i32, i32, i32) {
    %c0_i32 = arith.constant 0 : i32
    %c0_i32_0 = arith.constant 0 : i32
    %c0_i32_1 = arith.constant 0 : i32
    return %arg0, %c0_i32, %c0_i32_0 : i32, i32, i32
  }
  func.func @transform_3(%arg0: i32) -> (i32, i32, i32) {
    %c0_i32 = arith.constant 0 : i32
    %c0_i32_0 = arith.constant 0 : i32
    %c0_i32_1 = arith.constant 0 : i32
    return %arg0, %c0_i32, %c0_i32_0 : i32, i32, i32
  }
  func.func @transform_4(%arg0: i32) -> (i32, i32, i32) {
    %c0_i32 = arith.constant 0 : i32
    %c0_i32_0 = arith.constant 0 : i32
    %c0_i32_1 = arith.constant 0 : i32
    return %arg0, %c0_i32, %c0_i32_0 : i32, i32, i32
  }
  func.func @transform_5(%arg0: i32) -> (i32, i32, i32) {
    %c0_i32 = arith.constant 0 : i32
    %c0_i32_0 = arith.constant 0 : i32
    %c0_i32_1 = arith.constant 0 : i32
    return %arg0, %c0_i32, %c0_i32_0 : i32, i32, i32
  }
  func.func @transform_6(%arg0: i32) -> (i32, i32, i32) {
    %c0_i32 = arith.constant 0 : i32
    %c0_i32_0 = arith.constant 0 : i32
    %c0_i32_1 = arith.constant 0 : i32
    return %arg0, %c0_i32, %c0_i32_0 : i32, i32, i32
  }
  func.func @transform_7(%arg0: i32) -> (i32, i32, i32) {
    %c0_i32 = arith.constant 0 : i32
    %c0_i32_0 = arith.constant 0 : i32
    %c0_i32_1 = arith.constant 0 : i32
    return %arg0, %c0_i32, %c0_i32_0 : i32, i32, i32
  }
  func.func @transform_8(%arg0: i32) -> (i32, i32, i32) {
    %c0_i32 = arith.constant 0 : i32
    %c0_i32_0 = arith.constant 0 : i32
    %c0_i32_1 = arith.constant 0 : i32
    return %arg0, %c0_i32, %c0_i32_0 : i32, i32, i32
  }
  func.func @transform_9(%arg0: i32) -> (i32, i32, i32) {
    %c0_i32 = arith.constant 0 : i32
    %c0_i32_0 = arith.constant 0 : i32
    %c0_i32_1 = arith.constant 0 : i32
    return %arg0, %c0_i32, %c0_i32_0 : i32, i32, i32
  }
  func.func @transform_10(%arg0: i32) -> (i32, i32, i32) {
    %c0_i32 = arith.constant 0 : i32
    %c0_i32_0 = arith.constant 0 : i32
    %c0_i32_1 = arith.constant 0 : i32
    return %arg0, %c0_i32, %c0_i32_0 : i32, i32, i32
  }
  func.func @transform_11(%arg0: i32) -> (i32, i32, i32) {
    %c0_i32 = arith.constant 0 : i32
    %c0_i32_0 = arith.constant 0 : i32
    %c0_i32_1 = arith.constant 0 : i32
    return %arg0, %c0_i32, %c0_i32_0 : i32, i32, i32
  }
  func.func @transform_12(%arg0: i32) -> (i32, i32, i32) {
    %c0_i32 = arith.constant 0 : i32
    %c0_i32_0 = arith.constant 0 : i32
    %c0_i32_1 = arith.constant 0 : i32
    return %arg0, %c0_i32, %c0_i32_0 : i32, i32, i32
  }
  func.func @transform_13(%arg0: i32) -> (i32, i32, i32) {
    %c0_i32 = arith.constant 0 : i32
    %c0_i32_0 = arith.constant 0 : i32
    %c0_i32_1 = arith.constant 0 : i32
    return %arg0, %c0_i32, %c0_i32_0 : i32, i32, i32
  }
  func.func @transform_14(%arg0: i32) -> (i32, i32, i32) {
    %c0_i32 = arith.constant 0 : i32
    %c0_i32_0 = arith.constant 0 : i32
    %c0_i32_1 = arith.constant 0 : i32
    return %arg0, %c0_i32, %c0_i32_0 : i32, i32, i32
  }
  func.func @transform_15(%arg0: i32) -> (i32, i32, i32) {
    %c0_i32 = arith.constant 0 : i32
    %c0_i32_0 = arith.constant 0 : i32
    %c0_i32_1 = arith.constant 0 : i32
    return %arg0, %c0_i32, %c0_i32_0 : i32, i32, i32
  }
  func.func @transform_16(%arg0: i32) -> (i32, i32, i32) {
    %c0_i32 = arith.constant 0 : i32
    %c0_i32_0 = arith.constant 0 : i32
    %c0_i32_1 = arith.constant 0 : i32
    return %arg0, %c0_i32, %c0_i32_0 : i32, i32, i32
  }
  func.func @transform_17(%arg0: i32) -> (i32, i32, i32) {
    %c0_i32 = arith.constant 0 : i32
    %c0_i32_0 = arith.constant 0 : i32
    %c0_i32_1 = arith.constant 0 : i32
    return %arg0, %c0_i32, %c0_i32_0 : i32, i32, i32
  }
  func.func @transform_18(%arg0: i32) -> (i32, i32, i32) {
    %c0_i32 = arith.constant 0 : i32
    %c0_i32_0 = arith.constant 0 : i32
    %c0_i32_1 = arith.constant 0 : i32
    return %arg0, %c0_i32, %c0_i32_0 : i32, i32, i32
  }
  func.func @transform_19(%arg0: i32) -> (i32, i32, i32) {
    %c0_i32 = arith.constant 0 : i32
    %c0_i32_0 = arith.constant 0 : i32
    %c0_i32_1 = arith.constant 0 : i32
    return %arg0, %c0_i32, %c0_i32_0 : i32, i32, i32
  }
  func.func @transform_20(%arg0: i32) -> (i32, i32, i32) {
    %c0_i32 = arith.constant 0 : i32
    %c0_i32_0 = arith.constant 0 : i32
    %c0_i32_1 = arith.constant 0 : i32
    return %arg0, %c0_i32, %c0_i32_0 : i32, i32, i32
  }
  func.func @transform_21(%arg0: i32) -> (i32, i32, i32) {
    %c0_i32 = arith.constant 0 : i32
    %c0_i32_0 = arith.constant 0 : i32
    %c0_i32_1 = arith.constant 0 : i32
    return %arg0, %c0_i32, %c0_i32_0 : i32, i32, i32
  }
  func.func @transform_22(%arg0: i32) -> (i32, i32) {
    %c0_i32 = arith.constant 0 : i32
    %c0_i32_0 = arith.constant 0 : i32
    %c0_i32_1 = arith.constant 0 : i32
    return %c0_i32, %c0_i32_0 : i32, i32
  }
  func.func @transform_23(%arg0: i32) -> (i32, i32) {
    %c0_i32 = arith.constant 0 : i32
    %c0_i32_0 = arith.constant 0 : i32
    %c0_i32_1 = arith.constant 0 : i32
    return %c0_i32, %c0_i32_0 : i32, i32
  }
  func.func @transform_24(%arg0: i32) -> (i32, i32, i32) {
    %c0_i32 = arith.constant 0 : i32
    %c0_i32_0 = arith.constant 0 : i32
    %c0_i32_1 = arith.constant 0 : i32
    %c0_i32_2 = arith.constant 0 : i32
    return %c0_i32, %c0_i32_0, %c0_i32_1 : i32, i32, i32
  }
}

</mosaic_0001>

<bundles_post_ra>
// kernel: _lambda_.1
= control target key start
LH: loop header
LB: loop body
LE: loop exit
PB: predicated region body
PF: predicated region fallthrough
CT: control target
= control target key end

     0   :  { %s8457_s0 = inlined_call_operand.vmem [shape: f32[2,8,32], index: 0, kind: input, shape index: {}]   ;;  %s8458_s1 = inlined_call_operand.vmem [shape: f32[2,8,32], index: 1, kind: input, shape index: {}]   ;;  %s8459_s2 = inlined_call_operand.vmem [shape: bf16[2,32,96], index: 2, kind: input, shape index: {}]   ;;  %s8460_s3 = inlined_call_operand.vmem [shape: f32[2,1,96], index: 3, kind: input, shape index: {}]   ;;  %s8461_s4 = inlined_call_operand.vmem [shape: bf16[2,32,32], index: 4, kind: input, shape index: {}]   ;;  %s8462_s5 = inlined_call_operand.vmem [shape: f32[2,1,32], index: 5, kind: input, shape index: {}]   ;;  %s8463_s6 = inlined_call_operand.vmem [shape: bf16[2,32,32], index: 6, kind: input, shape index: {}]   ;;  %s8464_s7 = inlined_call_operand.vmem [shape: f32[2,1,32], index: 7, kind: input, shape index: {}]   ;;  %s8465_s8 = inlined_call_operand.vmem [shape: bf16[2,32,64], index: 8, kind: input, shape index: {}]   ;;  %s8466_s9 = inlined_call_operand.vmem [shape: f32[2,1,64], index: 9, kind: input, shape index: {}]   ;;  %s8467_s10 = inlined_call_operand.vmem [shape: bf16[2,32,32], index: 10, kind: input, shape index: {}]   ;;  %s8468_s11 = inlined_call_operand.vmem [shape: f32[2,1,32], index: 11, kind: input, shape index: {}]   ;;  %s8469_s12 = inlined_call_operand.vmem [shape: bf16[2,32,2048], index: 12, kind: input, shape index: {}]   ;;  %s8470_s13 = inlined_call_operand.vmem [shape: f32[2,1,2048], index: 13, kind: input, shape index: {}]   ;;  %s8471_s14 = inlined_call_operand.vmem [shape: bf16[2,2048,32], index: 14, kind: input, shape index: {}]   ;;  %s8472_s15 = inlined_call_operand.vmem [shape: f32[2,1,32], index: 15, kind: input, shape index: {}]   ;;  %s8473_s16 = inlined_call_operand.vmem [shape: f32[2,1,32], index: 16, kind: input, shape index: {}]   ;;  %s8474_s17 = inlined_call_operand.vmem [shape: f32[2,1,32], index: 17, kind: input, shape index: {}]   ;;  %s8475_s18 = inlined_call_operand.vmem [shape: f32[2,1,32], index: 18, kind: input, shape index: {}]   ;;  %s8476_s19 = inlined_call_operand.vmem [shape: f32[2,1,32], index: 19, kind: input, shape index: {}]   ;;  %s8477_s20 = inlined_call_operand.vmem [shape: f32[2,1,32], index: 20, kind: input, shape index: {}]   ;;  %s8478_s21 = inlined_call_operand.vmem [shape: f32[2,1,32], index: 21, kind: input, shape index: {}]   ;;  %s8479_s22 = inlined_call_operand.vmem [shape: bf16[32,128], index: 22, kind: input, shape index: {}]   ;;  %s8480_s23 = inlined_call_operand.vmem [shape: f32[1,128], index: 23, kind: input, shape index: {}]   ;;  %s8481_s24 = inlined_call_operand.hbm [shape: f32[2,8,128], index: 24, kind: output, shape index: {}]  }
   0x1   :  { %8492 = sst [smem:[#allocation11_spill]] %s8457_s0 }
   0x2   :  { %8493 = sst [smem:[#allocation12_spill]] %s8458_s1 }
   0x3   :  { %8494 = sst [smem:[#allocation13_spill]] %s8459_s2 }
   0x4   :  { %8495 = sst [smem:[#allocation14_spill]] %s8460_s3 }
   0x5   :  { %8496 = sst [smem:[#allocation15_spill]] %s8461_s4 }
   0x6   :  { %8497 = sst [smem:[#allocation16_spill]] %s8462_s5 }
   0x7   :  { %8498 = sst [smem:[#allocation17_spill]] %s8463_s6 }
   0x8   :  { %8499 = sst [smem:[#allocation18_spill]] %s8464_s7 }
   0x9   :  { %8500 = sst [smem:[#allocation19_spill]] %s8465_s8 }
   0xa   :  { %8501 = sst [smem:[#allocation20_spill]] %s8467_s10 }
   0xb   :  { %8502 = sst [smem:[#allocation21_spill]] %s8469_s12 }
   0xc   :  { %8503 = sst [smem:[#allocation22_spill]] %s8470_s13 }
   0xd   :  { %8504 = sst [smem:[#allocation23_spill]] %s8471_s14 }
   0xe   :  { %8505 = sst [smem:[#allocation24_spill]] %s8478_s21 }
   0xf   :  { %8506 = sst [smem:[#allocation25_spill]] %s8479_s22 }
  0x10   :  { %8507 = sst [smem:[#allocation26_spill]] %s8480_s23 }
  0x11   :  { %8508 = sst [smem:[#allocation27_spill]] %s8481_s24 }
  0x12   :  { %29 = vsyncpa [#allocation4], 0  ;;  %s7354_s5 = smov 0  }
  0x13 LB: > { %8509 = sst [smem:[#allocation6_spill]] %s7208_s5  ;;  %s7360_s26 = sadd.s32 4294967295, %s7208_s5   ;;  %s7208_s5 = sphi %s7354_s5, %s35_s5  }
  0x14   : > { %8510 = sst [smem:[#allocation7_spill]] %s7360_s26  ;;  %p6059_p0 = scmp.ge.s32.totalorder %s7208_s5, 1 }
  0x15   : > { %p823_p1 = scmp.lt.s32.totalorder %s7208_s5, 3 }
  0x17   : > { %p824_p2 = pnand %p6059_p0, %p823_p1 }
  0x19   : > { %827 = sbr.rel (%p824_p2) target bundleno = 8407 (0x20d7), region = 116 }
  0x20   : > { %p954_p3 = scmp.lt.s32.totalorder %s7360_s26, 1  ;;  %s8512_s3 = sld [smem:[#allocation13_spill]] }
  0x21   : > { %s8513_s1 = sld [smem:[#allocation15_spill]]  ;;  %s8516_s2 = sld [smem:[#allocation17_spill]] }
  0x22   : > { %s7366_s27 = scalar_select %p954_p3, %s7360_s26, 1 }
  0x23   : > { %s8520_s10 = sld [smem:[#allocation20_spill]]  ;;  %s8522_s12 = sld [smem:[#allocation21_spill]] }
  0x24   : > { %s6314_s28 = sshll.u32 %s7366_s27, 4  ;;  %s6319_s30 = sshll.u32 %s7366_s27, 8 }
  0x25   : > { %s8523_s13 = sld [smem:[#allocation22_spill]]  ;;  %s6320_s24 = sshll.u32 %s7366_s27, 10 }
  0x26   : > { %s7376_s25 = scalar_lea.vmem %s8512_s3, %s6314_s28  ;;  %s8524_s14 = sld [smem:[#allocation23_spill]] }
  0x27   : > { %s7381_s5 = scalar_lea.vmem %s8513_s1, %s6314_s28  ;;  %s7390_s29 = scalar_lea.vmem %s8516_s2, %s6314_s28 }
  0x28   : > { %8514 = sst [smem:[#allocation8_spill]] %s7381_s5  ;;  %s8519_s1 = sld [smem:[#allocation19_spill]] }
  0x29   : > { %8517 = sst [smem:[#allocation9_spill]] %s7390_s29  ;;  %s7408_s6 = scalar_lea.vmem %s8520_s10, %s6314_s28 }
  0x2a   : > { %8521 = sst [smem:[#allocation10_spill]] %s7408_s6  ;;  %s7418_s8 = scalar_lea.vmem %s8522_s12, %s6319_s30 }
  0x2b   : > { %s7423_s23 = scalar_lea.vmem %s8523_s13, %s6314_s28  ;;  %s1019_s12 = scalar_lea.vmem %s8475_s18, %s7366_s27 }
  0x2c   : > { %s7433_s29 = scalar_lea.vmem %s8524_s14, %s6320_s24  ;;  %s1022_s26 = scalar_lea.vmem %s8476_s19, %s7366_s27 }
  0x2d   : > { %s1025_s6 = scalar_lea.vmem %s8477_s20, %s7366_s27  ;;  %s8525_s7 = sld [smem:[#allocation24_spill]] }
  0x2e   : > { %s7399_s5 = scalar_lea.vmem %s8519_s1, %s6314_s28  ;;  %s8526_s0 = sld [smem:[#allocation7_spill]] }
  0x33   : > { %s1028_s2 = scalar_lea.vmem %s8525_s7, %s7366_s27 }
  0x34   : > { %p6075_p4 = scmp.ne.s32.totalorder %s8526_s0, 0 }
  0x35   : > { %s8527_s4 = sld [smem:[#allocation11_spill]] (!%p6075_p4)  ;;  %vm1036_vm0 = vcmask (!%p6075_p4), 261120  }
  0x36   : > { %1033 = sbr.rel (%p6075_p4) target bundleno = 61 (0x3d), region = 120 }
  0x3b   : > { %v1034_v0 = vld [vmem:[%s8527_s4] sm:$0xff] (!%p6075_p4)  ;;  %v1035_v1 = vld [vmem:[%s8527_s4 + $0x8] sm:$0xff] (!%p6075_p4) }
  0x3c   : > { %1037 = vst.msk [vmem:[#allocation2] sm:$0xff] (!%p6075_p4), %vm1036_vm0, %v1034_v0  ;;  %1038 = vst.msk [vmem:[#allocation2 + $0x8] sm:$0xff] (!%p6075_p4), %vm1036_vm0, %v1035_v1 }
  0x3d PF: > { %v6894_v2 = vld [vmem:[%s7376_s25] sm:$0xff]   ;;  %v7210_v3 = vmov 0.0   ;;  %v6895_v4 = vld [vmem:[%s7376_s25 + $0x8] sm:$0xff]   ;;  %vm7211_vm1 = vmmov 0   ;;  %vm1074_vm2 = vcmask 261120   ;;  %s8528_s25 = sld [smem:[#allocation14_spill]]  ;;  %v1039_v25 = vlaneseq }
  0x3e   : > { %6589 = vmatprep.subr.bf16.mxu0 %v7210_v3  ;;  %6597 = vmatprep.subr.bf16.mxu1 %v7210_v3  ;;  %s7212_s0 = smov 96   ;;  %vm1133_vm3 = vcmask 64512   ;;  %s7213_s22 = smov 64   ;;  %vm1258_vm5 = vcmask 1043456  }
  0x3f   : > { %6590 = vmatpush3.bf16.msra.mxu0 %v6894_v2  ;;  %6593 = vmatprep.mubr.msk.bf16.mxu0 %vm7211_vm1, %v7210_v3  ;;  %v7508_v26 = vshrl.u32 %v1039_v25, 7  ;;  %v1042_v27 = vand.u32 127, %v1039_v25  ;;  %s7214_s10 = smov 88   ;;  %s7215_s24 = smov 120  }
  0x40   : > { %6591 = vmatprep.subr.bf16.mxu0 %v7210_v3  ;;  %6599 = vmatprep.mubr.msk.bf16.mxu1 %vm7211_vm1, %v7210_v3  ;;  %s7216_s7 = smov 56   ;;  %s7217_s30 = smov 112  }
  0x41   : > { %vm1043_vm4 = vcmp.gt.s32.totalorder %v1042_v27, %v7508_v26  ;;  %s8530_s3 = sld [smem:[#allocation8_spill]]  ;;  %s7218_s28 = smov 80  }
  0x42   : > { %v7512_v28 = vsel %vm1043_vm4, -1e+30, %v7210_v3  ;;  %s7219_s1 = smov 48   ;;  %s7220_s13 = smov 72  }
  0x43   : > { %v1045_v5 = vld [vmem:[#allocation2] sm:$0xff]  ;;  %v1046_v6 = vld [vmem:[#allocation2 + $0x8] sm:$0xff]  ;;  %6592 = vmatpush3.bf16.msra.mxu0 %v6895_v4  ;;  %s8529_s21 = scalar_lea.vmem %s8528_s25, %s7366_s27  ;;  %s7221_s14 = smov 104  }
  0x44   : > { %v1050_v7 = vpack.c.bf16 %v1046_v6, %v1045_v5  ;;  %6603 = vmatprep.subr.bf16.mxu0 %v7210_v3  ;;  %v6076_v8 = vld [vmem:[%s8529_s21] ss:$0 sm:$0xff]  ;;  %s7222_s25 = smov 40  }
  0x46   : > { %6594 = vmatmul.mubr.msk.bf16.vlgmr.msra.gmra.mrb[0].mxu0 %vm1074_vm2, %v1050_v7 }
  0x47   : > { %6605 = vmatprep.mubr.msk.bf16.mxu0 %vm7211_vm1, %v7210_v3 }
 0x119   : > { %v1112_v9 = vpop.f32.mrb[0].mxu0 }
 0x11a   : > { %v1113_v10 = vadd.f32 %v6076_v8, %v1112_v9  ;;  %v6595_v11 = vpop.f32.mrb[1].mxu0 }
 0x11b   : > { %v1115_v12 = vpop.f32.mrb[2].mxu0 }
 0x11c   : > { %v7484_v13 = vpack.c.bf16 %v1113_v10, %v1113_v10  ;;  %v1116_v14 = vadd.f32 %v6076_v8, %v1115_v12  ;;  %v6596_v15 = vpop.f32.mrb[3].mxu0  ;;  %v1119_v19 = vmul.f32 0.35355338, %v1113_v10 }
 0x11e   : > { %1131 = vrot.lane.b32.xlu0 %v7484_v13, %s7212_s0  ;;  %v7488_v16 = vpack.c.bf16 %v1116_v14, %v1116_v14  ;;  %v7495_v22 = vpack.c.bf16 %v1119_v19, %v1119_v19  ;;  %v1120_v23 = vmul.f32 0.35355338, %v1116_v14 }
 0x120   : > { %v7502_v24 = vpack.c.bf16 %v1120_v23, %v1120_v23 }
 0x122   : > { %1181 = vrot.lane.b32.xlu0 %v7488_v16, %s7212_s0 }
 0x190   : > { %v1132_v17 = vpop.permute.xlu0 %1131 }
 0x191   : > { %v1138_v18 = vsel %vm1133_vm3, %v1132_v17, 0 }
 0x192   : > { %6598 = vmatpush3.bf16.xpose.msra.mxu1 %v1138_v18 }
 0x193   : > { %6609 = vmatprep.subr.bf16.mxu1 %v7210_v3 }
 0x194   : > { %v1182_v20 = vpop.permute.xlu0 %1181 }
 0x195   : > { %v1187_v21 = vsel %vm1133_vm3, %v1182_v20, 0 }
 0x196   : > { %6604 = vmatpush3.bf16.xpose.msra.mxu0 %v1187_v21 }
 0x197   : > { %6615 = vmatprep.subr.bf16.mxu0 %v7210_v3 }
 0x199   : > { %6600 = vmatmul.mubr.msk.bf16.vlgmr.msra.gmra.mrb[0].mxu1 %vm1133_vm3, %v7495_v22 }
 0x19a   : > { %6611 = vmatprep.mubr.msk.bf16.mxu1 %vm7211_vm1, %v7210_v3 }
 0x19d   : > { %6606 = vmatmul.mubr.msk.bf16.vlgmr.msra.gmra.mrb[4].mxu0 %vm1133_vm3, %v7502_v24 }
 0x19e   : > { %6617 = vmatprep.mubr.msk.bf16.mxu0 %vm7211_vm1, %v7210_v3 }
 0x26c   : > { %v1174_v29 = vpop.f32.mrb[0].mxu1 }
 0x26d   : > { %v1175_v30 = vadd.f32 %v1174_v29, %v7512_v28  ;;  %v6601_v31 = vpop.f32.mrb[1].mxu1 }
 0x26e   : > { %v1177_v32 = vpop.f32.mrb[2].mxu1 }
 0x26f   : > { %v6602_v33 = vpop.f32.mrb[3].mxu1  ;;  %v1229_v34 = vsel %vm1133_vm3, %v1175_v30, -inf }
 0x270   : > { %v1223_v35 = vpop.f32.mrb[4].mxu0  ;;  %1230 = vmax.xlane.f32.xlu1 %v1229_v34 }
 0x271   : > { %v1224_v36 = vadd.f32 %v1223_v35, %v7512_v28  ;;  %v6607_v37 = vpop.f32.mrb[5].mxu0 }
 0x272   : > { %v1226_v38 = vpop.f32.mrb[6].mxu0 }
 0x273   : > { %v6608_v39 = vpop.f32.mrb[7].mxu0  ;;  %v1232_v40 = vsel %vm1133_vm3, %v1224_v36, -inf }
 0x274   : > { %1233 = vmax.xlane.f32.xlu1 %v1232_v40 }
 0x285   : > { %1253 = vrot.lane.b32.xlu1 %v7484_v13, %s7213_s22 }
 0x289   : > { %1302 = vrot.lane.b32.xlu1 %v7488_v16, %s7213_s22  ;;  %s8534_s22 = sld [smem:[#allocation12_spill]] }
 0x28d   : > { %1354 = vrot.lane.b32.xlu1 %v7484_v13, %s7214_s10 }
 0x2fd   : > { %v1231_v41 = vpop.xlane.xlu1 %1230 }
 0x2fe   : > { %v1235_v42 = vsub.f32 %v1175_v30, %v1231_v41 }
 0x300   : > { %v1237_v43 = vmul.f32 1.442695, %v1235_v42 }
 0x301   : > { %v1234_v44 = vpop.xlane.xlu1 %1233 }
 0x302   : > { %7028 = vpow2.f32 %v1237_v43  ;;  %v1236_v45 = vsub.f32 %v1224_v36, %v1234_v44 }
 0x304   : > { %v1239_v46 = vmul.f32 1.442695, %v1236_v45 }
 0x305   : > { %v1254_v47 = vpop.permute.xlu1 %1253 }
 0x306   : > { %7030 = vpow2.f32 %v1239_v46  ;;  %v1260_v48 = vsel %vm1258_vm5, %v1254_v47, 0 }
 0x307   : > { %6610 = vmatpush3.bf16.msra.mxu1 %v1260_v48 }
 0x308   : > { %6621 = vmatprep.subr.bf16.mxu1 %v7210_v3 }
 0x309   : > { %v1303_v49 = vpop.permute.xlu1 %1302 }
 0x30a   : > { %v1308_v50 = vsel %vm1258_vm5, %v1303_v49, 0 }
 0x30b   : > { %6616 = vmatpush3.bf16.msra.mxu0 %v1308_v50  ;;  %v1122_v50 = vld [vmem:[%s8530_s3 + $0x4] sm:$0xf] }
 0x30c   : > { %v7029_v51 = vpop.eup %7028  ;;  %6627 = vmatprep.subr.bf16.mxu0 %v7210_v3 }
 0x30d   : > { %v1241_v52 = vsel %vm1133_vm3, %v7029_v51, 0.0  ;;  %v1355_v55 = vpop.permute.xlu1 %1354 }
 0x30e   : > { %1242 = vadd.xlane.f32.xlu0 %v1241_v52  ;;  %v1360_v62 = vsel %vm1133_vm3, %v1355_v55, 0  ;;  %v1121_v55 = vld [vmem:[%s8530_s3] sm:$0xf] }
 0x310   : > { %v7031_v53 = vpop.eup %7030 }
 0x311   : > { %v1244_v54 = vsel %vm1133_vm3, %v7031_v53, 0.0 }
 0x312   : > { %1245 = vadd.xlane.f32.xlu1 %v1244_v54 }
 0x323   : > { %1405 = vrot.lane.b32.xlu1 %v7488_v16, %s7214_s10 }
 0x324   : > { %1352 = vrot.lane.b32.xlu0 %v7495_v22, %s7215_s24 }
 0x327   : > { %1403 = vrot.lane.b32.xlu1 %v7502_v24, %s7215_s24 }
 0x39b   : > { %v1243_v56 = vpop.xlane.xlu0 %1242 }
 0x39c   : > { %7032 = vrcp.f32 %v1243_v56 }
 0x39f   : > { %v1246_v57 = vpop.xlane.xlu1 %1245  ;;  %v1353_v4 = vpop.permute.xlu0 %1352 }
 0x3a0   : > { %7034 = vrcp.f32 %v1246_v57 }
 0x3a3   : > { %v1406_v0 = vpop.permute.xlu1 %1405 }
 0x3a4   : > { %v1411_v2 = vsel %vm1133_vm3, %v1406_v0, 0 }
 0x3a6   : > { %v7033_v58 = vpop.eup %7032 }
 0x3a7   : > { %v1249_v59 = vmul.f32 %v7033_v58, %v7029_v51  ;;  %v1404_v5 = vpop.permute.xlu1 %1403  ;;  %v1625_v58 = vsel %vm1258_vm5, %v1121_v55, 0 }
 0x3a9   : > { %v1251_v60 = vpack.c.bf16 %v1249_v59, %v1249_v59 }
 0x3aa   : > { %v7035_v61 = vpop.eup %7034 }
 0x3ab   : > { %v1250_v63 = vmul.f32 %v7035_v61, %v7031_v53  ;;  %6612 = vmatmul.mubr.msk.bf16.vlgmr.msra.gmra.mrb[4].mxu1 %vm1133_vm3, %v1251_v60  ;;  %v1578_v53 = vsel %vm1258_vm5, %v1122_v50, 0 }
 0x3ac   : > { %6622 = vmatpush3.bf16.xpose.msra.mxu1 %v1360_v62  ;;  %6623 = vmatprep.mubr.msk.bf16.mxu1 %vm7211_vm1, %v7210_v3 }
 0x3ad   : > { %v1252_v1 = vpack.c.bf16 %v1250_v63, %v1250_v63  ;;  %6633 = vmatprep.subr.bf16.mxu1 %v7210_v3 }
 0x3af   : > { %6618 = vmatmul.mubr.msk.bf16.vlgmr.msra.gmra.mrb[8].mxu0 %vm1133_vm3, %v1252_v1 }
 0x3b0   : > { %6628 = vmatpush3.bf16.xpose.msra.mxu0 %v1411_v2  ;;  %6629 = vmatprep.mubr.msk.bf16.mxu0 %vm7211_vm1, %v7210_v3 }
 0x3b1   : > { %6639 = vmatprep.subr.bf16.mxu0 %v7210_v3 }
 0x3b3   : > { %6624 = vmatmul.mubr.msk.bf16.vlgmr.msra.gmra.mrb[8].mxu1 %vm1133_vm3, %v1353_v4 }
 0x3b4   : > { %6635 = vmatprep.mubr.msk.bf16.mxu1 %vm7211_vm1, %v7210_v3 }
 0x3b7   : > { %6630 = vmatmul.mubr.msk.bf16.vlgmr.msra.gmra.mrb[12].mxu0 %vm1133_vm3, %v1404_v5 }
 0x3b8   : > { %6641 = vmatprep.mubr.msk.bf16.mxu0 %vm7211_vm1, %v7210_v3 }
 0x47e   : > { %v7550_v6 = vpop.f32.mrb[4].mxu1 }
 0x47f   : > { %v6613_v7 = vpop.f32.mrb[5].mxu1 }
 0x480   : > { %v1299_v8 = vpop.f32.mrb[6].mxu1 }
 0x481   : > { %v6614_v9 = vpop.f32.mrb[7].mxu1 }
 0x482   : > { %v7552_v10 = vpop.f32.mrb[8].mxu0 }
 0x483   : > { %v1350_v11 = vpack.c.bf16 %v7552_v10, %v7550_v6  ;;  %v6619_v12 = vpop.f32.mrb[9].mxu0 }
 0x484   : > { %v1347_v14 = vpop.f32.mrb[10].mxu0 }
 0x485   : > { %v6620_v15 = vpop.f32.mrb[11].mxu0 }
 0x486   : > { %v1396_v17 = vpop.f32.mrb[8].mxu1 }
 0x487   : > { %v1397_v18 = vadd.f32 %v1396_v17, %v7512_v28  ;;  %v6625_v19 = vpop.f32.mrb[9].mxu1 }
 0x488   : > { %v1399_v20 = vpop.f32.mrb[10].mxu1 }
 0x489   : > { %v6626_v21 = vpop.f32.mrb[11].mxu1  ;;  %v1453_v23 = vsel %vm1133_vm3, %v1397_v18, -inf }
 0x48a   : > { %1454 = vmax.xlane.f32.xlu1 %v1453_v23  ;;  %v1447_v25 = vpop.f32.mrb[12].mxu0 }
 0x48b   : > { %v1448_v27 = vadd.f32 %v1447_v25, %v7512_v28  ;;  %v6631_v29 = vpop.f32.mrb[13].mxu0 }
 0x48c   : > { %v1450_v30 = vpop.f32.mrb[14].mxu0 }
 0x48d   : > { %v6632_v31 = vpop.f32.mrb[15].mxu0  ;;  %v1456_v32 = vsel %vm1133_vm3, %v1448_v27, -inf }
 0x48e   : > { %1457 = vmax.xlane.f32.xlu0 %v1456_v32 }
 0x4a4   : > { %1525 = vrot.lane.b32.xlu0 %v7488_v16, %s7216_s7 }
 0x4a8   : > { %1668 = vrot.lane.b32.xlu0 %v7495_v22, %s7217_s30 }
 0x517   : > { %v1455_v33 = vpop.xlane.xlu1 %1454 }
 0x518   : > { %v1459_v34 = vsub.f32 %v1397_v18, %v1455_v33 }
 0x51a   : > { %v1461_v35 = vmul.f32 1.442695, %v1459_v34 }
 0x51b   : > { %v1458_v36 = vpop.xlane.xlu0 %1457 }
 0x51c   : > { %7036 = vpow2.f32 %v1461_v35  ;;  %v1460_v37 = vsub.f32 %v1448_v27, %v1458_v36 }
 0x51e   : > { %v1463_v38 = vmul.f32 1.442695, %v1460_v37 }
 0x51f   : > { %v1526_v39 = vpop.permute.xlu0 %1525 }
 0x520   : > { %7038 = vpow2.f32 %v1463_v38  ;;  %v1531_v40 = vsel %vm1258_vm5, %v1526_v39, 0 }
 0x521   : > { %6640 = vmatpush3.bf16.msra.mxu0 %v1531_v40 }
 0x522   : > { %6651 = vmatprep.subr.bf16.mxu0 %v7210_v3 }
 0x523   : > { %v1669_v12 = vpop.permute.xlu0 %1668 }
 0x526   : > { %v7037_v41 = vpop.eup %7036 }
 0x527   : > { %v1465_v42 = vsel %vm1133_vm3, %v7037_v41, 0.0 }
 0x528   : > { %1466 = vadd.xlane.f32.xlu1 %v1465_v42 }
 0x52a   : > { %v7039_v43 = vpop.eup %7038 }
 0x52b   : > { %v1468_v44 = vsel %vm1133_vm3, %v7039_v43, 0.0 }
 0x52c   : > { %1469 = vadd.xlane.f32.xlu1 %v1468_v44 }
 0x53d   : > { %1477 = vrot.lane.b32.xlu1 %v7484_v13, %s7216_s7  ;;  %s8531_s7 = sld [smem:[#allocation16_spill]] }
 0x541   : > { %1670 = vrot.lane.b32.xlu1 %v7484_v13, %s7218_s28 }
 0x545   : > { %1720 = vrot.lane.b32.xlu1 %v7488_v16, %s7218_s28 }
 0x549   : > { %1718 = vrot.lane.b32.xlu1 %v7502_v24, %s7217_s30 }
 0x5b5   : > { %v1467_v45 = vpop.xlane.xlu1 %1466 }
 0x5b6   : > { %7040 = vrcp.f32 %v1467_v45 }
 0x5b9   : > { %v1470_v46 = vpop.xlane.xlu1 %1469 }
 0x5ba   : > { %7042 = vrcp.f32 %v1470_v46 }
 0x5bd   : > { %v1478_v47 = vpop.permute.xlu1 %1477 }
 0x5be   : > { %v1483_v48 = vsel %vm1258_vm5, %v1478_v47, 0 }
 0x5bf   : > { %6634 = vmatpush3.bf16.msra.mxu1 %v1483_v48 }
 0x5c0   : > { %v7041_v49 = vpop.eup %7040  ;;  %6645 = vmatprep.subr.bf16.mxu1 %v7210_v3 }
 0x5c1   : > { %v1473_v51 = vmul.f32 %v7041_v49, %v7037_v41  ;;  %v1671_v59 = vpop.permute.xlu1 %1670 }
 0x5c2   : > { %v1676_v8 = vsel %vm1133_vm3, %v1671_v59, 0 }
 0x5c3   : > { %v1475_v52 = vpack.c.bf16 %v1473_v51, %v1473_v51 }
 0x5c4   : > { %v7043_v54 = vpop.eup %7042 }
 0x5c5   : > { %v1474_v56 = vmul.f32 %v7043_v54, %v7039_v43  ;;  %6636 = vmatmul.mubr.msk.bf16.vlgmr.msra.gmra.mrb[12].mxu1 %vm1133_vm3, %v1475_v52  ;;  %v1721_v60 = vpop.permute.xlu1 %1720 }
 0x5c6   : > { %6646 = vmatpush3.bf16.msra.mxu1 %v1578_v53  ;;  %6647 = vmatprep.mubr.msk.bf16.mxu1 %vm7211_vm1, %v7210_v3  ;;  %v1726_v61 = vsel %vm1133_vm3, %v1721_v60, 0 }
 0x5c7   : > { %v1476_v57 = vpack.c.bf16 %v1474_v56, %v1474_v56  ;;  %6657 = vmatprep.subr.bf16.mxu1 %v7210_v3 }
 0x5c9   : > { %6642 = vmatmul.mubr.msk.bf16.vlgmr.msra.gmra.mrb[16].mxu0 %vm1133_vm3, %v1476_v57  ;;  %v1719_v62 = vpop.permute.xlu1 %1718 }
 0x5ca   : > { %6652 = vmatpush3.bf16.msra.mxu0 %v1625_v58  ;;  %6653 = vmatprep.mubr.msk.bf16.mxu0 %vm7211_vm1, %v7210_v3 }
 0x5cb   : > { %6663 = vmatprep.subr.bf16.mxu0 %v7210_v3 }
 0x5d1   : > { %6654 = vmatmul.mubr.msk.bf16.vlgmr.msra.gmra.mrb[20].mxu0 %vm1133_vm3, %v1350_v11 }
 0x5d2   : > { %6665 = vmatprep.mubr.msk.bf16.mxu0 %vm7211_vm1, %v7210_v3 }
 0x5d3   : > { %6664 = vmatpush3.bf16.xpose.msra.mxu0 %v1726_v61 }
 0x5d4   : > { %6675 = vmatprep.subr.bf16.mxu0 %v7210_v3 }
 0x5da   : > { %6666 = vmatmul.mubr.msk.bf16.vlgmr.msra.gmra.mrb[24].mxu0 %vm1133_vm3, %v1719_v62  ;;  %v1123_v62 = vld [vmem:[%s8530_s3 + $0x8] sm:$0xf] }
 0x5db   : > { %6677 = vmatprep.mubr.msk.bf16.mxu0 %vm7211_vm1, %v7210_v3 }
 0x698   : > { %v1519_v63 = vpop.f32.mrb[12].mxu1 }
 0x699   : > { %v6637_v0 = vpop.f32.mrb[13].mxu1 }
 0x69a   : > { %v1522_v1 = vpop.f32.mrb[14].mxu1 }
 0x69b   : > { %v6638_v2 = vpop.f32.mrb[15].mxu1 }
 0x69c   : > { %v1567_v4 = vpop.f32.mrb[16].mxu0 }
 0x69d   : > { %v1573_v5 = vpack.c.bf16 %v1567_v4, %v1519_v63  ;;  %v6643_v6 = vpop.f32.mrb[17].mxu0  ;;  %v1893_v63 = vsel %vm1258_vm5, %v1123_v62, 0 }
 0x69e   : > { %v1570_v7 = vpop.f32.mrb[18].mxu0 }
 0x69f   : > { %v6644_v9 = vpop.f32.mrb[19].mxu0  ;;  %6648 = vmatmul.mubr.msk.bf16.vlgmr.msra.gmra.mrb[16].mxu1 %vm1133_vm3, %v1573_v5 }
 0x6a0   : > { %6658 = vmatpush3.bf16.xpose.msra.mxu1 %v1676_v8  ;;  %6659 = vmatprep.mubr.msk.bf16.mxu1 %vm7211_vm1, %v7210_v3 }
 0x6a1   : > { %6669 = vmatprep.subr.bf16.mxu1 %v7210_v3 }
 0x6a4   : > { %v1661_v10 = vpop.f32.mrb[20].mxu0 }
 0x6a5   : > { %v6655_v11 = vpop.f32.mrb[21].mxu0 }
 0x6a6   : > { %v1664_v14 = vpop.f32.mrb[22].mxu0 }
 0x6a7   : > { %v6656_v15 = vpop.f32.mrb[23].mxu0  ;;  %6660 = vmatmul.mubr.msk.bf16.vlgmr.msra.gmra.mrb[20].mxu1 %vm1133_vm3, %v1669_v12 }
 0x6a8   : > { %6671 = vmatprep.mubr.msk.bf16.mxu1 %vm7211_vm1, %v7210_v3 }
 0x6ad   : > { %v1762_v17 = vpop.f32.mrb[24].mxu0 }
 0x6ae   : > { %v1763_v18 = vadd.f32 %v1762_v17, %v7512_v28  ;;  %v6667_v19 = vpop.f32.mrb[25].mxu0 }
 0x6af   : > { %v1765_v20 = vpop.f32.mrb[26].mxu0 }
 0x6b0   : > { %v6668_v21 = vpop.f32.mrb[27].mxu0  ;;  %v1771_v23 = vsel %vm1133_vm3, %v1763_v18, -inf }
 0x6b1   : > { %1772 = vmax.xlane.f32.xlu1 %v1771_v23 }
 0x6c2   : > { %1792 = vrot.lane.b32.xlu1 %v7484_v13, %s7219_s1 }
 0x6c6   : > { %1940 = vrot.lane.b32.xlu1 %v7484_v13, %s7220_s13 }
 0x6ca   : > { %1990 = vrot.lane.b32.xlu1 %v7488_v16, %s7220_s13 }
 0x6ce   : > { %1988 = vrot.lane.b32.xlu1 %v7502_v24, %s7221_s14 }
 0x73e   : > { %v1773_v25 = vpop.xlane.xlu1 %1772 }
 0x73f   : > { %v1775_v30 = vsub.f32 %v1763_v18, %v1773_v25 }
 0x741   : > { %v1778_v31 = vmul.f32 1.442695, %v1775_v30 }
 0x742   : > { %v1793_v27 = vpop.permute.xlu1 %1792 }
 0x743   : > { %v1798_v29 = vsel %vm1258_vm5, %v1793_v27, 0  ;;  %7044 = vpow2.f32 %v1778_v31 }
 0x744   : > { %6670 = vmatpush3.bf16.msra.mxu1 %v1798_v29 }
 0x745   : > { %6681 = vmatprep.subr.bf16.mxu1 %v7210_v3 }
 0x746   : > { %v1941_v57 = vpop.permute.xlu1 %1940 }
 0x747   : > { %v1946_v59 = vsel %vm1133_vm3, %v1941_v57, 0 }
 0x74a   : > { %v1991_v5 = vpop.permute.xlu1 %1990 }
 0x74d   : > { %v7045_v43 = vpop.eup %7044 }
 0x74e   : > { %v1783_v44 = vsel %vm1133_vm3, %v7045_v43, 0.0  ;;  %v1989_v20 = vpop.permute.xlu1 %1988 }
 0x772   : > { %v1614_v32 = vpop.f32.mrb[16].mxu1 }
 0x773   : > { %v7619_v33 = vadd.f32 %v1661_v10, %v1614_v32  ;;  %v6649_v34 = vpop.f32.mrb[17].mxu1  ;;  %v1996_v10 = vsel %vm1133_vm3, %v1991_v5, 0 }
 0x774   : > { %v1617_v35 = vpop.f32.mrb[18].mxu1 }
 0x775   : > { %v7621_v36 = vadd.f32 %v1664_v14, %v1617_v35  ;;  %v6650_v37 = vpop.f32.mrb[19].mxu1 }
 0x77a   : > { %v1712_v38 = vpop.f32.mrb[20].mxu1 }
 0x77b   : > { %v1713_v24 = vadd.f32 %v1712_v38, %v7512_v28  ;;  %v6661_v39 = vpop.f32.mrb[21].mxu1 }
 0x77c   : > { %v1715_v40 = vpop.f32.mrb[22].mxu1 }
 0x77d   : > { %v6662_v41 = vpop.f32.mrb[23].mxu1  ;;  %v1768_v42 = vsel %vm1133_vm3, %v1713_v24, -inf }
 0x77e   : > { %1769 = vmax.xlane.f32.xlu0 %v1768_v42 }
 0x782   : > { %1784 = vadd.xlane.f32.xlu0 %v1783_v44 }
 0x80b   : > { %v1770_v45 = vpop.xlane.xlu0 %1769 }
 0x80c   : > { %v1774_v46 = vsub.f32 %v1713_v24, %v1770_v45 }
 0x80e   : > { %v1776_v47 = vmul.f32 1.442695, %v1774_v46 }
 0x80f   : > { %v1785_v50 = vpop.xlane.xlu0 %1784 }
 0x810   : > { %7046 = vpow2.f32 %v1776_v47 }
 0x811   : > { %7048 = vrcp.f32 %v1785_v50  ;;  %v1124_v50 = vld [vmem:[%s8530_s3 + $0xc] sm:$0xf]  ;;  %s8532_s3 = scalar_lea.vmem %s8531_s7, %s7366_s27 }
 0x81a   : > { %v7047_v48 = vpop.eup %7046 }
 0x81b   : > { %v1780_v49 = vsel %vm1133_vm3, %v7047_v48, 0.0  ;;  %v7049_v51 = vpop.eup %7048 }
 0x81c   : > { %1781 = vadd.xlane.f32.xlu0 %v1780_v49  ;;  %v1789_v53 = vmul.f32 %v7049_v51, %v7045_v43  ;;  %v2163_v51 = vsel %vm1258_vm5, %v1124_v50, 0 }
 0x81e   : > { %v1791_v56 = vpack.c.bf16 %v1789_v53, %v1789_v53 }
 0x832   : > { %1840 = vrot.lane.b32.xlu0 %v7488_v16, %s7219_s1  ;;  %s8533_s1 = sld [smem:[#allocation9_spill]] }
 0x836   : > { %1938 = vrot.lane.b32.xlu0 %v7495_v22, %s7221_s14 }
 0x8a9   : > { %v1782_v52 = vpop.xlane.xlu0 %1781 }
 0x8aa   : > { %7050 = vrcp.f32 %v1782_v52 }
 0x8ad   : > { %v1841_v54 = vpop.permute.xlu0 %1840 }
 0x8ae   : > { %v1846_v55 = vsel %vm1258_vm5, %v1841_v54, 0 }
 0x8af   : > { %6676 = vmatpush3.bf16.msra.mxu0 %v1846_v55 }
 0x8b0   : > { %6687 = vmatprep.subr.bf16.mxu0 %v7210_v3 }
 0x8b1   : > { %v1939_v61 = vpop.permute.xlu0 %1938 }
 0x8b2   : > { %6678 = vmatmul.mubr.msk.bf16.vlgmr.msra.gmra.mrb[28].mxu0 %vm1133_vm3, %v1791_v56 }
 0x8b3   : > { %6689 = vmatprep.mubr.msk.bf16.mxu0 %vm7211_vm1, %v7210_v3 }
 0x8b4   : > { %v7051_v22 = vpop.eup %7050 }
 0x8b5   : > { %v1788_v58 = vmul.f32 %v7051_v22, %v7047_v48 }
 0x8b7   : > { %v1790_v60 = vpack.c.bf16 %v1788_v58, %v1788_v58 }
 0x8b8   : > { %6688 = vmatpush3.bf16.xpose.msra.mxu0 %v1946_v59 }
 0x8b9   : > { %6672 = vmatmul.mubr.msk.bf16.vlgmr.msra.gmra.mrb[24].mxu1 %vm1133_vm3, %v1790_v60  ;;  %6699 = vmatprep.subr.bf16.mxu0 %v7210_v3 }
 0x8ba   : > { %6683 = vmatprep.mubr.msk.bf16.mxu1 %vm7211_vm1, %v7210_v3  ;;  %6682 = vmatpush3.bf16.msra.mxu1 %v1893_v63 }
 0x8bb   : > { %6693 = vmatprep.subr.bf16.mxu1 %v7210_v3 }
 0x8bf   : > { %6690 = vmatmul.mubr.msk.bf16.vlgmr.msra.gmra.mrb[32].mxu0 %vm1133_vm3, %v1939_v61 }
 0x8c0   : > { %6701 = vmatprep.mubr.msk.bf16.mxu0 %vm7211_vm1, %v7210_v3 }
 0x985   : > { %v1882_v0 = vpop.f32.mrb[28].mxu0 }
 0x986   : > { %v6679_v1 = vpop.f32.mrb[29].mxu0 }
 0x987   : > { %v1885_v2 = vpop.f32.mrb[30].mxu0  ;;  %v6100_v1 = vld [vmem:[%s8532_s3] ss:$0 sm:$0xff]  ;;  %s8536_s3 = scalar_lea.vmem %s8474_s17, %s7366_s27 }
 0x988   : > { %v6680_v4 = vpop.f32.mrb[31].mxu0 }
 0x98c   : > { %v1834_v6 = vpop.f32.mrb[24].mxu1 }
 0x98d   : > { %v1888_v7 = vpack.c.bf16 %v1882_v0, %v1834_v6  ;;  %v6673_v8 = vpop.f32.mrb[25].mxu1 }
 0x98e   : > { %v1837_v9 = vpop.f32.mrb[26].mxu1 }
 0x98f   : > { %v6674_v11 = vpop.f32.mrb[27].mxu1  ;;  %6684 = vmatmul.mubr.msk.bf16.vlgmr.msra.gmra.mrb[28].mxu1 %vm1133_vm3, %v1888_v7 }
 0x990   : > { %6694 = vmatpush3.bf16.xpose.msra.mxu1 %v1996_v10  ;;  %6695 = vmatprep.mubr.msk.bf16.mxu1 %vm7211_vm1, %v7210_v3  ;;  %v7168_v11 = vld [vmem:[#allocation2] sm:$0xff] }
 0x991   : > { %6705 = vmatprep.subr.bf16.mxu1 %v7210_v3 }
 0x992   : > { %v1982_v12 = vpop.f32.mrb[32].mxu0 }
 0x993   : > { %v1983_v14 = vadd.f32 %v1982_v12, %v7512_v28  ;;  %v6691_v15 = vpop.f32.mrb[33].mxu0 }
 0x994   : > { %v1985_v17 = vpop.f32.mrb[34].mxu0  ;;  %v7169_v15 = vld [vmem:[#allocation2 + $0x8] sm:$0xff] }
 0x995   : > { %v6692_v18 = vpop.f32.mrb[35].mxu0  ;;  %v2038_v19 = vsel %vm1133_vm3, %v1983_v14, -inf }
 0x996   : > { %2039 = vmax.xlane.f32.xlu0 %v2038_v19 }
 0x997   : > { %6696 = vmatmul.mubr.msk.bf16.vlgmr.msra.gmra.mrb[32].mxu1 %vm1133_vm3, %v1989_v20 }
 0x998   : > { %6707 = vmatprep.mubr.msk.bf16.mxu1 %vm7211_vm1, %v7210_v3 }
 0xa23   : > { %v2040_v21 = vpop.xlane.xlu0 %2039 }
 0xa24   : > { %v2044_v23 = vsub.f32 %v1983_v14, %v2040_v21 }
 0xa26   : > { %v2046_v25 = vmul.f32 1.442695, %v2044_v23 }
 0xa28   : > { %7052 = vpow2.f32 %v2046_v25 }
 0xa32   : > { %v7053_v27 = vpop.eup %7052 }
 0xa33   : > { %v2050_v29 = vsel %vm1133_vm3, %v7053_v27, 0.0 }
 0xa34   : > { %2051 = vadd.xlane.f32.xlu0 %v2050_v29 }
 0xa62   : > { %v1929_v30 = vpop.f32.mrb[28].mxu1 }
 0xa63   : > { %v1936_v31 = vadd.f32 %v1929_v30, %v7619_v33  ;;  %v6685_v32 = vpop.f32.mrb[29].mxu1 }
 0xa64   : > { %v1932_v34 = vpop.f32.mrb[30].mxu1 }
 0xa65   : > { %v1937_v35 = vadd.f32 %v1932_v34, %v7621_v36  ;;  %v6686_v37 = vpop.f32.mrb[31].mxu1  ;;  %v6896_v34 = vld [vmem:[%s7399_s5] sm:$0xff]  }
 0xa66   : > { %v1047_v37 = vld [vmem:[%s8534_s22] sm:$0xff] }
 0xa6a   : > { %v2032_v38 = vpop.f32.mrb[32].mxu1 }
 0xa6b   : > { %v2033_v24 = vadd.f32 %v2032_v38, %v7512_v28  ;;  %v6697_v39 = vpop.f32.mrb[33].mxu1  ;;  %v1048_v38 = vld [vmem:[%s8534_s22 + $0x8] sm:$0xff] }
 0xa6c   : > { %v2035_v40 = vpop.f32.mrb[34].mxu1  ;;  %v6898_v39 = vld [vmem:[%s8533_s1] sm:$0xff]  }
 0xa6d   : > { %v6698_v41 = vpop.f32.mrb[35].mxu1  ;;  %v2041_v42 = vsel %vm1133_vm3, %v2033_v24, -inf  ;;  %v6899_v40 = vld [vmem:[%s8533_s1 + $0x8] sm:$0xff]   ;;  %s8535_s1 = scalar_lea.vmem %s8473_s16, %s7366_s27 }
 0xa6e   : > { %2042 = vmax.xlane.f32.xlu1 %v2041_v42 }
 0xa7f   : > { %2062 = vrot.lane.b32.xlu1 %v7484_v13, %s7222_s25 }
 0xac1   : > { %v2052_v43 = vpop.xlane.xlu0 %2051 }
 0xac2   : > { %7054 = vrcp.f32 %v2052_v43 }
 0xacc   : > { %v7055_v33 = vpop.eup %7054 }
 0xacd   : > { %v2058_v36 = vmul.f32 %v7055_v33, %v7053_v27 }
 0xacf   : > { %v2060_v48 = vpack.c.bf16 %v2058_v36, %v2058_v36 }
 0xafb   : > { %v2043_v44 = vpop.xlane.xlu1 %2042 }
 0xafc   : > { %v2045_v45 = vsub.f32 %v2033_v24, %v2043_v44  ;;  %v1049_v24 = vpack.c.bf16 %v1048_v38, %v1047_v37 }
 0xafe   : > { %v2048_v46 = vmul.f32 1.442695, %v2045_v45 }
 0xaff   : > { %v2063_v47 = vpop.permute.xlu1 %2062 }
 0xb00   : > { %7056 = vpow2.f32 %v2048_v46  ;;  %v2068_v28 = vsel %vm1258_vm5, %v2063_v47, 0  ;;  %v6101_v46 = vld [vmem:[%s8535_s1] ss:$0 sm:$0xff]  ;;  %s8537_s1 = scalar_lea.vmem %s8466_s9, %s7366_s27 }
 0xb01   : > { %6700 = vmatpush3.bf16.msra.mxu0 %v2068_v28 }
 0xb02   : > { %6711 = vmatprep.subr.bf16.mxu0 %v7210_v3 }
 0xb04   : > { %6702 = vmatmul.mubr.msk.bf16.vlgmr.msra.gmra.mrb[36].mxu0 %vm1133_vm3, %v2060_v48 }
 0xb05   : > { %6713 = vmatprep.mubr.msk.bf16.mxu0 %vm7211_vm1, %v7210_v3  ;;  %6712 = vmatpush3.bf16.msra.mxu0 %v2163_v51 }
 0xb06   : > { %6725 = vmatprep.subr.bf16.mxu0 %v7210_v3 }
 0xb0a   : > { %v7057_v13 = vpop.eup %7056 }
 0xb0b   : > { %v2053_v49 = vsel %vm1133_vm3, %v7057_v13, 0.0 }
 0xb0c   : > { %2054 = vadd.xlane.f32.xlu0 %v2053_v49  ;;  %v6102_v49 = vld [vmem:[%s8536_s3] ss:$0 sm:$0xff]  ;;  %s8538_s3 = sld [smem:[#allocation18_spill]] }
 0xb22   : > { %2110 = vrot.lane.b32.xlu0 %v7488_v16, %s7222_s25 }
 0xb99   : > { %v2055_v52 = vpop.xlane.xlu0 %2054 }
 0xb9a   : > { %7058 = vrcp.f32 %v2055_v52 }
 0xb9d   : > { %v2111_v53 = vpop.permute.xlu0 %2110 }
 0xb9e   : > { %v2116_v54 = vsel %vm1258_vm5, %v2111_v53, 0 }
 0xb9f   : > { %6706 = vmatpush3.bf16.msra.mxu1 %v2116_v54  ;;  %v6107_v54 = vld [vmem:[%s8537_s1] ss:$0 sm:$0xff] }
 0xba0   : > { %6717 = vmatprep.subr.bf16.mxu1 %v7210_v3 }
 0xba4   : > { %v7059_v55 = vpop.eup %7058 }
 0xba5   : > { %v2059_v56 = vmul.f32 %v7059_v55, %v7057_v13 }
 0xba7   : > { %v2061_v22 = vpack.c.bf16 %v2059_v56, %v2059_v56 }
 0xba9   : > { %6708 = vmatmul.mubr.msk.bf16.vlgmr.msra.gmra.mrb[36].mxu1 %vm1133_vm3, %v2061_v22 }
 0xbaa   : > { %6721 = vmatprep.mubr.msk.bf16.mxu1 %vm7211_vm1, %v7210_v3  ;;  %6718 = vmatpush3.bf16.msra.mxu1 %v6898_v39 }
 0xbab   : > { %6719 = vmatprep.subr.bf16.mxu1 %v7210_v3 }
 0xbae   : > { %6720 = vmatpush3.bf16.msra.mxu1 %v6899_v40 }
 0xbaf   : > { %6733 = vmatprep.subr.bf16.mxu1 %v7210_v3 }
 0xbd7   : > { %v2104_v16 = vpop.f32.mrb[36].mxu0 }
 0xbd8   : > { %v6703_v57 = vpop.f32.mrb[37].mxu0 }
 0xbd9   : > { %v2107_v58 = vpop.f32.mrb[38].mxu0 }
 0xbda   : > { %v6704_v59 = vpop.f32.mrb[39].mxu0 }
 0xc7c   : > { %v2152_v60 = vpop.f32.mrb[36].mxu1 }
 0xc7d   : > { %v2158_v61 = vpack.c.bf16 %v2152_v60, %v2104_v16  ;;  %v6709_v62 = vpop.f32.mrb[37].mxu1 }
 0xc7e   : > { %v2155_v63 = vpop.f32.mrb[38].mxu1 }
 0xc7f   : > { %v6710_v0 = vpop.f32.mrb[39].mxu1  ;;  %6714 = vmatmul.mubr.msk.bf16.vlgmr.msra.gmra.mrb[40].mxu0 %vm1133_vm3, %v2158_v61 }
 0xc80   : > { %6729 = vmatprep.mubr.msk.bf16.mxu0 %vm7211_vm1, %v7210_v3  ;;  %6726 = vmatpush3.bf16.msra.mxu0 %v6896_v34 }
 0xc81   : > { %6727 = vmatprep.subr.bf16.mxu0 %v7210_v3 }
 0xd52   : > { %v2199_v2 = vpop.f32.mrb[40].mxu0 }
 0xd53   : > { %v2206_v4 = vadd.f32 %v2199_v2, %v1936_v31  ;;  %v6715_v5 = vpop.f32.mrb[41].mxu0 }
 0xd54   : > { %v2202_v6 = vpop.f32.mrb[42].mxu0 }
 0xd55   : > { %v2214_v7 = vadd.f32 %v6100_v1, %v2206_v4  ;;  %v2207_v8 = vadd.f32 %v2202_v6, %v1937_v35  ;;  %v6716_v9 = vpop.f32.mrb[43].mxu0  ;;  %v6897_v35 = vld [vmem:[%s7399_s5 + $0x8] sm:$0xff]   ;;  %s8539_s5 = scalar_lea.vmem %s8538_s3, %s7366_s27  ;;  %s8544_s3 = sld [smem:[#allocation7_spill]] }
 0xd56   : > { %6728 = vmatpush3.bf16.msra.mxu0 %v6897_v35  ;;  %v6103_v63 = vld [vmem:[%s8539_s5] ss:$0 sm:$0xff] }
 0xd57   : > { %v2215_v10 = vadd.f32 %v6100_v1, %v2207_v8  ;;  %v2216_v12 = vadd.f32 %v7168_v11, %v2214_v7  ;;  %6739 = vmatprep.subr.bf16.mxu0 %v7210_v3 }
 0xd59   : > { %v2220_v14 = vsel %vm1074_vm2, %v2216_v12, 0.0  ;;  %v2217_v17 = vadd.f32 %v7169_v15, %v2215_v10  ;;  %6730 = vmatmul.mubr.msk.bf16.vlgmr.msra.gmra.mrb[44].mxu0 %vm1074_vm2, %v1049_v24 }
 0xd5a   : > { %2221 = vadd.xlane.f32.xlu1 %v2220_v14  ;;  %6741 = vmatprep.mubr.msk.bf16.mxu0 %vm7211_vm1, %v7210_v3 }
 0xd5b   : > { %v2223_v18 = vsel %vm1074_vm2, %v2217_v17, 0.0  ;;  %p6305_p5 = scmp.ne.s32.totalorder %s8544_s3, 1 }
 0xd5c   : > { %2224 = vadd.xlane.f32.xlu0 %v2223_v18  ;;  %vm7225_vm6 = vmmov (!%p6305_p5), 0  }
 0xde7   : > { %v2222_v19 = vpop.xlane.xlu1 %2221 }
 0xde8   : > { %v2227_v20 = vmul.f32 0.03125, %v2222_v19 }
 0xde9   : > { %v2225_v21 = vpop.xlane.xlu0 %2224 }
 0xdea   : > { %v2229_v23 = vsub.f32 %v2216_v12, %v2227_v20  ;;  %v2228_v25 = vmul.f32 0.03125, %v2225_v21 }
 0xdec   : > { %v2230_v27 = vsub.f32 %v2217_v17, %v2228_v25  ;;  %v2231_v29 = vmul.f32 %v2229_v23, %v2229_v23 }
 0xdee   : > { %v2233_v30 = vsel %vm1074_vm2, %v2231_v29, 0.0  ;;  %v2232_v31 = vmul.f32 %v2230_v27, %v2230_v27 }
 0xdef   : > { %2234 = vadd.xlane.f32.xlu1 %v2233_v30 }
 0xdf0   : > { %v2236_v32 = vsel %vm1074_vm2, %v2232_v31, 0.0 }
 0xdf1   : > { %2237 = vadd.xlane.f32.xlu0 %v2236_v32 }
 0xe2c   : > { %v2393_v55 = vpop.f32.mrb[44].mxu0 }
 0xe2d   : > { %v2394_v56 = vadd.f32 %v6107_v54, %v2393_v55  ;;  %v6731_v22 = vpop.f32.mrb[45].mxu0 }
 0xe2e   : > { %v2396_v16 = vpop.f32.mrb[46].mxu0 }
 0xe2f   : > { %v2397_v57 = vadd.f32 %v6107_v54, %v2396_v16  ;;  %v6732_v58 = vpop.f32.mrb[47].mxu0  ;;  %v7731_v59 = vpack.c.bf16 %v2394_v56, %v2394_v56 }
 0xe31   : > { %v7733_v60 = vpack.c.bf16 %v2397_v57, %v2397_v57  ;;  %v2413_v61 = vsel %vm1133_vm3, %v7731_v59, 0 }
 0xe33   : > { %v2459_v62 = vsel %vm1133_vm3, %v7733_v60, 0 }
 0xe34   : > { %6740 = vmatpush3.bf16.xpose.msra.mxu0 %v2459_v62 }
 0xe35   : > { %6751 = vmatprep.subr.bf16.mxu0 %v7210_v3 }
 0xe7c   : > { %v2235_v41 = vpop.xlane.xlu1 %2234 }
 0xe7d   : > { %v2239_v42 = vmul.f32 0.03125, %v2235_v41 }
 0xe7e   : > { %v2238_v43 = vpop.xlane.xlu0 %2237 }
 0xe7f   : > { %v2241_v33 = vadd.f32 1e-05, %v2239_v42  ;;  %v2240_v44 = vmul.f32 0.03125, %v2238_v43 }
 0xe81   : > { %7060 = vrsqrt.f32 %v2241_v33  ;;  %v2242_v45 = vadd.f32 1e-05, %v2240_v44 }
 0xe83   : > { %7062 = vrsqrt.f32 %v2242_v45 }
 0xe8b   : > { %v7061_v36 = vpop.eup %7060 }
 0xe8c   : > { %v2245_v47 = vmul.f32 %v7061_v36, %v2229_v23 }
 0xe8d   : > { %v7063_v28 = vpop.eup %7062 }
 0xe8e   : > { %v2253_v48 = vmul.f32 %v6101_v46, %v2245_v47  ;;  %v2246_v13 = vmul.f32 %v7063_v28, %v2230_v27 }
 0xe90   : > { %v2254_v50 = vmul.f32 %v6101_v46, %v2246_v13  ;;  %v7717_v51 = vadd.f32 %v6102_v49, %v2253_v48 }
 0xe92   : > { %v7719_v52 = vadd.f32 %v6102_v49, %v2254_v50 }
 0xe94   : > { %v2263_v53 = vpack.c.bf16 %v7719_v52, %v7717_v51 }
 0xe96   : > { %6722 = vmatmul.mubr.msk.bf16.vlgmr.msra.gmra.mrb[40].mxu1 %vm1074_vm2, %v2263_v53 }
 0xe97   : > { %6735 = vmatprep.mubr.msk.bf16.mxu1 %vm7211_vm1, %v7210_v3  ;;  %6734 = vmatpush3.bf16.xpose.msra.mxu1 %v2413_v61 }
 0xe98   : > { %6745 = vmatprep.subr.bf16.mxu1 %v7210_v3 }
 0xf69   : > { %v2324_v0 = vpop.f32.mrb[40].mxu1 }
 0xf6a   : > { %v2325_v1 = vadd.f32 %v6103_v63, %v2324_v0  ;;  %v6723_v2 = vpop.f32.mrb[41].mxu1 }
 0xf6b   : > { %v2327_v4 = vpop.f32.mrb[42].mxu1 }
 0xf6c   : > { %v2331_v5 = vmul.f32 0.35355338, %v2325_v1  ;;  %v2328_v6 = vadd.f32 %v6103_v63, %v2327_v4  ;;  %v6724_v7 = vpop.f32.mrb[43].mxu1 }
 0xf6e   : > { %v7746_v8 = vpack.c.bf16 %v2331_v5, %v2331_v5  ;;  %v2332_v9 = vmul.f32 0.35355338, %v2328_v6 }
 0xf70   : > { %v7748_v10 = vpack.c.bf16 %v2332_v9, %v2332_v9  ;;  %6736 = vmatmul.mubr.msk.bf16.vlgmr.msra.gmra.mrb[44].mxu1 %vm1133_vm3, %v7746_v8 }
 0xf71   : > { %6747 = vmatprep.mubr.msk.bf16.mxu1 %vm7211_vm1, %v7210_v3 }
 0xf72   : > { %6742 = vmatmul.mubr.msk.bf16.vlgmr.msra.gmra.mrb[48].mxu0 %vm1133_vm3, %v7748_v10 }
 0xf73   : > { %6753 = vmatprep.mubr.msk.bf16.mxu0 %vm7211_vm1, %v7210_v3 }
0x1043   : > { %v2449_v11 = vpop.f32.mrb[44].mxu1 }
0x1044   : > { %v6737_v12 = vpop.f32.mrb[45].mxu1  ;;  %v2501_v14 = vsel %vm1133_vm3, %v2449_v11, -inf }
0x1045   : > { %2502 = vmax.xlane.f32.xlu1 %v2501_v14  ;;  %v2452_v15 = vpop.f32.mrb[46].mxu1  ;;  %v2495_v17 = vpop.f32.mrb[48].mxu0 }
0x1046   : > { %v6738_v18 = vpop.f32.mrb[47].mxu1  ;;  %v6743_v19 = vpop.f32.mrb[49].mxu0  ;;  %v2504_v20 = vsel %vm1133_vm3, %v2495_v17, -inf }
0x1047   : > { %2505 = vmax.xlane.f32.xlu0 %v2504_v20  ;;  %v2498_v21 = vpop.f32.mrb[50].mxu0 }
0x1048   : > { %v6744_v23 = vpop.f32.mrb[51].mxu0 }
0x1056   : > { %2526 = vrot.lane.b32.xlu1 %v7731_v59, %s7212_s0 }
0x10d2   : > { %v2503_v25 = vpop.xlane.xlu1 %2502 }
0x10d3   : > { %v2507_v27 = vsub.f32 %v2449_v11, %v2503_v25 }
0x10d4   : > { %v2506_v29 = vpop.xlane.xlu0 %2505 }
0x10d5   : > { %v2509_v30 = vmul.f32 1.442695, %v2507_v27  ;;  %v2508_v31 = vsub.f32 %v2495_v17, %v2506_v29 }
0x10d6   : > { %v2527_v32 = vpop.permute.xlu1 %2526 }
0x10d7   : > { %7064 = vpow2.f32 %v2509_v30  ;;  %v2511_v34 = vmul.f32 1.442695, %v2508_v31  ;;  %v2532_v35 = vsel %vm1258_vm5, %v2527_v32, 0 }
0x10d8   : > { %6746 = vmatpush3.bf16.msra.mxu1 %v2532_v35 }
0x10d9   : > { %7066 = vpow2.f32 %v2511_v34  ;;  %6757 = vmatprep.subr.bf16.mxu1 %v7210_v3 }
0x10e1   : > { %v7065_v37 = vpop.eup %7064 }
0x10e2   : > { %v2513_v38 = vsel %vm1133_vm3, %v7065_v37, 0.0 }
0x10e3   : > { %v7067_v24 = vpop.eup %7066  ;;  %2514 = vadd.xlane.f32.xlu1 %v2513_v38 }
0x10e4   : > { %v2516_v39 = vsel %vm1133_vm3, %v7067_v24, 0.0 }
0x10e5   : > { %2517 = vadd.xlane.f32.xlu0 %v2516_v39 }
0x10f4   : > { %2627 = vrot.lane.b32.xlu1 %v7731_v59, %s7215_s24 }
0x10f8   : > { %2678 = vrot.lane.b32.xlu1 %v7733_v60, %s7215_s24 }
0x10fb   : > { %2575 = vrot.lane.b32.xlu0 %v7733_v60, %s7212_s0  ;;  %s8540_s0 = sld [smem:[#allocation10_spill]] }
0x10fc   : > { %2676 = vrot.lane.b32.xlu1 %v7748_v10, %s7215_s24 }
0x10ff   : > { %2625 = vrot.lane.b32.xlu0 %v7746_v8, %s7215_s24 }
0x1170   : > { %v2515_v40 = vpop.xlane.xlu1 %2514 }
0x1171   : > { %7068 = vrcp.f32 %v2515_v40 }
0x1172   : > { %v2518_v41 = vpop.xlane.xlu0 %2517 }
0x1173   : > { %7070 = vrcp.f32 %v2518_v41  ;;  %v2400_v41 = vld [vmem:[%s8540_s0] sm:$0xf] }
0x1174   : > { %v2628_v33 = vpop.permute.xlu1 %2627 }
0x1175   : > { %v2633_v48 = vsel %vm1133_vm3, %v2628_v33, 0  ;;  %v2898_v33 = vsel %vm1258_vm5, %v2400_v41, 0 }
0x1176   : > { %v2576_v42 = vpop.permute.xlu0 %2575 }
0x1177   : > { %v2581_v43 = vsel %vm1258_vm5, %v2576_v42, 0 }
0x1178   : > { %6752 = vmatpush3.bf16.msra.mxu0 %v2581_v43  ;;  %v2679_v28 = vpop.permute.xlu1 %2678 }
0x1179   : > { %6763 = vmatprep.subr.bf16.mxu0 %v7210_v3  ;;  %v2684_v49 = vsel %vm1133_vm3, %v2679_v28, 0 }
0x117a   : > { %v2626_v50 = vpop.permute.xlu0 %2625 }
0x117b   : > { %v7069_v44 = vpop.eup %7068 }
0x117c   : > { %v2521_v45 = vmul.f32 %v7069_v44, %v7065_v37  ;;  %v2677_v53 = vpop.permute.xlu1 %2676  ;;  %v2401_v37 = vld [vmem:[%s8540_s0 + $0x4] sm:$0xf] }
0x117d   : > { %v7071_v36 = vpop.eup %7070  ;;  %v2851_v39 = vsel %vm1258_vm5, %v2401_v37, 0 }
0x117e   : > { %v2522_v46 = vmul.f32 %v7071_v36, %v7067_v24  ;;  %v2523_v47 = vpack.c.bf16 %v2521_v45, %v2521_v45 }
0x1180   : > { %6748 = vmatmul.mubr.msk.bf16.vlgmr.msra.gmra.mrb[48].mxu1 %vm1133_vm3, %v2523_v47  ;;  %v2524_v13 = vpack.c.bf16 %v2522_v46, %v2522_v46 }
0x1181   : > { %6758 = vmatpush3.bf16.xpose.msra.mxu1 %v2633_v48  ;;  %6759 = vmatprep.mubr.msk.bf16.mxu1 %vm7211_vm1, %v7210_v3 }
0x1182   : > { %6754 = vmatmul.mubr.msk.bf16.vlgmr.msra.gmra.mrb[52].mxu0 %vm1133_vm3, %v2524_v13  ;;  %6769 = vmatprep.subr.bf16.mxu1 %v7210_v3 }
0x1183   : > { %6764 = vmatpush3.bf16.xpose.msra.mxu0 %v2684_v49  ;;  %6765 = vmatprep.mubr.msk.bf16.mxu0 %vm7211_vm1, %v7210_v3 }
0x1184   : > { %6775 = vmatprep.subr.bf16.mxu0 %v7210_v3 }
0x1188   : > { %6760 = vmatmul.mubr.msk.bf16.vlgmr.msra.gmra.mrb[52].mxu1 %vm1133_vm3, %v2626_v50 }
0x1189   : > { %6771 = vmatprep.mubr.msk.bf16.mxu1 %vm7211_vm1, %v7210_v3 }
0x118a   : > { %6766 = vmatmul.mubr.msk.bf16.vlgmr.msra.gmra.mrb[56].mxu0 %vm1133_vm3, %v2677_v53 }
0x118b   : > { %6777 = vmatprep.mubr.msk.bf16.mxu0 %vm7211_vm1, %v7210_v3 }
0x1253   : > { %v7794_v54 = vpop.f32.mrb[48].mxu1 }
0x1254   : > { %v6749_v55 = vpop.f32.mrb[49].mxu1 }
0x1255   : > { %v2571_v56 = vpop.f32.mrb[50].mxu1  ;;  %v7796_v22 = vpop.f32.mrb[52].mxu0 }
0x1256   : > { %v2623_v16 = vpack.c.bf16 %v7796_v22, %v7794_v54  ;;  %v6750_v57 = vpop.f32.mrb[51].mxu1  ;;  %v6755_v58 = vpop.f32.mrb[53].mxu0 }
0x1257   : > { %v2620_v61 = vpop.f32.mrb[54].mxu0 }
0x1258   : > { %v6756_v62 = vpop.f32.mrb[55].mxu0 }
0x125b   : > { %v2669_v63 = vpop.f32.mrb[52].mxu1 }
0x125c   : > { %v6761_v0 = vpop.f32.mrb[53].mxu1  ;;  %v2726_v1 = vsel %vm1133_vm3, %v2669_v63, -inf }
0x125d   : > { %2727 = vmax.xlane.f32.xlu0 %v2726_v1  ;;  %v2672_v2 = vpop.f32.mrb[54].mxu1  ;;  %v2720_v4 = vpop.f32.mrb[56].mxu0 }
0x125e   : > { %v6762_v5 = vpop.f32.mrb[55].mxu1  ;;  %v6767_v6 = vpop.f32.mrb[57].mxu0  ;;  %v2729_v7 = vsel %vm1133_vm3, %v2720_v4, -inf }
0x125f   : > { %2730 = vmax.xlane.f32.xlu1 %v2729_v7  ;;  %v2723_v9 = vpop.f32.mrb[58].mxu0 }
0x1260   : > { %v6768_v11 = vpop.f32.mrb[59].mxu0 }
0x1270   : > { %2750 = vrot.lane.b32.xlu1 %v7731_v59, %s7214_s10 }
0x1274   : > { %2943 = vrot.lane.b32.xlu1 %v7731_v59, %s7217_s30 }
0x1278   : > { %2993 = vrot.lane.b32.xlu1 %v7733_v60, %s7217_s30 }
0x127c   : > { %2991 = vrot.lane.b32.xlu1 %v7748_v10, %s7217_s30 }
0x12ea   : > { %v2728_v12 = vpop.xlane.xlu0 %2727 }
0x12eb   : > { %v2732_v14 = vsub.f32 %v2669_v63, %v2728_v12 }
0x12ec   : > { %v2731_v15 = vpop.xlane.xlu1 %2730 }
0x12ed   : > { %v2734_v17 = vmul.f32 1.442695, %v2732_v14  ;;  %v2733_v18 = vsub.f32 %v2720_v4, %v2731_v15 }
0x12ef   : > { %7072 = vpow2.f32 %v2734_v17  ;;  %v2736_v19 = vmul.f32 1.442695, %v2733_v18 }
0x12f0   : > { %v2751_v20 = vpop.permute.xlu1 %2750 }
0x12f1   : > { %7074 = vpow2.f32 %v2736_v19  ;;  %v2756_v21 = vsel %vm1258_vm5, %v2751_v20, 0 }
0x12f2   : > { %6770 = vmatpush3.bf16.msra.mxu1 %v2756_v21 }
0x12f3   : > { %6781 = vmatprep.subr.bf16.mxu1 %v7210_v3 }
0x12f4   : > { %v2944_v44 = vpop.permute.xlu1 %2943 }
0x12f5   : > { %v2949_v55 = vsel %vm1133_vm3, %v2944_v44, 0 }
0x12f8   : > { %v2994_v45 = vpop.permute.xlu1 %2993 }
0x12f9   : > { %v7073_v23 = vpop.eup %7072  ;;  %v2999_v36 = vsel %vm1133_vm3, %v2994_v45, 0 }
0x12fa   : > { %v2738_v25 = vsel %vm1133_vm3, %v7073_v23, 0.0 }
0x12fb   : > { %v7075_v27 = vpop.eup %7074  ;;  %2739 = vadd.xlane.f32.xlu0 %v2738_v25 }
0x12fc   : > { %v2741_v29 = vsel %vm1133_vm3, %v7075_v27, 0.0  ;;  %v2992_v46 = vpop.permute.xlu1 %2991 }
0x12ff   : > { %2742 = vadd.xlane.f32.xlu0 %v2741_v29 }
0x1315   : > { %2798 = vrot.lane.b32.xlu0 %v7733_v60, %s7214_s10 }
0x1319   : > { %2941 = vrot.lane.b32.xlu0 %v7746_v8, %s7217_s30  ;;  %s8541_s30 = scalar_lea.vmem %s8468_s11, %s7366_s27 }
0x1388   : > { %v2740_v30 = vpop.xlane.xlu0 %2739 }
0x1389   : > { %7076 = vrcp.f32 %v2740_v30 }
0x138c   : > { %v2743_v31 = vpop.xlane.xlu0 %2742 }
0x138d   : > { %7078 = vrcp.f32 %v2743_v31 }
0x1390   : > { %v2799_v32 = vpop.permute.xlu0 %2798 }
0x1391   : > { %v2804_v34 = vsel %vm1258_vm5, %v2799_v32, 0 }
0x1392   : > { %6776 = vmatpush3.bf16.msra.mxu0 %v2804_v34 }
0x1393   : > { %v7077_v35 = vpop.eup %7076  ;;  %6787 = vmatprep.subr.bf16.mxu0 %v7210_v3 }
0x1394   : > { %v2746_v38 = vmul.f32 %v7077_v35, %v7073_v23  ;;  %v2942_v57 = vpop.permute.xlu0 %2941 }
0x1396   : > { %v2748_v24 = vpack.c.bf16 %v2746_v38, %v2746_v38 }
0x1397   : > { %v7079_v40 = vpop.eup %7078 }
0x1398   : > { %v2747_v42 = vmul.f32 %v7079_v40, %v7075_v27  ;;  %6772 = vmatmul.mubr.msk.bf16.vlgmr.msra.gmra.mrb[56].mxu1 %vm1133_vm3, %v2748_v24 }
0x1399   : > { %6782 = vmatpush3.bf16.msra.mxu1 %v2851_v39  ;;  %6783 = vmatprep.mubr.msk.bf16.mxu1 %vm7211_vm1, %v7210_v3 }
0x139a   : > { %v2749_v43 = vpack.c.bf16 %v2747_v42, %v2747_v42  ;;  %6793 = vmatprep.subr.bf16.mxu1 %v7210_v3 }
0x139c   : > { %6778 = vmatmul.mubr.msk.bf16.vlgmr.msra.gmra.mrb[60].mxu0 %vm1133_vm3, %v2749_v43 }
0x139d   : > { %6788 = vmatpush3.bf16.msra.mxu0 %v2898_v33  ;;  %6789 = vmatprep.mubr.msk.bf16.mxu0 %vm7211_vm1, %v7210_v3 }
0x139e   : > { %6799 = vmatprep.subr.bf16.mxu0 %v7210_v3 }
0x13a4   : > { %6790 = vmatmul.mubr.msk.bf16.vlgmr.msra.gmra.mrb[64].mxu0 %vm1133_vm3, %v2623_v16 }
0x13a5   : > { %6801 = vmatprep.mubr.msk.bf16.mxu0 %vm7211_vm1, %v7210_v3 }
0x13a6   : > { %6800 = vmatpush3.bf16.xpose.msra.mxu0 %v2999_v36  ;;  %v2402_v36 = vld [vmem:[%s8540_s0 + $0x8] sm:$0xf] }
0x13a7   : > { %6811 = vmatprep.subr.bf16.mxu0 %v7210_v3 }
0x13ad   : > { %6802 = vmatmul.mubr.msk.bf16.vlgmr.msra.gmra.mrb[68].mxu0 %vm1133_vm3, %v2992_v46  ;;  %v3166_v46 = vsel %vm1258_vm5, %v2402_v36, 0 }
0x13ae   : > { %6813 = vmatprep.mubr.msk.bf16.mxu0 %vm7211_vm1, %v7210_v3 }
0x146b   : > { %v2792_v47 = vpop.f32.mrb[56].mxu1 }
0x146c   : > { %v6773_v28 = vpop.f32.mrb[57].mxu1 }
0x146d   : > { %v2795_v48 = vpop.f32.mrb[58].mxu1 }
0x146e   : > { %v6774_v13 = vpop.f32.mrb[59].mxu1 }
0x146f   : > { %v2840_v49 = vpop.f32.mrb[60].mxu0 }
0x1470   : > { %v2846_v50 = vpack.c.bf16 %v2840_v49, %v2792_v47  ;;  %v6779_v53 = vpop.f32.mrb[61].mxu0 }
0x1471   : > { %v2843_v54 = vpop.f32.mrb[62].mxu0 }
0x1472   : > { %v6780_v56 = vpop.f32.mrb[63].mxu0  ;;  %6784 = vmatmul.mubr.msk.bf16.vlgmr.msra.gmra.mrb[60].mxu1 %vm1133_vm3, %v2846_v50 }
0x1473   : > { %6794 = vmatpush3.bf16.xpose.msra.mxu1 %v2949_v55  ;;  %6795 = vmatprep.mubr.msk.bf16.mxu1 %vm7211_vm1, %v7210_v3 }
0x1474   : > { %6805 = vmatprep.subr.bf16.mxu1 %v7210_v3 }
0x1477   : > { %v2934_v22 = vpop.f32.mrb[64].mxu0 }
0x1478   : > { %v6791_v16 = vpop.f32.mrb[65].mxu0 }
0x1479   : > { %v2937_v58 = vpop.f32.mrb[66].mxu0 }
0x147a   : > { %v6792_v61 = vpop.f32.mrb[67].mxu0  ;;  %6796 = vmatmul.mubr.msk.bf16.vlgmr.msra.gmra.mrb[64].mxu1 %vm1133_vm3, %v2942_v57 }
0x147b   : > { %6807 = vmatprep.mubr.msk.bf16.mxu1 %vm7211_vm1, %v7210_v3 }
0x1480   : > { %v3035_v62 = vpop.f32.mrb[68].mxu0 }
0x1481   : > { %v6803_v63 = vpop.f32.mrb[69].mxu0  ;;  %v3044_v0 = vsel %vm1133_vm3, %v3035_v62, -inf }
0x1482   : > { %3045 = vmax.xlane.f32.xlu1 %v3044_v0  ;;  %v3038_v1 = vpop.f32.mrb[70].mxu0 }
0x1483   : > { %v6804_v2 = vpop.f32.mrb[71].mxu0 }
0x1493   : > { %3065 = vrot.lane.b32.xlu1 %v7731_v59, %s7218_s28 }
0x1497   : > { %3213 = vrot.lane.b32.xlu1 %v7731_v59, %s7221_s14 }
0x149b   : > { %3263 = vrot.lane.b32.xlu1 %v7733_v60, %s7221_s14 }
0x149f   : > { %3261 = vrot.lane.b32.xlu1 %v7748_v10, %s7221_s14 }
0x150f   : > { %v3046_v4 = vpop.xlane.xlu1 %3045 }
0x1510   : > { %v3048_v7 = vsub.f32 %v3035_v62, %v3046_v4 }
0x1512   : > { %v3051_v9 = vmul.f32 1.442695, %v3048_v7 }
0x1513   : > { %v3066_v5 = vpop.permute.xlu1 %3065 }
0x1514   : > { %v3071_v6 = vsel %vm1258_vm5, %v3066_v5, 0  ;;  %7080 = vpow2.f32 %v3051_v9 }
0x1515   : > { %6806 = vmatpush3.bf16.msra.mxu1 %v3071_v6 }
0x1516   : > { %6817 = vmatprep.subr.bf16.mxu1 %v7210_v3 }
0x1517   : > { %v3214_v42 = vpop.permute.xlu1 %3213 }
0x1518   : > { %v3219_v33 = vsel %vm1133_vm3, %v3214_v42, 0 }
0x151b   : > { %v3264_v49 = vpop.permute.xlu1 %3263 }
0x151c   : > { %v3269_v56 = vsel %vm1133_vm3, %v3264_v49, 0 }
0x151e   : > { %v7081_v21 = vpop.eup %7080 }
0x151f   : > { %v3056_v27 = vsel %vm1133_vm3, %v7081_v21, 0.0  ;;  %v3262_v63 = vpop.permute.xlu1 %3261 }
0x1545   : > { %v2887_v11 = vpop.f32.mrb[60].mxu1 }
0x1546   : > { %v7862_v12 = vadd.f32 %v2934_v22, %v2887_v11  ;;  %v6785_v14 = vpop.f32.mrb[61].mxu1 }
0x1547   : > { %v2890_v15 = vpop.f32.mrb[62].mxu1 }
0x1548   : > { %v7864_v17 = vadd.f32 %v2937_v58, %v2890_v15  ;;  %v6786_v18 = vpop.f32.mrb[63].mxu1 }
0x154d   : > { %v2985_v19 = vpop.f32.mrb[64].mxu1 }
0x154e   : > { %v6797_v10 = vpop.f32.mrb[65].mxu1  ;;  %v3041_v20 = vsel %vm1133_vm3, %v2985_v19, -inf }
0x154f   : > { %3042 = vmax.xlane.f32.xlu0 %v3041_v20  ;;  %v2988_v23 = vpop.f32.mrb[66].mxu1 }
0x1550   : > { %v6798_v25 = vpop.f32.mrb[67].mxu1 }
0x1553   : > { %3057 = vadd.xlane.f32.xlu0 %v3056_v27 }
0x15dc   : > { %v3043_v29 = vpop.xlane.xlu0 %3042 }
0x15dd   : > { %v3047_v30 = vsub.f32 %v2985_v19, %v3043_v29 }
0x15df   : > { %v3049_v31 = vmul.f32 1.442695, %v3047_v30 }
0x15e0   : > { %v3058_v35 = vpop.xlane.xlu0 %3057 }
0x15e1   : > { %7082 = vpow2.f32 %v3049_v31 }
0x15e2   : > { %7084 = vrcp.f32 %v3058_v35  ;;  %v2403_v35 = vld [vmem:[%s8540_s0 + $0xc] sm:$0xf]  ;;  %s8545_s0 = sld [smem:[#allocation25_spill]] (!%p6305_p5) }
0x15eb   : > { %v7083_v32 = vpop.eup %7082 }
0x15ec   : > { %v3053_v34 = vsel %vm1133_vm3, %v7083_v32, 0.0  ;;  %v7085_v37 = vpop.eup %7084 }
0x15ed   : > { %3054 = vadd.xlane.f32.xlu0 %v3053_v34  ;;  %v3062_v24 = vmul.f32 %v7085_v37, %v7081_v21  ;;  %v3436_v37 = vsel %vm1258_vm5, %v2403_v35, 0 }
0x15ef   : > { %v3064_v41 = vpack.c.bf16 %v3062_v24, %v3062_v24 }
0x1603   : > { %3113 = vrot.lane.b32.xlu0 %v7733_v60, %s7218_s28 }
0x1607   : > { %3211 = vrot.lane.b32.xlu0 %v7746_v8, %s7221_s14 }
0x167a   : > { %v3055_v38 = vpop.xlane.xlu0 %3054 }
0x167b   : > { %7086 = vrcp.f32 %v3055_v38 }
0x167e   : > { %v3114_v39 = vpop.permute.xlu0 %3113 }
0x167f   : > { %v3119_v40 = vsel %vm1258_vm5, %v3114_v39, 0 }
0x1680   : > { %6812 = vmatpush3.bf16.msra.mxu0 %v3119_v40 }
0x1681   : > { %6823 = vmatprep.subr.bf16.mxu0 %v7210_v3 }
0x1682   : > { %v3212_v45 = vpop.permute.xlu0 %3211 }
0x1683   : > { %6814 = vmatmul.mubr.msk.bf16.vlgmr.msra.gmra.mrb[72].mxu0 %vm1133_vm3, %v3064_v41 }
0x1684   : > { %6825 = vmatprep.mubr.msk.bf16.mxu0 %vm7211_vm1, %v7210_v3 }
0x1685   : > { %v7087_v8 = vpop.eup %7086 }
0x1686   : > { %v3061_v43 = vmul.f32 %v7087_v8, %v7083_v32 }
0x1688   : > { %v3063_v44 = vpack.c.bf16 %v3061_v43, %v3061_v43 }
0x1689   : > { %6824 = vmatpush3.bf16.xpose.msra.mxu0 %v3219_v33 }
0x168a   : > { %6808 = vmatmul.mubr.msk.bf16.vlgmr.msra.gmra.mrb[68].mxu1 %vm1133_vm3, %v3063_v44  ;;  %6835 = vmatprep.subr.bf16.mxu0 %v7210_v3 }
0x168b   : > { %6819 = vmatprep.mubr.msk.bf16.mxu1 %vm7211_vm1, %v7210_v3  ;;  %6818 = vmatpush3.bf16.msra.mxu1 %v3166_v46 }
0x168c   : > { %6829 = vmatprep.subr.bf16.mxu1 %v7210_v3 }
0x1690   : > { %6826 = vmatmul.mubr.msk.bf16.vlgmr.msra.gmra.mrb[76].mxu0 %vm1133_vm3, %v3212_v45 }
0x1691   : > { %6837 = vmatprep.mubr.msk.bf16.mxu0 %vm7211_vm1, %v7210_v3 }
0x1756   : > { %v3155_v47 = vpop.f32.mrb[72].mxu0 }
0x1757   : > { %v6815_v28 = vpop.f32.mrb[73].mxu0 }
0x1758   : > { %v3158_v48 = vpop.f32.mrb[74].mxu0 }
0x1759   : > { %v6816_v13 = vpop.f32.mrb[75].mxu0 }
0x175d   : > { %v3107_v50 = vpop.f32.mrb[68].mxu1 }
0x175e   : > { %v3161_v53 = vpack.c.bf16 %v3155_v47, %v3107_v50  ;;  %v6809_v54 = vpop.f32.mrb[69].mxu1  ;;  %v6131_v47 = vld [vmem:[%s8541_s30] ss:$0 sm:$0xff]  ;;  %s8546_s30 = sld [smem:[#allocation26_spill]] (!%p6305_p5) }
0x175f   : > { %v3110_v55 = vpop.f32.mrb[70].mxu1 }
0x1760   : > { %v6810_v22 = vpop.f32.mrb[71].mxu1  ;;  %6820 = vmatmul.mubr.msk.bf16.vlgmr.msra.gmra.mrb[72].mxu1 %vm1133_vm3, %v3161_v53 }
0x1761   : > { %6830 = vmatpush3.bf16.xpose.msra.mxu1 %v3269_v56  ;;  %6831 = vmatprep.mubr.msk.bf16.mxu1 %vm7211_vm1, %v7210_v3 }
0x1762   : > { %6841 = vmatprep.subr.bf16.mxu1 %v7210_v3 }
0x1763   : > { %v3255_v16 = vpop.f32.mrb[76].mxu0 }
0x1764   : > { %v6827_v57 = vpop.f32.mrb[77].mxu0  ;;  %v3311_v58 = vsel %vm1133_vm3, %v3255_v16, -inf }
0x1765   : > { %3312 = vmax.xlane.f32.xlu0 %v3311_v58  ;;  %v3258_v61 = vpop.f32.mrb[78].mxu0 }
0x1766   : > { %v6828_v62 = vpop.f32.mrb[79].mxu0 }
0x1768   : > { %6832 = vmatmul.mubr.msk.bf16.vlgmr.msra.gmra.mrb[76].mxu1 %vm1133_vm3, %v3262_v63 }
0x1769   : > { %6843 = vmatprep.mubr.msk.bf16.mxu1 %vm7211_vm1, %v7210_v3 }
0x17f2   : > { %v3313_v0 = vpop.xlane.xlu0 %3312 }
0x17f3   : > { %v3317_v1 = vsub.f32 %v3255_v16, %v3313_v0 }
0x17f5   : > { %v3319_v2 = vmul.f32 1.442695, %v3317_v1 }
0x17f7   : > { %7088 = vpow2.f32 %v3319_v2 }
0x1801   : > { %v7089_v4 = vpop.eup %7088 }
0x1802   : > { %v3323_v5 = vsel %vm1133_vm3, %v7089_v4, 0.0 }
0x1803   : > { %3324 = vadd.xlane.f32.xlu0 %v3323_v5  ;;  %v3536_v5 = vld [vmem:[%s7418_s8] sm:$0xff] }
0x1833   : > { %v3202_v6 = vpop.f32.mrb[72].mxu1 }
0x1834   : > { %v3209_v7 = vadd.f32 %v3202_v6, %v7862_v12  ;;  %v6821_v9 = vpop.f32.mrb[73].mxu1  ;;  %v3544_v6 = vld [vmem:[%s7418_s8 + $0x40] sm:$0xff] }
0x1835   : > { %v3205_v11 = vpop.f32.mrb[74].mxu1  ;;  %v6135_v9 = vcombine.high %v3536_v5, %v3544_v6 }
0x1836   : > { %v3210_v14 = vadd.f32 %v3205_v11, %v7864_v17  ;;  %v6822_v15 = vpop.f32.mrb[75].mxu1  ;;  %v3545_v11 = vld [vmem:[%s7418_s8 + $0x48] sm:$0xff] }
0x183b   : > { %v3305_v18 = vpop.f32.mrb[76].mxu1 }
0x183c   : > { %v6833_v19 = vpop.f32.mrb[77].mxu1  ;;  %v3314_v10 = vsel %vm1133_vm3, %v3305_v18, -inf }
0x183d   : > { %3315 = vmax.xlane.f32.xlu1 %v3314_v10  ;;  %v3308_v20 = vpop.f32.mrb[78].mxu1  ;;  %v3552_v19 = vld [vmem:[%s7418_s8 + $0x80] sm:$0xff] }
0x183e   : > { %v6834_v21 = vpop.f32.mrb[79].mxu1  ;;  %v3560_v10 = vld [vmem:[%s7418_s8 + $0xc0] sm:$0xff]  ;;  %v3553_v20 = vld [vmem:[%s7418_s8 + $0x88] sm:$0xff] }
0x183f   : > { %v6151_v21 = vcombine.high %v3552_v19, %v3560_v10 }
0x184e   : > { %3335 = vrot.lane.b32.xlu1 %v7731_v59, %s7220_s13 }
0x1890   : > { %v3325_v23 = vpop.xlane.xlu0 %3324 }
0x1891   : > { %7090 = vrcp.f32 %v3325_v23  ;;  %v3561_v23 = vld [vmem:[%s7418_s8 + $0xc8] sm:$0xff] }
0x189b   : > { %v7091_v25 = vpop.eup %7090 }
0x189c   : > { %v3331_v29 = vmul.f32 %v7091_v25, %v7089_v4  ;;  %v6150_v25 = vcombine.low %v3552_v19, %v3560_v10  ;;  %v3558_v10 = vld [vmem:[%s7418_s8 + $0xb0] sm:$0xff] }
0x189e   : > { %v3333_v32 = vpack.c.bf16 %v3331_v29, %v3331_v29  ;;  %v3538_v29 = vld [vmem:[%s7418_s8 + $0x10] sm:$0xff] }
0x18ca   : > { %v3316_v27 = vpop.xlane.xlu1 %3315 }
0x18cb   : > { %v3318_v12 = vsub.f32 %v3305_v18, %v3316_v27  ;;  %v6152_v27 = vcombine.low %v3553_v20, %v3561_v23 }
0x18cd   : > { %v3321_v30 = vmul.f32 1.442695, %v3318_v12  ;;  %v6153_v12 = vcombine.high %v3553_v20, %v3561_v23  ;;  %v3566_v20 = vld [vmem:[%s7418_s8 + $0xf0] sm:$0xff]  ;;  %v3567_v23 = vld [vmem:[%s7418_s8 + $0xf8] sm:$0xff] }
0x18ce   : > { %v3336_v17 = vpop.permute.xlu1 %3335 }
0x18cf   : > { %7092 = vpow2.f32 %v3321_v30  ;;  %v3341_v31 = vsel %vm1258_vm5, %v3336_v17, 0  ;;  %v3546_v30 = vld [vmem:[%s7418_s8 + $0x50] sm:$0xff]  ;;  %v3539_v17 = vld [vmem:[%s7418_s8 + $0x18] sm:$0xff] }
0x18d0   : > { %6836 = vmatpush3.bf16.msra.mxu0 %v3341_v31  ;;  %v7223_v31 = vmov 0  }
0x18d1   : > { %6847 = vmatprep.subr.bf16.mxu0 %v7210_v3 }
0x18d3   : > { %6838 = vmatmul.mubr.msk.bf16.vlgmr.msra.gmra.mrb[80].mxu0 %vm1133_vm3, %v3333_v32  ;;  %v6139_v32 = vcombine.high %v3538_v29, %v3546_v30 }
0x18d4   : > { %6849 = vmatprep.mubr.msk.bf16.mxu0 %vm7211_vm1, %v7210_v3  ;;  %6848 = vmatpush3.bf16.msra.mxu0 %v3436_v37 }
0x18d9   : > { %v7093_v59 = vpop.eup %7092 }
0x18da   : > { %v3326_v34 = vsel %vm1133_vm3, %v7093_v59, 0.0 }
0x18db   : > { %3327 = vadd.xlane.f32.xlu0 %v3326_v34  ;;  %v6138_v34 = vcombine.low %v3538_v29, %v3546_v30  ;;  %v6162_v30 = vcombine.low %v3558_v10, %v3566_v20 }
0x18f1   : > { %3383 = vrot.lane.b32.xlu0 %v7733_v60, %s7220_s13 }
0x1968   : > { %v3328_v38 = vpop.xlane.xlu0 %3327 }
0x1969   : > { %7094 = vrcp.f32 %v3328_v38 }
0x196c   : > { %v3384_v24 = vpop.permute.xlu0 %3383 }
0x196d   : > { %v3389_v39 = vsel %vm1258_vm5, %v3384_v24, 0 }
0x196e   : > { %6842 = vmatpush3.bf16.msra.mxu1 %v3389_v39 }
0x196f   : > { %3815 = vmatprep.subr.bf16.mxu1 %v6135_v9  ;;  %v3543_v9 = vld [vmem:[%s7418_s8 + $0x38] sm:$0xff] }
0x1973   : > { %v7095_v40 = vpop.eup %7094 }
0x1974   : > { %v3332_v3 = vmul.f32 %v7095_v40, %v7093_v59  ;;  %v3547_v59 = vld [vmem:[%s7418_s8 + $0x58] sm:$0xff] }
0x1975   : > { %v6140_v35 = vcombine.low %v3539_v17, %v3547_v59  ;;  %v6141_v37 = vcombine.high %v3539_v17, %v3547_v59  ;;  %v6901_v59 = vld [vmem:[%s7433_s29 + $0xc0] sm:$0xff]  }
0x1976   : > { %v3334_v41 = vpack.c.bf16 %v3332_v3, %v3332_v3 }
0x1978   : > { %6844 = vmatmul.mubr.msk.bf16.vlgmr.msra.gmra.mrb[80].mxu1 %vm1133_vm3, %v3334_v41 }
0x1979   : > { %3847 = vmatprep.mubr.bf16.mxu1 %v7223_v31 }
0x19a6   : > { %v3377_v8 = vpop.f32.mrb[80].mxu0 }
0x19a7   : > { %v6839_v42 = vpop.f32.mrb[81].mxu0 }
0x19a8   : > { %v3380_v43 = vpop.f32.mrb[82].mxu0  ;;  %v6132_v42 = vld [vmem:[%s1019_s12] ss:$0 sm:$0xff] }
0x19a9   : > { %v6840_v60 = vpop.f32.mrb[83].mxu0 }
0x1a4b   : > { %v3425_v33 = vpop.f32.mrb[80].mxu1 }
0x1a4c   : > { %v3431_v44 = vpack.c.bf16 %v3425_v33, %v3377_v8  ;;  %v6845_v45 = vpop.f32.mrb[81].mxu1 }
0x1a4d   : > { %v3428_v36 = vpop.f32.mrb[82].mxu1  ;;  %v6133_v45 = vld [vmem:[%s1022_s26] ss:$0 sm:$0xff] }
0x1a4e   : > { %v6846_v46 = vpop.f32.mrb[83].mxu1  ;;  %6850 = vmatmul.mubr.msk.bf16.vlgmr.msra.gmra.mrb[84].mxu0 %vm1133_vm3, %v3431_v44 }
0x1a4f   : > { %3890 = vmatprep.mubr.bf16.mxu0 %v7223_v31  ;;  %v3554_v46 = vld [vmem:[%s7418_s8 + $0x90] sm:$0xff] }
0x1b21   : > { %v3472_v28 = vpop.f32.mrb[84].mxu0 }
0x1b22   : > { %v3479_v48 = vadd.f32 %v3472_v28, %v3209_v7  ;;  %v6851_v13 = vpop.f32.mrb[85].mxu0  ;;  %v3537_v7 = vld [vmem:[%s7418_s8 + $0x8] sm:$0xff]  ;;  %v3555_v28 = vld [vmem:[%s7418_s8 + $0x98] sm:$0xff] }
0x1b23   : > { %v3475_v49 = vpop.f32.mrb[86].mxu0  ;;  %v6136_v15 = vcombine.low %v3537_v7, %v3545_v11  ;;  %v6137_v18 = vcombine.high %v3537_v7, %v3545_v11  ;;  %v3550_v7 = vld [vmem:[%s7418_s8 + $0x70] sm:$0xff]  ;;  %v3551_v11 = vld [vmem:[%s7418_s8 + $0x78] sm:$0xff] }
0x1b24   : > { %v3487_v50 = vadd.f32 %v6131_v47, %v3479_v48  ;;  %v3480_v53 = vadd.f32 %v3475_v49, %v3210_v14  ;;  %v6852_v54 = vpop.f32.mrb[87].mxu0  ;;  %v6134_v14 = vcombine.low %v3536_v5, %v3544_v6  ;;  %v3563_v48 = vld [vmem:[%s7418_s8 + $0xd8] sm:$0xff]  ;;  %v3542_v6 = vld [vmem:[%s7418_s8 + $0x30] sm:$0xff]  ;;  %v6149_v19 = vcombine.high %v3543_v9, %v3551_v11 }
0x1b25   : > { %3858 = vmatprep.subr.bf16.mxu0 %v6137_v18  ;;  %v6157_v54 = vcombine.high %v3555_v28, %v3563_v48  ;;  %v6147_v18 = vcombine.high %v3542_v6, %v3550_v7 }
0x1b26   : > { %v3488_v55 = vadd.f32 %v6131_v47, %v3480_v53  ;;  %v3489_v56 = vadd.f32 %v3487_v50, %v7717_v51  ;;  %3816 = vmatpush1.bf16.msra.mxu1 %v6134_v14  ;;  %3859 = vmatpush1.bf16.msra.mxu0 %v6136_v15  ;;  %v3562_v47 = vld [vmem:[%s7418_s8 + $0xd0] sm:$0xff] }
0x1b27   : > { %3817 = vmatprep.subr.bf16.mxu1 %v6151_v21  ;;  %3860 = vmatprep.subr.bf16.mxu0 %v6153_v12  ;;  %v6155_v53 = vcombine.high %v3554_v46, %v3562_v47  ;;  %v3559_v21 = vld [vmem:[%s7418_s8 + $0xb8] sm:$0xff]  ;;  %v6163_v12 = vcombine.high %v3558_v10, %v3566_v20 }
0x1b28   : > { %v3493_v22 = vsel %vm1074_vm2, %v3489_v56, 0.0  ;;  %v3490_v16 = vadd.f32 %v3488_v55, %v7719_v52  ;;  %v3540_v55 = vld [vmem:[%s7418_s8 + $0x20] sm:$0xff]  ;;  %v6165_v29 = vcombine.high %v3559_v21, %v3567_v23  ;;  %v6164_v17 = vcombine.low %v3559_v21, %v3567_v23 }
0x1b29   : > { %3494 = vadd.xlane.f32.xlu1 %v3493_v22  ;;  %v3541_v22 = vld [vmem:[%s7418_s8 + $0x28] sm:$0xff] }
0x1b2a   : > { %v3496_v57 = vsel %vm1074_vm2, %v3490_v16, 0.0  ;;  %3818 = vmatpush1.bf16.msra.mxu1 %v6150_v25  ;;  %3861 = vmatpush1.bf16.msra.mxu0 %v6152_v27  ;;  %v6146_v25 = vcombine.low %v3542_v6, %v3550_v7  ;;  %v6148_v27 = vcombine.low %v3543_v9, %v3551_v11  ;;  %v3590_v9 = vsub.s32 4, %v7508_v26 }
0x1b2b   : > { %3497 = vadd.xlane.f32.xlu0 %v3496_v57  ;;  %3901 = vmatprep.subr.bf16.mxu1 %v6139_v32  ;;  %v6154_v57 = vcombine.low %v3554_v46, %v3562_v47  ;;  %v6900_v32 = vld [vmem:[%s7433_s29 + $0x40] sm:$0xff]   ;;  %v6920_v46 = vld [vmem:[%s7433_s29 + $0x68] sm:$0xff]  }
0x1b2c   : > { %3944 = vmatprep.subr.bf16.mxu0 %v6141_v37  ;;  %v6904_v37 = vld [vmem:[%s7433_s29 + $0x48] sm:$0xff]  }
0x1b2d   : > { %v6921_v47 = vld [vmem:[%s7433_s29 + $0xe8] sm:$0xff]  }
0x1bb6   : > { %v3495_v58 = vpop.xlane.xlu1 %3494 }
0x1bb7   : > { %v3499_v61 = vmul.f32 0.03125, %v3495_v58  ;;  %v6156_v58 = vcombine.low %v3555_v28, %v3563_v48  ;;  %v6922_v28 = vld [vmem:[%s7433_s29 + $0x28] sm:$0xff]  }
0x1bb8   : > { %v3498_v62 = vpop.xlane.xlu0 %3497  ;;  %v6923_v48 = vld [vmem:[%s7433_s29 + $0xa8] sm:$0xff]  }
0x1bb9   : > { %v3501_v63 = vsub.f32 %v3489_v56, %v3499_v61  ;;  %v3500_v0 = vmul.f32 0.03125, %v3498_v62  ;;  %v3548_v56 = vld [vmem:[%s7418_s8 + $0x60] sm:$0xff] }
0x1bba   : > { %v6143_v61 = vcombine.high %v3540_v55, %v3548_v56 }
0x1bbb   : > { %v3502_v1 = vsub.f32 %v3490_v16, %v3500_v0  ;;  %v3503_v2 = vmul.f32 %v3501_v63, %v3501_v63  ;;  %v3549_v16 = vld [vmem:[%s7418_s8 + $0x68] sm:$0xff]  ;;  %v3564_v0 = vld [vmem:[%s7418_s8 + $0xe0] sm:$0xff] }
0x1bbc   : > { %v6145_v62 = vcombine.high %v3541_v22, %v3549_v16 }
0x1bbd   : > { %v3505_v51 = vsel %vm1074_vm2, %v3503_v2, 0.0  ;;  %v3504_v4 = vmul.f32 %v3502_v1, %v3502_v1  ;;  %v3565_v2 = vld [vmem:[%s7418_s8 + $0xe8] sm:$0xff] }
0x1bbe   : > { %3506 = vadd.xlane.f32.xlu1 %v3505_v51  ;;  %v6142_v51 = vcombine.low %v3540_v55, %v3548_v56  ;;  %v6927_v55 = vld [vmem:[%s7433_s29 + $0xb0] sm:$0xff]   ;;  %v6928_v56 = vld [vmem:[%s7433_s29 + $0x78] sm:$0xff]  }
0x1bbf   : > { %v3508_v52 = vsel %vm1074_vm2, %v3504_v4, 0.0  ;;  %v6144_v4 = vcombine.low %v3541_v22, %v3549_v16  ;;  %v6929_v22 = vld [vmem:[%s7433_s29 + $0xf8] sm:$0xff]  }
0x1bc0   : > { %3509 = vadd.xlane.f32.xlu0 %v3508_v52  ;;  %v6930_v16 = vld [vmem:[%s7433_s29 + $0x38] sm:$0xff]  }
0x1c4b   : > { %v3507_v38 = vpop.xlane.xlu1 %3506 }
0x1c4c   : > { %v3511_v24 = vmul.f32 0.03125, %v3507_v38  ;;  %v6905_v38 = vld [vmem:[%s7433_s29 + $0xc8] sm:$0xff]  }
0x1c4d   : > { %v3510_v39 = vpop.xlane.xlu0 %3509 }
0x1c4e   : > { %v3513_v40 = vadd.f32 1e-05, %v3511_v24  ;;  %v3512_v3 = vmul.f32 0.03125, %v3510_v39  ;;  %v6907_v24 = vld [vmem:[%s7433_s29 + $0x88] sm:$0xff]   ;;  %v6908_v39 = vld [vmem:[%s7433_s29 + $0x50] sm:$0xff]  }
0x1c50   : > { %7096 = vrsqrt.f32 %v3513_v40  ;;  %v3514_v41 = vadd.f32 1e-05, %v3512_v3  ;;  %v6909_v40 = vld [vmem:[%s7433_s29 + $0xd0] sm:$0xff]  }
0x1c51   : > { %v6910_v3 = vld [vmem:[%s7433_s29 + $0x10] sm:$0xff]  }
0x1c52   : > { %7098 = vrsqrt.f32 %v3514_v41  ;;  %v6911_v41 = vld [vmem:[%s7433_s29 + $0x90] sm:$0xff]  }
0x1c5a   : > { %v7097_v8 = vpop.eup %7096 }
0x1c5b   : > { %v3517_v43 = vmul.f32 %v7097_v8, %v3501_v63  ;;  %v3556_v63 = vld [vmem:[%s7418_s8 + $0xa0] sm:$0xff]  ;;  %v6912_v8 = vld [vmem:[%s7433_s29 + $0x58] sm:$0xff]  }
0x1c5c   : > { %v7099_v60 = vpop.eup %7098  ;;  %v6159_v52 = vcombine.high %v3556_v63, %v3564_v0  ;;  %v6158_v14 = vcombine.low %v3556_v63, %v3564_v0  ;;  %v3582_v63 = vsub.s32 2, %v7508_v26  ;;  %v3568_v0 = vld [vmem:[%s7423_s23] sm:$0xff] }
0x1c5d   : > { %v3525_v33 = vmul.f32 %v6132_v42, %v3517_v43  ;;  %v3518_v44 = vmul.f32 %v7099_v60, %v3502_v1  ;;  %v3557_v1 = vld [vmem:[%s7418_s8 + $0xa8] sm:$0xff]  ;;  %v6914_v43 = vld [vmem:[%s7433_s29 + $0x18] sm:$0xff]  }
0x1c5e   : > { %v6161_v5 = vcombine.high %v3557_v1, %v3565_v2  ;;  %v6160_v15 = vcombine.low %v3557_v1, %v3565_v2  ;;  %v6915_v60 = vld [vmem:[%s7433_s29 + $0x98] sm:$0xff]   ;;  %v3578_v1 = vsub.s32 1, %v7508_v26  ;;  %v3586_v2 = vsub.s32 3, %v7508_v26 }
0x1c5f   : > { %v3526_v36 = vmul.f32 %v6132_v42, %v3518_v44  ;;  %v7956_v13 = vadd.f32 %v6133_v45, %v3525_v33  ;;  %v6913_v42 = vld [vmem:[%s7433_s29 + $0xd8] sm:$0xff]   ;;  %v6916_v33 = vld [vmem:[%s7433_s29 + $0x60] sm:$0xff]  }
0x1c60   : > { %v6917_v44 = vld [vmem:[%s7433_s29 + $0xe0] sm:$0xff]  }
0x1c61   : > { %v7958_v49 = vadd.f32 %v6133_v45, %v3526_v36  ;;  %v6918_v45 = vld [vmem:[%s7433_s29 + $0x20] sm:$0xff]  }
0x1c62   : > { %v6919_v36 = vld [vmem:[%s7433_s29 + $0xa0] sm:$0xff]  }
0x1c63   : > { %v7962_v50 = vpack.c.bf16 %v7958_v49, %v7956_v13 }
0x1c65   : > { %6166 = vmatmul.mubr.msk.bf16.vlgmr.msra.gmra.mrb[84].mxu1 %vm1074_vm2, %v7962_v50  ;;  %6167 = vmatmul.mubr.msk.bf16.vlgmr.msra.gmra.mrb[88].mxu0 %vm1074_vm2, %v7962_v50 }
0x1c66   : > { %3902 = vmatpush1.bf16.msra.mxu1 %v6138_v34  ;;  %3945 = vmatpush1.bf16.msra.mxu0 %v6140_v35  ;;  %v6902_v34 = vld [vmem:[%s7433_s29] sm:$0xff]  }
0x1c67   : > { %3903 = vmatprep.subr.bf16.mxu1 %v6155_v53  ;;  %3946 = vmatprep.subr.bf16.mxu0 %v6157_v54  ;;  %v6903_v35 = vld [vmem:[%s7433_s29 + $0x80] sm:$0xff]   ;;  %v6925_v53 = vld [vmem:[%s7433_s29 + $0xf0] sm:$0xff]  }
0x1c68   : > { %3933 = vmatprep.mubr.bf16.mxu1 %v7223_v31  ;;  %3976 = vmatprep.mubr.bf16.mxu0 %v7223_v31  ;;  %v6926_v54 = vld [vmem:[%s7433_s29 + $0x30] sm:$0xff]  }
0x1c6a   : > { %3904 = vmatpush1.bf16.msra.mxu1 %v6154_v57  ;;  %3947 = vmatpush1.bf16.msra.mxu0 %v6156_v58  ;;  %v6931_v57 = vld [vmem:[%s7433_s29 + $0xb8] sm:$0xff]   ;;  %v6932_v58 = vld [vmem:[%s7433_s29 + $0x140] sm:$0xff]  }
0x1c6b   : > { %3987 = vmatprep.subr.bf16.mxu1 %v6143_v61  ;;  %4030 = vmatprep.subr.bf16.mxu0 %v6145_v62  ;;  %v6933_v61 = vld [vmem:[%s7433_s29 + $0x1c0] sm:$0xff]   ;;  %v3574_v62 = vsub.s32 0, %v7508_v26 }
0x1c6d   : > { %6168 = vmatmul.mubr.msk.bf16.vlgmr.msra.gmra.mrb[88].mxu1 %vm1074_vm2, %v7962_v50  ;;  %6169 = vmatmul.mubr.msk.bf16.vlgmr.msra.gmra.mrb[92].mxu0 %vm1074_vm2, %v7962_v50 }
0x1c6e   : > { %3988 = vmatpush1.bf16.msra.mxu1 %v6142_v51  ;;  %4031 = vmatpush1.bf16.msra.mxu0 %v6144_v4  ;;  %v3575_v51 = vrot.slane %v3568_v0, %v3574_v62  ;;  %v3583_v4 = vrot.slane %v3568_v0, %v3582_v63 }
0x1c6f   : > { %3989 = vmatprep.subr.bf16.mxu1 %v6159_v52  ;;  %4032 = vmatprep.subr.bf16.mxu0 %v6161_v5  ;;  %v3579_v52 = vrot.slane %v3568_v0, %v3578_v1  ;;  %v3587_v5 = vrot.slane %v3568_v0, %v3586_v2 }
0x1c70   : > { %4019 = vmatprep.mubr.bf16.mxu1 %v7223_v31  ;;  %4062 = vmatprep.mubr.bf16.mxu0 %v7223_v31 }
0x1c72   : > { %3990 = vmatpush1.bf16.msra.mxu1 %v6158_v14  ;;  %4033 = vmatpush1.bf16.msra.mxu0 %v6160_v15 }
0x1c73   : > { %4073 = vmatprep.subr.bf16.mxu1 %v6147_v18  ;;  %4116 = vmatprep.subr.bf16.mxu0 %v6149_v19  ;;  %v3598_v19 = vsub.s32 6, %v7508_v26 }
0x1c75   : > { %6170 = vmatmul.mubr.msk.bf16.vlgmr.msra.gmra.mrb[92].mxu1 %vm1074_vm2, %v7962_v50  ;;  %6171 = vmatmul.mubr.msk.bf16.vlgmr.msra.gmra.mrb[96].mxu0 %vm1074_vm2, %v7962_v50 }
0x1c76   : > { %4074 = vmatpush1.bf16.msra.mxu1 %v6146_v25  ;;  %4117 = vmatpush1.bf16.msra.mxu0 %v6148_v27  ;;  %v3594_v25 = vsub.s32 5, %v7508_v26  ;;  %v3602_v27 = vsub.s32 7, %v7508_v26 }
0x1c77   : > { %4075 = vmatprep.subr.bf16.mxu1 %v6163_v12  ;;  %4118 = vmatprep.subr.bf16.mxu0 %v6165_v29 }
0x1c78   : > { %4105 = vmatprep.mubr.bf16.mxu1 %v7223_v31  ;;  %4148 = vmatprep.mubr.bf16.mxu0 %v7223_v31  ;;  %v6906_v31 = vld [vmem:[%s7433_s29 + $0x8] sm:$0xff]  }
0x1c7a   : > { %4076 = vmatpush1.bf16.msra.mxu1 %v6162_v30  ;;  %4119 = vmatpush1.bf16.msra.mxu0 %v6164_v17 }
0x1c7b   : > { %6410 = vmatprep.subr.bf16.mxu1 %v6900_v32  ;;  %6432 = vmatprep.subr.bf16.mxu0 %v6901_v59  ;;  %v3591_v32 = vrot.slane %v3568_v0, %v3590_v9  ;;  %v3569_v59 = vld [vmem:[%s7423_s23 + $0x8] sm:$0xff]  ;;  %s8542_s23 = scalar_lea.vmem %s8472_s15, %s7366_s27 }
0x1c7c   : > { %v8046_v26 = vrot.slane %v3569_v59, %v3574_v62  ;;  %v8060_v62 = vrot.slane %v3569_v59, %v3594_v25 }
0x1c7d   : > { %6172 = vmatmul.mubr.msk.bf16.vlgmr.msra.gmra.mrb[96].mxu1 %vm1074_vm2, %v7962_v50  ;;  %6173 = vmatmul.mubr.msk.bf16.vlgmr.msra.gmra.mrb[100].mxu0 %vm1074_vm2, %v7962_v50  ;;  %v6924_v50 = vld [vmem:[%s7433_s29 + $0x70] sm:$0xff]  }
0x1c7e   : > { %6411 = vmatpush3.bf16.msra.mxu1 %v6902_v34  ;;  %6433 = vmatpush3.bf16.msra.mxu0 %v6903_v35 }
0x1c7f   : > { %6412 = vmatprep.subr.bf16.mxu1 %v6904_v37  ;;  %6434 = vmatprep.subr.bf16.mxu0 %v6905_v38 }
0x1c82   : > { %6413 = vmatpush3.bf16.msra.mxu1 %v6906_v31  ;;  %6435 = vmatpush3.bf16.msra.mxu0 %v6907_v24  ;;  %v3599_v31 = vrot.slane %v3568_v0, %v3598_v19 }
0x1c83   : > { %6414 = vmatprep.subr.bf16.mxu1 %v6908_v39  ;;  %6436 = vmatprep.subr.bf16.mxu0 %v6909_v40  ;;  %v3595_v39 = vrot.slane %v3568_v0, %v3594_v25  ;;  %v3603_v40 = vrot.slane %v3568_v0, %v3602_v27 }
0x1c86   : > { %6415 = vmatpush3.bf16.msra.mxu1 %v6910_v3  ;;  %6437 = vmatpush3.bf16.msra.mxu0 %v6911_v41 }
0x1c87   : > { %6416 = vmatprep.subr.bf16.mxu1 %v6912_v8  ;;  %6438 = vmatprep.subr.bf16.mxu0 %v6913_v42 }
0x1c8a   : > { %6417 = vmatpush3.bf16.msra.mxu1 %v6914_v43  ;;  %6439 = vmatpush3.bf16.msra.mxu0 %v6915_v60  ;;  %v8048_v60 = vrot.slane %v3569_v59, %v3582_v63  ;;  %v8062_v63 = vrot.slane %v3569_v59, %v3602_v27 }
0x1c8b   : > { %6418 = vmatprep.subr.bf16.mxu1 %v6916_v33  ;;  %6440 = vmatprep.subr.bf16.mxu0 %v6917_v44 }
0x1c8e   : > { %6419 = vmatpush3.bf16.msra.mxu1 %v6918_v45  ;;  %6441 = vmatpush3.bf16.msra.mxu0 %v6919_v36  ;;  %v8050_v36 = vrot.slane %v3569_v59, %v3578_v1 }
0x1c8f   : > { %6420 = vmatprep.subr.bf16.mxu1 %v6920_v46  ;;  %6442 = vmatprep.subr.bf16.mxu0 %v6921_v47  ;;  %v8052_v46 = vrot.slane %v3569_v59, %v3586_v2 }
0x1c92   : > { %6421 = vmatpush3.bf16.msra.mxu1 %v6922_v28  ;;  %6443 = vmatpush3.bf16.msra.mxu0 %v6923_v48 }
0x1c93   : > { %6422 = vmatprep.subr.bf16.mxu1 %v6924_v50  ;;  %6444 = vmatprep.subr.bf16.mxu0 %v6925_v53  ;;  %v8054_v53 = vrot.slane %v3569_v59, %v3590_v9 }
0x1c96   : > { %6423 = vmatpush3.bf16.msra.mxu1 %v6926_v54  ;;  %6445 = vmatpush3.bf16.msra.mxu0 %v6927_v55 }
0x1c97   : > { %6424 = vmatprep.subr.bf16.mxu1 %v6928_v56  ;;  %6446 = vmatprep.subr.bf16.mxu0 %v6929_v22 }
0x1c9a   : > { %6425 = vmatpush3.bf16.msra.mxu1 %v6930_v16  ;;  %6447 = vmatpush3.bf16.msra.mxu0 %v6931_v57  ;;  %v8058_v57 = vrot.slane %v3569_v59, %v3598_v19 }
0x1c9b   : > { %6454 = vmatprep.subr.bf16.mxu1 %v6932_v58  ;;  %6476 = vmatprep.subr.bf16.mxu0 %v6933_v61 }
0x1d38   : > { %v3849_v6 = vpop.f32.mrb[84].mxu1  ;;  %v3892_v7 = vpop.f32.mrb[88].mxu0 }
0x1d39   : > { %v3850_v11 = vadd.f32 %v3849_v6, %v3575_v51  ;;  %v3893_v14 = vadd.f32 %v3892_v7, %v3583_v4  ;;  %v3851_v15 = vpop.f32.mrb[85].mxu1  ;;  %v3894_v18 = vpop.f32.mrb[89].mxu0 }
0x1d3a   : > { %v3852_v10 = vadd.f32 %v3851_v15, %v3579_v52  ;;  %v3895_v20 = vadd.f32 %v3894_v18, %v3587_v5  ;;  %v3853_v21 = vpop.f32.mrb[86].mxu1  ;;  %v3896_v23 = vpop.f32.mrb[90].mxu0 }
0x1d3b   : > { %v4191_v12 = vmul.f32 0.70710677, %v3850_v11  ;;  %v4193_v29 = vmul.f32 0.70710677, %v3893_v14  ;;  %v3854_v34 = vadd.f32 %v3853_v21, %v3575_v51  ;;  %v3897_v35 = vadd.f32 %v3896_v23, %v3583_v4  ;;  %v3855_v37 = vpop.f32.mrb[87].mxu1  ;;  %v3898_v38 = vpop.f32.mrb[91].mxu0 }
0x1d3c   : > { %v4192_v30 = vmul.f32 0.70710677, %v3852_v10  ;;  %v4194_v17 = vmul.f32 0.70710677, %v3895_v20  ;;  %v3856_v24 = vadd.f32 %v3855_v37, %v3579_v52  ;;  %v3899_v41 = vadd.f32 %v3898_v38, %v3587_v5 }
0x1d3d   : > { %7100 = verf.f32 %v4191_v12  ;;  %v4207_v3 = vmul.f32 0.70710677, %v3854_v34  ;;  %v4209_v8 = vmul.f32 0.70710677, %v3897_v35  ;;  %v4159_v0 = vmul.f32 0.5, %v3850_v11 }
0x1d3e   : > { %7102 = verf.f32 %v4193_v29  ;;  %v4208_v42 = vmul.f32 0.70710677, %v3856_v24  ;;  %v4210_v54 = vmul.f32 0.70710677, %v3899_v41  ;;  %v4161_v1 = vmul.f32 0.5, %v3893_v14 }
0x1d3f   : > { %7104 = verf.f32 %v4192_v30  ;;  %v8064_v6 = vmul.f32 0.5, %v3852_v10  ;;  %v8066_v7 = vmul.f32 0.5, %v3895_v20  ;;  %v4175_v19 = vmul.f32 0.5, %v3854_v34 }
0x1d40   : > { %7106 = verf.f32 %v4194_v17  ;;  %v3935_v43 = vpop.f32.mrb[88].mxu1  ;;  %v3978_v44 = vpop.f32.mrb[92].mxu0  ;;  %v4177_v27 = vmul.f32 0.5, %v3897_v35  ;;  %v8069_v12 = vmul.f32 0.5, %v3856_v24  ;;  %v8071_v17 = vmul.f32 0.5, %v3899_v41 }
0x1d41   : > { %7108 = verf.f32 %v4207_v3  ;;  %v3936_v33 = vadd.f32 %v3935_v43, %v3591_v32  ;;  %v3937_v45 = vpop.f32.mrb[89].mxu1  ;;  %v3979_v47 = vadd.f32 %v3978_v44, %v3599_v31  ;;  %v3980_v48 = vpop.f32.mrb[93].mxu0 }
0x1d42   : > { %7110 = verf.f32 %v4209_v8  ;;  %v3938_v28 = vadd.f32 %v3937_v45, %v3595_v39  ;;  %v3939_v50 = vpop.f32.mrb[90].mxu1  ;;  %v8056_v56 = vadd.f32 %v3980_v48, %v3603_v40  ;;  %v3982_v22 = vpop.f32.mrb[94].mxu0 }
0x1d43   : > { %v4195_v55 = vmul.f32 0.70710677, %v3936_v33  ;;  %v3941_v16 = vpop.f32.mrb[91].mxu1  ;;  %7112 = verf.f32 %v4208_v42  ;;  %v4197_v58 = vmul.f32 0.70710677, %v3979_v47  ;;  %v3984_v61 = vpop.f32.mrb[95].mxu0  ;;  %v3940_v51 = vadd.f32 %v3939_v50, %v3591_v32 }
0x1d44   : > { %v4196_v2 = vmul.f32 0.70710677, %v3938_v28  ;;  %v3983_v4 = vadd.f32 %v3982_v22, %v3599_v31  ;;  %v3942_v52 = vadd.f32 %v3941_v16, %v3595_v39  ;;  %v4198_v9 = vmul.f32 0.70710677, %v8056_v56 }
0x1d45   : > { %7114 = verf.f32 %v4195_v55  ;;  %v4211_v21 = vmul.f32 0.70710677, %v3940_v51  ;;  %v3985_v11 = vadd.f32 %v3984_v61, %v3603_v40  ;;  %v8073_v38 = vmul.f32 0.5, %v3936_v33 }
0x1d46   : > { %7116 = verf.f32 %v4197_v58  ;;  %v4213_v29 = vmul.f32 0.70710677, %v3983_v4  ;;  %v4212_v32 = vmul.f32 0.70710677, %v3942_v52  ;;  %v8075_v31 = vmul.f32 0.5, %v3979_v47 }
0x1d47   : > { %v7101_v5 = vpop.eup %7100  ;;  %7118 = verf.f32 %v4210_v54  ;;  %v8077_v39 = vmul.f32 0.5, %v3938_v28  ;;  %v4214_v8 = vmul.f32 0.70710677, %v3985_v11 }
0x1d48   : > { %v7103_v15 = vpop.eup %7102  ;;  %v4255_v18 = vadd.f32 1.0, %v7101_v5  ;;  %v4021_v14 = vpop.f32.mrb[92].mxu1  ;;  %7120 = verf.f32 %v4196_v2  ;;  %v4181_v2 = vmul.f32 0.5, %v3983_v4 }
0x1d49   : > { %v4064_v23 = vpop.f32.mrb[96].mxu0  ;;  %v7105_v25 = vpop.eup %7104  ;;  %v4257_v20 = vadd.f32 1.0, %v7103_v15  ;;  %7122 = verf.f32 %v4211_v21  ;;  %v4022_v33 = vadd.f32 %v4021_v14, %v8046_v26  ;;  %v8101_v21 = vmul.f32 0.5, %v3942_v52 }
0x1d4a   : > { %v4023_v10 = vpop.f32.mrb[93].mxu1  ;;  %v7107_v30 = vpop.eup %7106  ;;  %7124 = verf.f32 %v4213_v29  ;;  %v8081_v3 = vmul.f32 %v4255_v18, %v4159_v0  ;;  %v4256_v43 = vadd.f32 1.0, %v7105_v25  ;;  %v4065_v45 = vadd.f32 %v4064_v23, %v8048_v60 }
0x1d4b   : > { %v4066_v59 = vpop.f32.mrb[97].mxu0  ;;  %v4025_v37 = vpop.f32.mrb[94].mxu1  ;;  %7126 = verf.f32 %v4198_v9  ;;  %v8087_v28 = vmul.f32 %v4257_v20, %v4161_v1  ;;  %v4258_v48 = vadd.f32 1.0, %v7107_v30  ;;  %v4199_v22 = vmul.f32 0.70710677, %v4022_v33 }
0x1d4c   : > { %v7109_v34 = vpop.eup %7108  ;;  %v4068_v35 = vpop.f32.mrb[98].mxu0  ;;  %7128 = verf.f32 %v4212_v32  ;;  %v4024_v16 = vadd.f32 %v4023_v10, %v8050_v36  ;;  %v8097_v0 = vmul.f32 0.5, %v8056_v56  ;;  %v4179_v1 = vmul.f32 0.5, %v3940_v51 }
0x1d4d   : > { %v8079_v24 = vpop.f32.mrb[95].mxu1  ;;  %v7111_v40 = vpop.eup %7110  ;;  %v4271_v41 = vadd.f32 1.0, %v7109_v34  ;;  %7130 = verf.f32 %v4214_v8  ;;  %v8103_v14 = vmul.f32 0.5, %v3985_v11  ;;  %v4201_v51 = vmul.f32 0.70710677, %v4065_v45 }
0x1d4e   : > { %v8083_v42 = vpop.f32.mrb[99].mxu0  ;;  %v4273_v44 = vadd.f32 1.0, %v7111_v40  ;;  %v7113_v47 = vpop.eup %7112  ;;  %7132 = verf.f32 %v4199_v22  ;;  %v8113_v30 = vmul.f32 %v4258_v48, %v8066_v7  ;;  %v4200_v20 = vmul.f32 0.70710677, %v4024_v16 }
0x1d4f   : > { %v8089_v50 = vmul.f32 %v4271_v41, %v4175_v19  ;;  %v7115_v54 = vpop.eup %7114  ;;  %v4272_v19 = vadd.f32 1.0, %v7113_v47  ;;  %v4067_v11 = vadd.f32 %v4066_v59, %v8052_v46  ;;  %7134 = verf.f32 %v4201_v51 }
0x1d50   : > { %v8091_v55 = vmul.f32 %v4273_v44, %v4177_v27  ;;  %v7117_v58 = vpop.eup %7116  ;;  %v4107_v5 = vpop.f32.mrb[96].mxu1  ;;  %v8106_v27 = vmul.f32 %v4256_v43, %v8064_v6  ;;  %v4259_v56 = vadd.f32 1.0, %v7115_v54  ;;  %v4026_v41 = vadd.f32 %v4025_v37, %v8046_v26 }
0x1d51   : > { %v4319_v61 = vpack.c.bf16 %v8089_v50, %v8081_v3  ;;  %v4150_v9 = vpop.f32.mrb[100].mxu0  ;;  %v7119_v15 = vpop.eup %7118  ;;  %v4261_v52 = vadd.f32 1.0, %v7117_v58  ;;  %v4069_v8 = vadd.f32 %v4068_v35, %v8048_v60  ;;  %v8123_v44 = vmul.f32 %v4272_v19, %v8069_v12  ;;  %v6938_v3 = vld [vmem:[%s7433_s29 + $0x108] sm:$0xff]  }
0x1d52   : > { %v4321_v18 = vpack.c.bf16 %v8091_v55, %v8087_v28  ;;  %v4109_v23 = vpop.f32.mrb[97].mxu1  ;;  %v4152_v25 = vpop.f32.mrb[101].mxu0  ;;  %v4274_v40 = vadd.f32 1.0, %v7119_v15  ;;  %v8125_v47 = vmul.f32 0.5, %v4022_v33  ;;  %v8127_v48 = vmul.f32 0.5, %v4065_v45  ;;  %v6941_v55 = vld [vmem:[%s7433_s29 + $0x1d0] sm:$0xff]  }
0x1d53   : > { %v8108_v4 = vpop.f32.mrb[98].mxu1  ;;  %v8110_v29 = vpop.f32.mrb[102].mxu0  ;;  %v8130_v54 = vmul.f32 %v4259_v56, %v8073_v38  ;;  %v4202_v58 = vmul.f32 0.70710677, %v4067_v11  ;;  %v4215_v15 = vmul.f32 0.70710677, %v4026_v41  ;;  %v8133_v26 = vmul.f32 %v4261_v52, %v8075_v31 }
0x1d54   : > { %v7121_v10 = vpop.eup %7120  ;;  %v8116_v32 = vpop.f32.mrb[99].mxu1  ;;  %7136 = verf.f32 %v4200_v20  ;;  %v4217_v12 = vmul.f32 0.70710677, %v4069_v8  ;;  %v4028_v33 = vadd.f32 %v8079_v24, %v8050_v36  ;;  %v4071_v38 = vadd.f32 %v8083_v42, %v8052_v46 }
0x1d55   : > { %v8118_v34 = vpop.f32.mrb[103].mxu0  ;;  %v7123_v6 = vpop.eup %7122  ;;  %7138 = verf.f32 %v4202_v58  ;;  %v4306_v19 = vmul.f32 %v4274_v40, %v8071_v17  ;;  %v4260_v56 = vadd.f32 1.0, %v7121_v10  ;;  %v8148_v20 = vmul.f32 0.5, %v4024_v16 }
0x1d56   : > { %v7125_v43 = vpop.eup %7124  ;;  %v4275_v7 = vadd.f32 1.0, %v7123_v6  ;;  %7140 = verf.f32 %v4215_v15  ;;  %v4216_v51 = vmul.f32 0.70710677, %v4028_v33  ;;  %v4218_v36 = vmul.f32 0.70710677, %v4071_v38 }
0x1d57   : > { %v7127_v59 = vpop.eup %7126  ;;  %v4277_v22 = vadd.f32 1.0, %v7125_v43  ;;  %7142 = verf.f32 %v4217_v12  ;;  %v8151_v46 = vadd.f32 %v4107_v5, %v8054_v53  ;;  %v8154_v42 = vadd.f32 %v4150_v9, %v8058_v57 }
0x1d58   : > { %v8135_v60 = vmul.f32 %v4275_v7, %v4179_v1  ;;  %v7129_v37 = vpop.eup %7128  ;;  %v4262_v1 = vadd.f32 1.0, %v7127_v59  ;;  %7144 = verf.f32 %v4216_v51  ;;  %v8157_v10 = vadd.f32 %v4109_v23, %v8060_v62 }
0x1d59   : > { %v8137_v35 = vmul.f32 %v4277_v22, %v4181_v2  ;;  %v7131_v45 = vpop.eup %7130  ;;  %v4276_v52 = vadd.f32 1.0, %v7129_v37  ;;  %v8160_v6 = vmul.f32 %v4260_v56, %v8077_v39  ;;  %7146 = verf.f32 %v4218_v36 }
0x1d5a   : > { %v4323_v31 = vpack.c.bf16 %v8135_v60, %v8130_v54  ;;  %v7133_v24 = vpop.eup %7132  ;;  %v4278_v17 = vadd.f32 1.0, %v7131_v45  ;;  %v4203_v16 = vmul.f32 0.70710677, %v8151_v46  ;;  %v8164_v40 = vadd.f32 %v4152_v25, %v8062_v63  ;;  %v6935_v45 = vld [vmem:[%s7433_s29 + $0x180] sm:$0xff]   ;;  %v6973_v54 = vld [vmem:[%s7433_s29 + $0x2d0] sm:$0xff]  }
0x1d5b   : > { %v4325_v2 = vpack.c.bf16 %v8137_v35, %v8133_v26  ;;  %v7135_v5 = vpop.eup %7134  ;;  %v8167_v43 = vmul.f32 %v4262_v1, %v8097_v0  ;;  %v8169_v7 = vmul.f32 0.5, %v4067_v11  ;;  %v4183_v9 = vmul.f32 0.5, %v4026_v41  ;;  %v6934_v41 = vld [vmem:[%s7433_s29 + $0x100] sm:$0xff]   ;;  %v6974_v26 = vld [vmem:[%s7433_s29 + $0x210] sm:$0xff]   ;;  %v6976_v35 = vld [vmem:[%s7433_s29 + $0x258] sm:$0xff]  }
0x1d5c   : > { %v4205_v23 = vmul.f32 0.70710677, %v8154_v42  ;;  %v8173_v39 = vmul.f32 %v4276_v52, %v8101_v21  ;;  %v4263_v59 = vadd.f32 1.0, %v7133_v24  ;;  %v4185_v22 = vmul.f32 0.5, %v4069_v8  ;;  %v6975_v60 = vld [vmem:[%s7433_s29 + $0x290] sm:$0xff]  }
0x1d5d   : > { %v4204_v58 = vmul.f32 0.70710677, %v8157_v10  ;;  %v8177_v25 = vmul.f32 %v4278_v17, %v8103_v14  ;;  %v4184_v15 = vmul.f32 0.5, %v4028_v33  ;;  %v4206_v0 = vmul.f32 0.70710677, %v8164_v40  ;;  %v6936_v14 = vld [vmem:[%s7433_s29 + $0x148] sm:$0xff]  }
0x1d5e   : > { %v4320_v11 = vpack.c.bf16 %v8123_v44, %v8106_v27  ;;  %v7137_v12 = vpop.eup %7136  ;;  %v4265_v37 = vadd.f32 1.0, %v7135_v5  ;;  %7148 = verf.f32 %v4203_v16  ;;  %v4322_v21 = vpack.c.bf16 %v4306_v19, %v8113_v30  ;;  %v6937_v30 = vld [vmem:[%s7433_s29 + $0x1c8] sm:$0xff]  }
0x1d5f   : > { %v8186_v8 = vadd.f32 %v8108_v4, %v8054_v53  ;;  %v7139_v56 = vpop.eup %7138  ;;  %v4186_v33 = vmul.f32 0.5, %v4071_v38  ;;  %7150 = verf.f32 %v4205_v23  ;;  %v8192_v1 = vadd.f32 %v8110_v29, %v8058_v57  ;;  %v6940_v38 = vld [vmem:[%s7433_s29 + $0x150] sm:$0xff]  }
0x1d60   : > { %5398 = vmatprep.mubr.bf16.mxu1 %v4320_v11  ;;  %v8196_v27 = vadd.f32 %v8116_v32, %v8060_v62  ;;  %v7141_v44 = vpop.eup %7140  ;;  %v8200_v53 = vmul.f32 %v4263_v59, %v8125_v47  ;;  %7152 = verf.f32 %v4204_v58  ;;  %5439 = vmatprep.mubr.bf16.mxu0 %v4322_v21  ;;  %v8208_v57 = vadd.f32 %v8118_v34, %v8062_v63  ;;  %v6939_v34 = vld [vmem:[%s7433_s29 + $0x188] sm:$0xff]   ;;  %v6946_v11 = vld [vmem:[%s7433_s29 + $0x118] sm:$0xff]  }
0x1d61   : > { %v4219_v4 = vmul.f32 0.70710677, %v8186_v8  ;;  %5399 = vmatmul.mubr.bf16.vlgmr.msra.gmra.mrb[100].mxu1 %v4319_v61  ;;  %v7143_v62 = vpop.eup %7142  ;;  %v4264_v29 = vadd.f32 1.0, %v7137_v12  ;;  %v4279_v32 = vadd.f32 1.0, %v7141_v44  ;;  %7154 = verf.f32 %v4206_v0  ;;  %5440 = vmatmul.mubr.bf16.vlgmr.msra.gmra.mrb[104].mxu0 %v4321_v18  ;;  %v6947_v12 = vld [vmem:[%s7433_s29 + $0x198] sm:$0xff]  }
0x1d62   : > { %v4221_v47 = vmul.f32 0.70710677, %v8192_v1  ;;  %6455 = vmatpush3.bf16.msra.mxu1 %v6934_v41  ;;  %v8216_v50 = vmul.f32 %v4265_v37, %v8127_v48  ;;  %v4281_v61 = vadd.f32 1.0, %v7143_v62  ;;  %6477 = vmatpush3.bf16.msra.mxu0 %v6935_v45  ;;  %v4220_v63 = vmul.f32 0.70710677, %v8196_v27  ;;  %v7145_v19 = vpop.eup %7144  ;;  %v6948_v37 = vld [vmem:[%s7433_s29 + $0x160] sm:$0xff]  }
0x1d63   : > { %7156 = verf.f32 %v4219_v4  ;;  %6456 = vmatprep.subr.bf16.mxu1 %v6936_v14  ;;  %v4266_v51 = vadd.f32 1.0, %v7139_v56  ;;  %v8221_v52 = vmul.f32 %v4279_v32, %v4183_v9  ;;  %v4222_v28 = vmul.f32 0.70710677, %v8208_v57  ;;  %6478 = vmatprep.subr.bf16.mxu0 %v6937_v30  ;;  %v7147_v18 = vpop.eup %7146  ;;  %v6942_v9 = vld [vmem:[%s7433_s29 + $0x110] sm:$0xff]   ;;  %v6949_v14 = vld [vmem:[%s7433_s29 + $0x1e0] sm:$0xff]  }
0x1d64   : > { %7158 = verf.f32 %v4221_v47  ;;  %v8225_v48 = vmul.f32 %v4281_v61, %v4185_v22  ;;  %v4280_v36 = vadd.f32 1.0, %v7145_v19  ;;  %v4324_v24 = vpack.c.bf16 %v8173_v39, %v8160_v6  ;;  %v6943_v6 = vld [vmem:[%s7433_s29 + $0x190] sm:$0xff]   ;;  %v6944_v39 = vld [vmem:[%s7433_s29 + $0x158] sm:$0xff]   ;;  %v6952_v19 = vld [vmem:[%s7433_s29 + $0x168] sm:$0xff]  }
0x1d65   : > { %7160 = verf.f32 %v4220_v63  ;;  %v4327_v17 = vpack.c.bf16 %v8221_v52, %v8200_v53  ;;  %v4282_v16 = vadd.f32 1.0, %v7147_v18  ;;  %v4326_v5 = vpack.c.bf16 %v8177_v25, %v8167_v43  ;;  %v7005_v53 = vld [vmem:[%s7433_s29 + $0x3d0] sm:$0xff]  }
0x1d66   : > { %7162 = verf.f32 %v4222_v28  ;;  %6457 = vmatpush3.bf16.msra.mxu1 %v6938_v3  ;;  %v8235_v23 = vmul.f32 %v4264_v29, %v8148_v20  ;;  %v4329_v59 = vpack.c.bf16 %v8225_v48, %v8216_v50  ;;  %v8239_v22 = vmul.f32 %v4280_v36, %v4184_v15  ;;  %6479 = vmatpush3.bf16.msra.mxu0 %v6939_v34  ;;  %v6945_v20 = vld [vmem:[%s7433_s29 + $0x1d8] sm:$0xff]   ;;  %v6950_v3 = vld [vmem:[%s7433_s29 + $0x120] sm:$0xff]   ;;  %v7006_v50 = vld [vmem:[%s7433_s29 + $0x310] sm:$0xff]  }
0x1d67   : > { %6458 = vmatprep.subr.bf16.mxu1 %v6940_v38  ;;  %v8244_v58 = vmul.f32 %v4266_v51, %v8169_v7  ;;  %v8246_v43 = vmul.f32 %v4282_v16, %v4186_v33  ;;  %5480 = vmatprep.mubr.bf16.mxu1 %v4324_v24  ;;  %v4171_v33 = vmul.f32 0.5, %v8151_v46  ;;  %v4173_v30 = vmul.f32 0.5, %v8154_v42  ;;  %v6951_v38 = vld [vmem:[%s7433_s29 + $0x1a0] sm:$0xff]   ;;  %v7007_v52 = vld [vmem:[%s7433_s29 + $0x390] sm:$0xff]   ;;  %v7008_v48 = vld [vmem:[%s7433_s29 + $0x358] sm:$0xff]  }
0x1d68   : > { %6480 = vmatprep.subr.bf16.mxu0 %v6941_v55  ;;  %v7149_v25 = vpop.eup %7148  ;;  %5521 = vmatprep.mubr.bf16.mxu0 %v4326_v5  ;;  %v4328_v15 = vpack.c.bf16 %v8239_v22, %v8235_v23  ;;  %v4172_v62 = vmul.f32 0.5, %v8157_v10  ;;  %v4187_v32 = vmul.f32 0.5, %v8186_v8  ;;  %v4174_v63 = vmul.f32 0.5, %v8164_v40  ;;  %v6953_v40 = vld [vmem:[%s7433_s29 + $0x1e8] sm:$0xff]   ;;  %v6979_v23 = vld [vmem:[%s7433_s29 + $0x298] sm:$0xff]   ;;  %v6980_v22 = vld [vmem:[%s7433_s29 + $0x260] sm:$0xff]  }
0x1d69   : > { %v7151_v0 = vpop.eup %7150  ;;  %v4330_v41 = vpack.c.bf16 %v8246_v43, %v8244_v58  ;;  %v4267_v45 = vadd.f32 1.0, %v7149_v25  ;;  %v4189_v46 = vmul.f32 0.5, %v8192_v1  ;;  %v4188_v28 = vmul.f32 0.5, %v8196_v27  ;;  %v6956_v25 = vld [vmem:[%s7433_s29 + $0x170] sm:$0xff]   ;;  %v6981_v58 = vld [vmem:[%s7433_s29 + $0x2e0] sm:$0xff]  }
0x1d6a   : > { %6459 = vmatpush3.bf16.msra.mxu1 %v6942_v9  ;;  %v7153_v7 = vpop.eup %7152  ;;  %6481 = vmatpush3.bf16.msra.mxu0 %v6943_v6  ;;  %v4269_v44 = vadd.f32 1.0, %v7151_v0  ;;  %v4190_v36 = vmul.f32 0.5, %v8208_v57  ;;  %v6954_v9 = vld [vmem:[%s7433_s29 + $0x128] sm:$0xff]   ;;  %v6957_v0 = vld [vmem:[%s7433_s29 + $0x1f0] sm:$0xff]   ;;  %v6982_v43 = vld [vmem:[%s7433_s29 + $0x220] sm:$0xff]  }
0x1d6b   : > { %6460 = vmatprep.subr.bf16.mxu1 %v6944_v39  ;;  %v7155_v21 = vpop.eup %7154  ;;  %6482 = vmatprep.subr.bf16.mxu0 %v6945_v20  ;;  %v4268_v29 = vadd.f32 1.0, %v7153_v7  ;;  %v8266_v51 = vmul.f32 %v4267_v45, %v4171_v33  ;;  %v6955_v57 = vld [vmem:[%s7433_s29 + $0x1a8] sm:$0xff]   ;;  %v6961_v45 = vld [vmem:[%s7433_s29 + $0x1f8] sm:$0xff]   ;;  %v6964_v33 = vld [vmem:[%s7433_s29 + $0x240] sm:$0xff]  }
0x1d6c   : > { %v4270_v34 = vadd.f32 1.0, %v7155_v21  ;;  %v8272_v18 = vmul.f32 %v4269_v44, %v4173_v30  ;;  %v6960_v21 = vld [vmem:[%s7433_s29 + $0x178] sm:$0xff]   ;;  %v6965_v30 = vld [vmem:[%s7433_s29 + $0x2c0] sm:$0xff]  }
0x1d6d   : > { %v7157_v56 = vpop.eup %7156  ;;  %v8277_v16 = vmul.f32 %v4268_v29, %v4172_v62  ;;  %v6966_v44 = vld [vmem:[%s7433_s29 + $0x200] sm:$0xff]   ;;  %v6968_v62 = vld [vmem:[%s7433_s29 + $0x248] sm:$0xff]  }
0x1d6e   : > { %v7159_v4 = vpop.eup %7158  ;;  %v4283_v47 = vadd.f32 1.0, %v7157_v56  ;;  %6461 = vmatpush3.bf16.msra.mxu1 %v6946_v11  ;;  %6483 = vmatpush3.bf16.msra.mxu0 %v6947_v12  ;;  %v8284_v6 = vmul.f32 %v4270_v34, %v4174_v63  ;;  %v6958_v12 = vld [vmem:[%s7433_s29 + $0x130] sm:$0xff]   ;;  %v6963_v56 = vld [vmem:[%s7433_s29 + $0x1b8] sm:$0xff]   ;;  %v6969_v29 = vld [vmem:[%s7433_s29 + $0x2c8] sm:$0xff]  }
0x1d6f   : > { %v7161_v61 = vpop.eup %7160  ;;  %v4285_v42 = vadd.f32 1.0, %v7159_v4  ;;  %6462 = vmatprep.subr.bf16.mxu1 %v6948_v37  ;;  %6484 = vmatprep.subr.bf16.mxu0 %v6949_v14  ;;  %v6959_v37 = vld [vmem:[%s7433_s29 + $0x1b0] sm:$0xff]   ;;  %v6962_v14 = vld [vmem:[%s7433_s29 + $0x138] sm:$0xff]   ;;  %v6967_v4 = vld [vmem:[%s7433_s29 + $0x280] sm:$0xff]  }
0x1d70   : > { %v7163_v10 = vpop.eup %7162  ;;  %v8268_v8 = vmul.f32 %v4283_v47, %v4187_v32  ;;  %v4284_v55 = vadd.f32 1.0, %v7161_v61  ;;  %v6970_v32 = vld [vmem:[%s7433_s29 + $0x208] sm:$0xff]  }
0x1d71   : > { %v8274_v1 = vmul.f32 %v4285_v42, %v4189_v46  ;;  %v4286_v24 = vadd.f32 1.0, %v7163_v10  ;;  %v6971_v47 = vld [vmem:[%s7433_s29 + $0x288] sm:$0xff]   ;;  %v6988_v46 = vld [vmem:[%s7433_s29 + $0x270] sm:$0xff]   ;;  %v6992_v10 = vld [vmem:[%s7433_s29 + $0x278] sm:$0xff]  }
0x1d72   : > { %v4331_v5 = vpack.c.bf16 %v8268_v8, %v8266_v51  ;;  %v8281_v27 = vmul.f32 %v4284_v55, %v4188_v28  ;;  %6463 = vmatpush3.bf16.msra.mxu1 %v6950_v3  ;;  %6485 = vmatpush3.bf16.msra.mxu0 %v6951_v38  ;;  %v6972_v3 = vld [vmem:[%s7433_s29 + $0x250] sm:$0xff]   ;;  %v6985_v61 = vld [vmem:[%s7433_s29 + $0x2e8] sm:$0xff]   ;;  %v6993_v28 = vld [vmem:[%s7433_s29 + $0x2f8] sm:$0xff]  }
0x1d73   : > { %v4333_v39 = vpack.c.bf16 %v8274_v1, %v8272_v18  ;;  %v8288_v20 = vmul.f32 %v4286_v24, %v4190_v36  ;;  %6464 = vmatprep.subr.bf16.mxu1 %v6952_v19  ;;  %6486 = vmatprep.subr.bf16.mxu0 %v6953_v40  ;;  %v6986_v63 = vld [vmem:[%s7433_s29 + $0x228] sm:$0xff]   ;;  %v6989_v42 = vld [vmem:[%s7433_s29 + $0x2f0] sm:$0xff]   ;;  %v6994_v55 = vld [vmem:[%s7433_s29 + $0x238] sm:$0xff]  }
0x1d74   : > { %v4332_v11 = vpack.c.bf16 %v8281_v27, %v8277_v16  ;;  %v6987_v34 = vld [vmem:[%s7433_s29 + $0x2a8] sm:$0xff]   ;;  %v6990_v38 = vld [vmem:[%s7433_s29 + $0x230] sm:$0xff]   ;;  %v6995_v40 = vld [vmem:[%s7433_s29 + $0x2b8] sm:$0xff]  }
0x1d75   : > { %v4334_v7 = vpack.c.bf16 %v8288_v20, %v8284_v6  ;;  %v6991_v19 = vld [vmem:[%s7433_s29 + $0x2b0] sm:$0xff]   ;;  %v6996_v36 = vld [vmem:[%s7433_s29 + $0x340] sm:$0xff]   ;;  %v7011_v16 = vld [vmem:[%s7433_s29 + $0x398] sm:$0xff]  }
0x1d76   : > { %6465 = vmatpush3.bf16.msra.mxu1 %v6954_v9  ;;  %6487 = vmatpush3.bf16.msra.mxu0 %v6955_v57  ;;  %v6997_v24 = vld [vmem:[%s7433_s29 + $0x3c0] sm:$0xff]  }
0x1d77   : > { %6466 = vmatprep.subr.bf16.mxu1 %v6956_v25  ;;  %6488 = vmatprep.subr.bf16.mxu0 %v6957_v0  ;;  %v6998_v9 = vld [vmem:[%s7433_s29 + $0x300] sm:$0xff]   ;;  %v7000_v25 = vld [vmem:[%s7433_s29 + $0x348] sm:$0xff]  }
0x1d78   : > { %v6999_v57 = vld [vmem:[%s7433_s29 + $0x380] sm:$0xff]   ;;  %v7001_v0 = vld [vmem:[%s7433_s29 + $0x3c8] sm:$0xff]  }
0x1d79   : > { %v7012_v27 = vld [vmem:[%s7433_s29 + $0x360] sm:$0xff]  }
0x1d7a   : > { %6467 = vmatpush3.bf16.msra.mxu1 %v6958_v12  ;;  %6489 = vmatpush3.bf16.msra.mxu0 %v6959_v37  ;;  %v7002_v12 = vld [vmem:[%s7433_s29 + $0x308] sm:$0xff]   ;;  %v7013_v6 = vld [vmem:[%s7433_s29 + $0x3e0] sm:$0xff]  }
0x1d7b   : > { %6468 = vmatprep.subr.bf16.mxu1 %v6960_v21  ;;  %6490 = vmatprep.subr.bf16.mxu0 %v6961_v45  ;;  %v7003_v37 = vld [vmem:[%s7433_s29 + $0x388] sm:$0xff]   ;;  %v7004_v21 = vld [vmem:[%s7433_s29 + $0x350] sm:$0xff]   ;;  %v7014_v20 = vld [vmem:[%s7433_s29 + $0x320] sm:$0xff]  }
0x1d7c   : > { %v7017_v45 = vld [vmem:[%s7433_s29 + $0x3e8] sm:$0xff]  }
0x1d7e   : > { %6469 = vmatpush3.bf16.msra.mxu1 %v6962_v14  ;;  %6491 = vmatpush3.bf16.msra.mxu0 %v6963_v56  ;;  %v7018_v14 = vld [vmem:[%s7433_s29 + $0x328] sm:$0xff]  }
0x1d7f   : > { %6498 = vmatprep.subr.bf16.mxu1 %v6964_v33  ;;  %6520 = vmatprep.subr.bf16.mxu0 %v6965_v30  ;;  %v7019_v56 = vld [vmem:[%s7433_s29 + $0x3a8] sm:$0xff]   ;;  %v7020_v33 = vld [vmem:[%s7433_s29 + $0x370] sm:$0xff]  }
0x1d80   : > { %v7021_v30 = vld [vmem:[%s7433_s29 + $0x3f0] sm:$0xff]  }
0x1d81   : > { %5481 = vmatmul.mubr.bf16.vlgmr.msra.gmra.mrb[104].mxu1 %v4323_v31  ;;  %5522 = vmatmul.mubr.bf16.vlgmr.msra.gmra.mrb[108].mxu0 %v4325_v2  ;;  %v6977_v31 = vld [vmem:[%s7433_s29 + $0x2d8] sm:$0xff]  }
0x1d82   : > { %6499 = vmatpush3.bf16.msra.mxu1 %v6966_v44  ;;  %5562 = vmatprep.mubr.bf16.mxu1 %v4328_v15  ;;  %v6978_v2 = vld [vmem:[%s7433_s29 + $0x218] sm:$0xff]   ;;  %v6983_v15 = vld [vmem:[%s7433_s29 + $0x2a0] sm:$0xff]   ;;  %v7022_v44 = vld [vmem:[%s7433_s29 + $0x330] sm:$0xff]  }
0x1d83   : > { %6521 = vmatpush3.bf16.msra.mxu0 %v6967_v4  ;;  %5603 = vmatprep.mubr.bf16.mxu0 %v4330_v41  ;;  %v6984_v41 = vld [vmem:[%s7433_s29 + $0x268] sm:$0xff]   ;;  %v7023_v4 = vld [vmem:[%s7433_s29 + $0x3b0] sm:$0xff]  }
0x1d84   : > { %6500 = vmatprep.subr.bf16.mxu1 %v6968_v62  ;;  %6522 = vmatprep.subr.bf16.mxu0 %v6969_v29  ;;  %v7024_v62 = vld [vmem:[%s7433_s29 + $0x378] sm:$0xff]  }
0x1d85   : > { %v7025_v29 = vld [vmem:[%s7433_s29 + $0x3f8] sm:$0xff]  }
0x1d86   : > { %6501 = vmatpush3.bf16.msra.mxu1 %v6970_v32  ;;  %v7026_v32 = vld [vmem:[%s7433_s29 + $0x338] sm:$0xff]  }
0x1d87   : > { %6523 = vmatpush3.bf16.msra.mxu0 %v6971_v47  ;;  %6502 = vmatprep.subr.bf16.mxu1 %v6972_v3  ;;  %v7027_v47 = vld [vmem:[%s7433_s29 + $0x3b8] sm:$0xff]  }
0x1d88   : > { %6524 = vmatprep.subr.bf16.mxu0 %v6973_v54 }
0x1d8a   : > { %6503 = vmatpush3.bf16.msra.mxu1 %v6974_v26  ;;  %v6174_v26 = vld [vmem:[%s8542_s23] ss:$0 sm:$0xff] }
0x1d8b   : > { %6525 = vmatpush3.bf16.msra.mxu0 %v6975_v60  ;;  %6504 = vmatprep.subr.bf16.mxu1 %v6976_v35 }
0x1d8c   : > { %6526 = vmatprep.subr.bf16.mxu0 %v6977_v31 }
0x1d8e   : > { %6505 = vmatpush3.bf16.msra.mxu1 %v6978_v2 }
0x1d8f   : > { %6527 = vmatpush3.bf16.msra.mxu0 %v6979_v23  ;;  %6506 = vmatprep.subr.bf16.mxu1 %v6980_v22 }
0x1d90   : > { %6528 = vmatprep.subr.bf16.mxu0 %v6981_v58 }
0x1d92   : > { %6507 = vmatpush3.bf16.msra.mxu1 %v6982_v43 }
0x1d93   : > { %6529 = vmatpush3.bf16.msra.mxu0 %v6983_v15  ;;  %6508 = vmatprep.subr.bf16.mxu1 %v6984_v41 }
0x1d94   : > { %6530 = vmatprep.subr.bf16.mxu0 %v6985_v61 }
0x1d96   : > { %6509 = vmatpush3.bf16.msra.mxu1 %v6986_v63 }
0x1d97   : > { %6531 = vmatpush3.bf16.msra.mxu0 %v6987_v34  ;;  %6510 = vmatprep.subr.bf16.mxu1 %v6988_v46 }
0x1d98   : > { %6532 = vmatprep.subr.bf16.mxu0 %v6989_v42 }
0x1d9a   : > { %6511 = vmatpush3.bf16.msra.mxu1 %v6990_v38 }
0x1d9b   : > { %6533 = vmatpush3.bf16.msra.mxu0 %v6991_v19  ;;  %6512 = vmatprep.subr.bf16.mxu1 %v6992_v10 }
0x1d9c   : > { %6534 = vmatprep.subr.bf16.mxu0 %v6993_v28 }
0x1d9e   : > { %6513 = vmatpush3.bf16.msra.mxu1 %v6994_v55 }
0x1d9f   : > { %6535 = vmatpush3.bf16.msra.mxu0 %v6995_v40  ;;  %6542 = vmatprep.subr.bf16.mxu1 %v6996_v36 }
0x1da0   : > { %6564 = vmatprep.subr.bf16.mxu0 %v6997_v24 }
0x1da1   : > { %5563 = vmatmul.mubr.bf16.vlgmr.msra.gmra.mrb[108].mxu1 %v4327_v17  ;;  %v7009_v17 = vld [vmem:[%s7433_s29 + $0x3d8] sm:$0xff]  }
0x1da2   : > { %5604 = vmatmul.mubr.bf16.vlgmr.msra.gmra.mrb[112].mxu0 %v4329_v59  ;;  %6543 = vmatpush3.bf16.msra.mxu1 %v6998_v9  ;;  %v7010_v59 = vld [vmem:[%s7433_s29 + $0x318] sm:$0xff]  }
0x1da3   : > { %5644 = vmatprep.mubr.bf16.mxu1 %v4332_v11  ;;  %6565 = vmatpush3.bf16.msra.mxu0 %v6999_v57  ;;  %v7015_v11 = vld [vmem:[%s7433_s29 + $0x3a0] sm:$0xff]  }
0x1da4   : > { %5685 = vmatprep.mubr.bf16.mxu0 %v4334_v7  ;;  %6544 = vmatprep.subr.bf16.mxu1 %v7000_v25  ;;  %v7016_v7 = vld [vmem:[%s7433_s29 + $0x368] sm:$0xff]  }
0x1da5   : > { %6566 = vmatprep.subr.bf16.mxu0 %v7001_v0 }
0x1da6   : > { %6545 = vmatpush3.bf16.msra.mxu1 %v7002_v12 }
0x1da7   : > { %6567 = vmatpush3.bf16.msra.mxu0 %v7003_v37  ;;  %6546 = vmatprep.subr.bf16.mxu1 %v7004_v21 }
0x1da8   : > { %6568 = vmatprep.subr.bf16.mxu0 %v7005_v53 }
0x1daa   : > { %6547 = vmatpush3.bf16.msra.mxu1 %v7006_v50 }
0x1dab   : > { %6569 = vmatpush3.bf16.msra.mxu0 %v7007_v52  ;;  %6548 = vmatprep.subr.bf16.mxu1 %v7008_v48 }
0x1dac   : > { %6570 = vmatprep.subr.bf16.mxu0 %v7009_v17 }
0x1dae   : > { %6549 = vmatpush3.bf16.msra.mxu1 %v7010_v59 }
0x1daf   : > { %6571 = vmatpush3.bf16.msra.mxu0 %v7011_v16  ;;  %6550 = vmatprep.subr.bf16.mxu1 %v7012_v27 }
0x1db0   : > { %6572 = vmatprep.subr.bf16.mxu0 %v7013_v6 }
0x1db2   : > { %6551 = vmatpush3.bf16.msra.mxu1 %v7014_v20 }
0x1db3   : > { %6573 = vmatpush3.bf16.msra.mxu0 %v7015_v11  ;;  %6552 = vmatprep.subr.bf16.mxu1 %v7016_v7 }
0x1db4   : > { %6574 = vmatprep.subr.bf16.mxu0 %v7017_v45 }
0x1db6   : > { %6553 = vmatpush3.bf16.msra.mxu1 %v7018_v14 }
0x1db7   : > { %6575 = vmatpush3.bf16.msra.mxu0 %v7019_v56  ;;  %6554 = vmatprep.subr.bf16.mxu1 %v7020_v33 }
0x1db8   : > { %6576 = vmatprep.subr.bf16.mxu0 %v7021_v30 }
0x1dba   : > { %6555 = vmatpush3.bf16.msra.mxu1 %v7022_v44 }
0x1dbb   : > { %6577 = vmatpush3.bf16.msra.mxu0 %v7023_v4  ;;  %6556 = vmatprep.subr.bf16.mxu1 %v7024_v62 }
0x1dbc   : > { %6578 = vmatprep.subr.bf16.mxu0 %v7025_v29 }
0x1dbe   : > { %6557 = vmatpush3.bf16.msra.mxu1 %v7026_v32 }
0x1dbf   : > { %6579 = vmatpush3.bf16.msra.mxu0 %v7027_v47 }
0x1dc1   : > { %5645 = vmatmul.mubr.bf16.vlgmr.msra.gmra.mrb[112].mxu1 %v4331_v5 }
0x1dc2   : > { %5686 = vmatmul.mubr.bf16.vlgmr.msra.gmra.mrb[116].mxu0 %v4333_v39 }
0x1e34   : > { %v6426_v3 = vpop.f32.mrb[100].mxu1  ;;  %v6448_v54 = vpop.f32.mrb[104].mxu0 }
0x1e35   : > { %v6427_v60 = vpop.f32.mrb[101].mxu1  ;;  %v6449_v31 = vpop.f32.mrb[105].mxu0 }
0x1e36   : > { %v6428_v35 = vadd.f32 %v6427_v60, %v6426_v3  ;;  %v6429_v2 = vpop.f32.mrb[102].mxu1  ;;  %v6450_v23 = vadd.f32 %v6449_v31, %v6448_v54  ;;  %v6451_v22 = vpop.f32.mrb[106].mxu0 }
0x1e37   : > { %v6430_v58 = vpop.f32.mrb[103].mxu1  ;;  %v6452_v5 = vpop.f32.mrb[107].mxu0 }
0x1e38   : > { %v5401_v51 = vadd.f32 %v6428_v35, %v6174_v26  ;;  %v6431_v8 = vadd.f32 %v6430_v58, %v6429_v2  ;;  %v6453_v43 = vadd.f32 %v6452_v5, %v6451_v22 }
0x1e3a   : > { %v5442_v18 = vadd.f32 %v6450_v23, %v5401_v51  ;;  %v5404_v1 = vadd.f32 %v6431_v8, %v6174_v26 }
0x1e3c   : > { %v5445_v39 = vadd.f32 %v6453_v43, %v5404_v1 }
0x1e54   : > { %v6470_v15 = vpop.f32.mrb[104].mxu1  ;;  %v6492_v41 = vpop.f32.mrb[108].mxu0 }
0x1e55   : > { %v6471_v61 = vpop.f32.mrb[105].mxu1  ;;  %v6493_v34 = vpop.f32.mrb[109].mxu0 }
0x1e56   : > { %v6472_v63 = vadd.f32 %v6471_v61, %v6470_v15  ;;  %v6473_v46 = vpop.f32.mrb[106].mxu1  ;;  %v6494_v42 = vadd.f32 %v6493_v34, %v6492_v41  ;;  %v6495_v38 = vpop.f32.mrb[110].mxu0 }
0x1e57   : > { %v6474_v19 = vpop.f32.mrb[107].mxu1  ;;  %v6496_v55 = vpop.f32.mrb[111].mxu0 }
0x1e58   : > { %v5483_v10 = vadd.f32 %v6472_v63, %v5442_v18  ;;  %v6475_v28 = vadd.f32 %v6474_v19, %v6473_v46  ;;  %v6497_v40 = vadd.f32 %v6496_v55, %v6495_v38  ;;  %v6303_v46 = vld [vmem:[%s1025_s6] ss:$0 sm:$0xff] }
0x1e59   : > { %v6304_v19 = vld [vmem:[%s1028_s2] ss:$0 sm:$0xff] }
0x1e5a   : > { %v5524_v36 = vadd.f32 %v6494_v42, %v5483_v10  ;;  %v5486_v24 = vadd.f32 %v6475_v28, %v5445_v39 }
0x1e5c   : > { %v5527_v9 = vadd.f32 %v6497_v40, %v5486_v24  ;;  %v7170_v24 = vld [vmem:[%s8545_s0] sm:$0xff] (!%p6305_p5)  }
0x1e74   : > { %v6514_v57 = vpop.f32.mrb[108].mxu1 }
0x1e75   : > { %v6536_v25 = vpop.f32.mrb[112].mxu0  ;;  %v6515_v0 = vpop.f32.mrb[109].mxu1 }
0x1e76   : > { %v6516_v12 = vadd.f32 %v6515_v0, %v6514_v57  ;;  %v6537_v37 = vpop.f32.mrb[113].mxu0  ;;  %v6517_v21 = vpop.f32.mrb[110].mxu1  ;;  %v7171_v57 = vld [vmem:[%s8545_s0 + $0x8] sm:$0xff] (!%p6305_p5)   ;;  %v6306_v0 = vld [vmem:[%s8546_s30] ss:$0 sm:$0xff] (!%p6305_p5) }
0x1e77   : > { %v6538_v53 = vadd.f32 %v6537_v37, %v6536_v25  ;;  %v6539_v50 = vpop.f32.mrb[114].mxu0  ;;  %v6518_v52 = vpop.f32.mrb[111].mxu1 }
0x1e78   : > { %v5565_v48 = vadd.f32 %v6516_v12, %v5524_v36  ;;  %v6519_v17 = vadd.f32 %v6518_v52, %v6517_v21  ;;  %v6540_v59 = vpop.f32.mrb[115].mxu0 }
0x1e79   : > { %v6541_v16 = vadd.f32 %v6540_v59, %v6539_v50 }
0x1e7a   : > { %v5606_v27 = vadd.f32 %v6538_v53, %v5565_v48  ;;  %v5568_v6 = vadd.f32 %v6519_v17, %v5527_v9  ;;  %v7224_v9 = vmov (!%p6305_p5), 0.0  }
0x1e7b   : > { %6853 = vmatprep.subr.bf16.mxu0 (!%p6305_p5), %v7224_v9  ;;  %6857 = vmatprep.mubr.msk.bf16.mxu0 (!%p6305_p5), %vm7225_vm6, %v7224_v9 }
0x1e7c   : > { %v5609_v20 = vadd.f32 %v6541_v16, %v5568_v6  ;;  %6854 = vmatpush3.bf16.msra.mxu0 (!%p6305_p5), %v7170_v24 }
0x1e7d   : > { %6855 = vmatprep.subr.bf16.mxu0 (!%p6305_p5), %v7224_v9 }
0x1e80   : > { %6856 = vmatpush3.bf16.msra.mxu0 (!%p6305_p5), %v7171_v57 }
0x1e94   : > { %v6558_v11 = vpop.f32.mrb[112].mxu1 }
0x1e95   : > { %v6580_v7 = vpop.f32.mrb[116].mxu0  ;;  %v6559_v45 = vpop.f32.mrb[113].mxu1 }
0x1e96   : > { %v6560_v14 = vadd.f32 %v6559_v45, %v6558_v11  ;;  %v6581_v56 = vpop.f32.mrb[117].mxu0  ;;  %v6561_v33 = vpop.f32.mrb[114].mxu1 }
0x1e97   : > { %v6582_v30 = vadd.f32 %v6581_v56, %v6580_v7  ;;  %v6583_v44 = vpop.f32.mrb[118].mxu0  ;;  %v6562_v4 = vpop.f32.mrb[115].mxu1 }
0x1e98   : > { %v5647_v62 = vadd.f32 %v6560_v14, %v5606_v27  ;;  %v6563_v29 = vadd.f32 %v6562_v4, %v6561_v33  ;;  %v6584_v32 = vpop.f32.mrb[119].mxu0 }
0x1e99   : > { %v6585_v47 = vadd.f32 %v6584_v32, %v6583_v44 }
0x1e9a   : > { %v5688_v3 = vadd.f32 %v6582_v30, %v5647_v62  ;;  %v5650_v54 = vadd.f32 %v6563_v29, %v5609_v20 }
0x1e9c   : > { %v5691_v26 = vadd.f32 %v6585_v47, %v5650_v54  ;;  %v5694_v60 = vadd.f32 %v5688_v3, %v7956_v13 }
0x1e9e   : > { %v5698_v35 = vsel %vm1074_vm2, %v5694_v60, 0.0  ;;  %v5695_v31 = vadd.f32 %v5691_v26, %v7958_v49 }
0x1e9f   : > { %5699 = vadd.xlane.f32.xlu1 %v5698_v35 }
0x1ea0   : > { %v5701_v2 = vsel %vm1074_vm2, %v5695_v31, 0.0 }
0x1ea1   : > { %5702 = vadd.xlane.f32.xlu0 %v5701_v2 }
0x1f2c   : > { %v5700_v23 = vpop.xlane.xlu1 %5699 }
0x1f2d   : > { %v5704_v22 = vmul.f32 0.03125, %v5700_v23 }
0x1f2e   : > { %v5703_v58 = vpop.xlane.xlu0 %5702 }
0x1f2f   : > { %v5706_v51 = vsub.f32 %v5694_v60, %v5704_v22  ;;  %v5705_v8 = vmul.f32 0.03125, %v5703_v58 }
0x1f31   : > { %v5707_v5 = vsub.f32 %v5695_v31, %v5705_v8  ;;  %v5708_v43 = vmul.f32 %v5706_v51, %v5706_v51 }
0x1f33   : > { %v5710_v18 = vsel %vm1074_vm2, %v5708_v43, 0.0  ;;  %v5709_v1 = vmul.f32 %v5707_v5, %v5707_v5 }
0x1f34   : > { %5711 = vadd.xlane.f32.xlu1 %v5710_v18 }
0x1f35   : > { %v5713_v13 = vsel %vm1074_vm2, %v5709_v1, 0.0 }
0x1f36   : > { %5714 = vadd.xlane.f32.xlu0 %v5713_v13 }
0x1fc1   : > { %v5712_v49 = vpop.xlane.xlu1 %5711 }
0x1fc2   : > { %v5716_v39 = vmul.f32 0.03125, %v5712_v49 }
0x1fc3   : > { %v5715_v15 = vpop.xlane.xlu0 %5714 }
0x1fc4   : > { %v5718_v41 = vadd.f32 1e-05, %v5716_v39  ;;  %v5717_v61 = vmul.f32 0.03125, %v5715_v15 }
0x1fc6   : > { %7164 = vrsqrt.f32 %v5718_v41  ;;  %v5719_v63 = vadd.f32 1e-05, %v5717_v61 }
0x1fc8   : > { %7166 = vrsqrt.f32 %v5719_v63 }
0x1fd0   : > { %v7165_v34 = vpop.eup %7164 }
0x1fd1   : > { %v5722_v42 = vmul.f32 %v7165_v34, %v5706_v51 }
0x1fd2   : > { %v7167_v38 = vpop.eup %7166 }
0x1fd3   : > { %v5730_v10 = vmul.f32 %v6303_v46, %v5722_v42  ;;  %v5723_v28 = vmul.f32 %v7167_v38, %v5707_v5  ;;  %5745 = sbr.rel (%p6305_p5) target bundleno = 8372 (0x20b4), region = 124 }
0x1fd5   : > { %v5738_v55 = vadd.f32 %v6304_v19, %v5730_v10  ;;  %v5731_v40 = vmul.f32 %v6303_v46, %v5723_v28 }
0x1fd7   : > { %5740 = vst.msk [vmem:[#allocation2] sm:$0xff] %vm1074_vm2, %v5738_v55  ;;  %v5739_v36 = vadd.f32 %v6304_v19, %v5731_v40 }
0x1fd9   : > { %5741 = vst.msk [vmem:[#allocation2 + $0x8] sm:$0xff] %vm1074_vm2, %v5739_v36  ;;  %v5746_v25 = vpack.c.bf16 (!%p6305_p5), %v5739_v36, %v5738_v55 }
0x1fdb   : > { %6858 = vmatmul.mubr.msk.bf16.vlgmr.msra.gmra.mrb[0].mxu0 %vm1074_vm2, %v5746_v25 }
0x20ae   : > { %v5807_v12 = vpop.f32.mrb[0].mxu0 }
0x20af   : > { %v5808_v37 = vadd.f32 %v6306_v0, %v5807_v12  ;;  %v6859_v21 = vpop.f32.mrb[1].mxu0 }
0x20b0   : > { %v5810_v53 = vpop.f32.mrb[2].mxu0 }
0x20b1   : > { %5814 = vst [vmem:[#allocation3] sm:$0xff] %v5808_v37  ;;  %v5811_v50 = vadd.f32 %v6306_v0, %v5810_v53  ;;  %v6860_v52 = vpop.f32.mrb[3].mxu0 }
0x20b3   : > { %5815 = vst [vmem:[#allocation3 + $0x8] sm:$0xff] %v5811_v50 }
0x20b4 PF: > { %s8547_s28 = sld [smem:[#allocation7_spill]]  ;;  %s7226_s13 = smov [#allocation3]  }
0x20b5   : > { %s5822_s14 = sshll.u32 %s7226_s13, 4  ;;  %s5823_s14 = int_to_ptr.vmem [resolvable:$true] %s5822_s14 }
0x20b6   : > { %s7172_s25 = scalar_lea.vmem %s5823_s14, 256  ;;  %p7179_p10 = scmp.lt.s32.totalorder %s5823_s14, %s5823_s14 }
0x20b7   : > { %p7173_p7 = scmp.ne.s32.totalorder %s5823_s14, %s7172_s25  ;;  %p7180_p11 = scmp.lt.s32.totalorder %s7172_s25, %s7172_s25 }
0x20b9   : > { %p7181_p12 = por %p7180_p11, %p7179_p10 }
0x20ba   : > { %p6865_p6 = scmp.eq.s32.totalorder %s8547_s28, 1 }
0x20bc   : > { %p7174_p8 = pnand %p7173_p7, %p6865_p6 }
0x20be   : > { %p7175_p9 = pneg %p7174_p8 }
0x20c0   : > { %p7182_p13 = pnand %p7181_p12, %p7175_p9 }
0x20c2   : > { %7185 = shalt.err (!%p7182_p13)
}
0x20c3   : > { %s8548_s23 = sld [smem:[#allocation27_spill]] }
0x20c9   : > { %s7186_s29 = scalar_lea.hbm %s8548_s23, 256 }
0x20ca   : > { %p7187_p0 = scmp.ne.s32.totalorder %s8548_s23, %s7186_s29  ;;  %p7192_p3 = scmp.lt.u32.totalorder %s7186_s29, %s8548_s23 }
0x20cc   : > { %p7188_p1 = pnand %p7187_p0, %p6865_p6 }
0x20ce   : > { %p7189_p2 = pneg %p7188_p1 }
0x20d0   : > { %p7194_p4 = pnand %p7192_p3, %p7189_p2 }
0x20d2   : > { %7197 = shalt.err (!%p7194_p4)
}
0x20d3   : > { %s7227_s3 = smov 128   ;;  %s7228_s6 = smov 8  }
0x20d4   : > { %6862 = dma.vmem_to_hbm [thread:$0]  (%p6865_p6), %s5823_s14, 256, %s8548_s23, [#allocation4], %s7227_s3, %s7227_s3, %s7228_s6  }
0x20d5   : > { %7203 = dma.done.wait (%p6865_p6), [#allocation4], 256  }
0x20d6   : > { %7205 = vsyncadd (%p6865_p6), [#allocation4], 4294967040 }
0x20d7 PF: > { %s8549_s2 = sld [smem:[#allocation6_spill]] }
0x20dd   : > { %s35_s5 = sadd.s32 1, %s8549_s2  }
0x20de   : > { %p32_p5 = scmp.ge.s32.totalorder %s35_s5, 4  }
0x20e0   :  { %34 = sbr.rel (!%p32_p5) target bundleno = 19 (0x13), region = 208 }
0x20e7   :  { %5838 = vsyncpa [#allocation4], 1 }
0x20e8   :  { %5840 = vsyncpa [#allocation4 + $0x1], 1 }

</bundles_post_ra>
